<compile_context>
chip_gen: v6e
topology: v6e:2x2x1
jax: 0.10.0
libtpu: 0.0.40
codegen_flags: <defaults>
</compile_context>

<pallas_src>
import functools

import jax
import jax.numpy as jnp
from jax.experimental import pallas as pl
from jax.experimental.pallas import tpu as pltpu

EPS = 1e-5
_LANE = 128                      # channel dims padded to this (lane-dense)
_TN = 128                        # output-column tile
_VMEM_LIMIT = 48 * 1024 * 1024   # headroom below v7x's 64 MiB physical VMEM


# ---------------------------------------------------------------------------
# small helpers (wrapper side)
# ---------------------------------------------------------------------------
def _round_up(x, m=_LANE):
    return (x + m - 1) // m * m


def _pad_last(a, target):
    pad = target - a.shape[-1]
    if pad == 0:
        return a
    return jnp.pad(a, [(0, 0)] * (a.ndim - 1) + [(0, pad)])


def _pad2d(a, rows, cols):
    return jnp.pad(a, ((0, rows - a.shape[0]), (0, cols - a.shape[1])))


def _pad_vec(v, target, value):
    pad = target - v.shape[0]
    if pad == 0:
        return v
    return jnp.pad(v, (0, pad), constant_values=value)


def _compiler_params():
    return pltpu.CompilerParams(
        dimension_semantics=("parallel",),   # column tiles are independent
        vmem_limit_bytes=_VMEM_LIMIT,
    )


# ---------------------------------------------------------------------------
# in-kernel helper: train-mode BN over rows of an (M, TN) f32 tile
# ---------------------------------------------------------------------------
def _bn_cols(y, g, b, inv_m):
    s1 = jnp.sum(y, axis=0, keepdims=True)
    s2 = jnp.sum(y * y, axis=0, keepdims=True)       # one-pass stats
    mu = s1 * inv_m
    var = s2 * inv_m - mu * mu                        # biased var, like torch
    scale = jax.lax.rsqrt(var + EPS) * g              # folded scale/shift
    shift = b - mu * scale
    return y * scale + shift


# ---------------------------------------------------------------------------
# kernels
# ---------------------------------------------------------------------------
def _matmul_bn_kernel(x_ref, w_ref, g_ref, b_ref, o_ref, *, apply_relu, inv_m):
    """1x1 conv (matmul) + BN + optional ReLU for one output-column tile."""
    y = jnp.dot(x_ref[...], w_ref[...], preferred_element_type=jnp.float32)
    y = _bn_cols(y, g_ref[...], b_ref[...], inv_m)
    if apply_relu:
        y = jnp.maximum(y, 0.0)
    o_ref[...] = y.astype(o_ref.dtype)


def _conv3x3_bn_relu_kernel(ph_ref, w_ref, g_ref, b_ref, o_ref, *,
                            n, ho, wo, stride, inv_m):
    """3x3 conv as 9 accumulated MXU matmuls over a resident padded input
    (no HBM im2col), + BN + ReLU, for one output-column tile."""
    m = n * ho * wo
    cp = ph_ref.shape[-1]
    acc = jnp.zeros((m, o_ref.shape[-1]), jnp.float32)
    for ky in range(3):
        for kx in range(3):
            if stride == 1:
                tap = ph_ref[:, ky:ky + ho, kx:kx + wo, :]
            else:  # stride == 2: phases pre-separated in the wrapper
                pidx = (ky % 2) * 2 + (kx % 2)
                dy, dx = ky // 2, kx // 2
                tap = ph_ref[pidx * n:(pidx + 1) * n,
                             dy:dy + ho, dx:dx + wo, :]
            # f32 round-trip keeps the leading-dim merge layout-trivial,
            # then repack to bf16 for the MXU (exact).
            tap2d = tap.astype(jnp.float32).reshape(m, cp).astype(jnp.bfloat16)
            acc = acc + jnp.dot(tap2d, w_ref[ky * 3 + kx],
                                preferred_element_type=jnp.float32)
    y = jnp.maximum(_bn_cols(acc, g_ref[...], b_ref[...], inv_m), 0.0)
    o_ref[...] = y.astype(o_ref.dtype)


def _final_proj_kernel(h_ref, w3_ref, g3_ref, b3_ref,
                       xs_ref, ws_ref, gs_ref, bs_ref, o_ref, *, inv_m):
    """conv3+BN3 fused with projection-shortcut conv+BN, add, final ReLU."""
    y = jnp.dot(h_ref[...], w3_ref[...], preferred_element_type=jnp.float32)
    y = _bn_cols(y, g3_ref[...], b3_ref[...], inv_m)
    s = jnp.dot(xs_ref[...], ws_ref[...], preferred_element_type=jnp.float32)
    s = _bn_cols(s, gs_ref[...], bs_ref[...], inv_m)
    o_ref[...] = jnp.maximum(y + s, 0.0).astype(o_ref.dtype)


def _final_identity_kernel(h_ref, w3_ref, g3_ref, b3_ref, s_ref, o_ref, *,
                           inv_m):
    """conv3+BN3 + identity shortcut add + final ReLU."""
    y = jnp.dot(h_ref[...], w3_ref[...], preferred_element_type=jnp.float32)
    y = _bn_cols(y, g3_ref[...], b3_ref[...], inv_m)
    o_ref[...] = jnp.maximum(y + s_ref[...].astype(jnp.float32),
                             0.0).astype(o_ref.dtype)


# ---------------------------------------------------------------------------
# pallas_call wrappers (column-tiled grids, activations resident)
# ---------------------------------------------------------------------------
def _conv1x1_bn(x2d, w, gamma, beta, *, relu, out_dtype):
    m, k = x2d.shape
    np_ = w.shape[1]
    tn = min(_TN, np_)
    kern = functools.partial(_matmul_bn_kernel, apply_relu=relu, inv_m=1.0 / m)
    return pl.pallas_call(
        kern,
        out_shape=jax.ShapeDtypeStruct((m, np_), out_dtype),
        grid=(np_ // tn,),
        in_specs=[
            pl.BlockSpec((m, k), lambda j: (0, 0)),     # resident activations
            pl.BlockSpec((k, tn), lambda j: (0, j)),
            pl.BlockSpec((1, tn), lambda j: (0, j)),
            pl.BlockSpec((1, tn), lambda j: (0, j)),
        ],
        out_specs=pl.BlockSpec((m, tn), lambda j: (0, j)),
        compiler_params=_compiler_params(),
    )(x2d, w, gamma.reshape(1, np_), beta.reshape(1, np_))


def _conv3x3_bn_relu(ph, w2, gamma, beta, *, n, ho, wo, stride, out_dtype):
    pn, hp, wp, cp = ph.shape
    np_ = w2.shape[2]
    tn = min(_TN, np_)
    m = n * ho * wo
    kern = functools.partial(_conv3x3_bn_relu_kernel,
                             n=n, ho=ho, wo=wo, stride=stride, inv_m=1.0 / m)
    return pl.pallas_call(
        kern,
        out_shape=jax.ShapeDtypeStruct((m, np_), out_dtype),
        grid=(np_ // tn,),
        in_specs=[
            pl.BlockSpec((pn, hp, wp, cp), lambda j: (0, 0, 0, 0)),  # resident
            pl.BlockSpec((9, cp, tn), lambda j: (0, 0, j)),
            pl.BlockSpec((1, tn), lambda j: (0, j)),
            pl.BlockSpec((1, tn), lambda j: (0, j)),
        ],
        out_specs=pl.BlockSpec((m, tn), lambda j: (0, j)),
        compiler_params=_compiler_params(),
    )(ph, w2, gamma.reshape(1, np_), beta.reshape(1, np_))


def _final_proj(h2, w3, g3, b3, xs, ws, gs, bs):
    m, k1 = h2.shape
    k2 = xs.shape[1]
    np_ = w3.shape[1]
    tn = min(_TN, np_)
    kern = functools.partial(_final_proj_kernel, inv_m=1.0 / m)
    return pl.pallas_call(
        kern,
        out_shape=jax.ShapeDtypeStruct((m, np_), jnp.float32),
        grid=(np_ // tn,),
        in_specs=[
            pl.BlockSpec((m, k1), lambda j: (0, 0)),
            pl.BlockSpec((k1, tn), lambda j: (0, j)),
            pl.BlockSpec((1, tn), lambda j: (0, j)),
            pl.BlockSpec((1, tn), lambda j: (0, j)),
            pl.BlockSpec((m, k2), lambda j: (0, 0)),
            pl.BlockSpec((k2, tn), lambda j: (0, j)),
            pl.BlockSpec((1, tn), lambda j: (0, j)),
            pl.BlockSpec((1, tn), lambda j: (0, j)),
        ],
        out_specs=pl.BlockSpec((m, tn), lambda j: (0, j)),
        compiler_params=_compiler_params(),
    )(h2, w3, g3.reshape(1, np_), b3.reshape(1, np_),
      xs, ws, gs.reshape(1, np_), bs.reshape(1, np_))


def _final_identity(h2, w3, g3, b3, sc):
    m, k1 = h2.shape
    np_ = w3.shape[1]
    tn = min(_TN, np_)
    kern = functools.partial(_final_identity_kernel, inv_m=1.0 / m)
    return pl.pallas_call(
        kern,
        out_shape=jax.ShapeDtypeStruct((m, np_), jnp.float32),
        grid=(np_ // tn,),
        in_specs=[
            pl.BlockSpec((m, k1), lambda j: (0, 0)),
            pl.BlockSpec((k1, tn), lambda j: (0, j)),
            pl.BlockSpec((1, tn), lambda j: (0, j)),
            pl.BlockSpec((1, tn), lambda j: (0, j)),
            pl.BlockSpec((m, tn), lambda j: (0, j)),
        ],
        out_specs=pl.BlockSpec((m, tn), lambda j: (0, j)),
        compiler_params=_compiler_params(),
    )(h2, w3, g3.reshape(1, np_), b3.reshape(1, np_), sc)


# ---------------------------------------------------------------------------
# wrapper-side prep for the 3x3 conv (spatial pad + stride-phase split)
# ---------------------------------------------------------------------------
def _conv2_input(h1_nhwc, stride):
    """Zero-pad spatially (pad=1); for stride=2 split into 4 stride phases so
    all 9 in-kernel taps become contiguous static slices (no im2col copy)."""
    n, h, w, cp = h1_nhwc.shape
    ho = (h + 2 - 3) // stride + 1
    wo = (w + 2 - 3) // stride + 1
    hp = jnp.pad(h1_nhwc, ((0, 0), (1, 1), (1, 1), (0, 0)))
    if stride == 1:
        return hp, ho, wo
    assert stride == 2 and h % 2 == 0 and w % 2 == 0, (
        "stride-2 path assumes even spatial dims")
    hpad, wpad = h + 2, w + 2
    ph = hp.reshape(n, hpad // 2, 2, wpad // 2, 2, cp)
    ph = ph.transpose(2, 4, 0, 1, 3, 5).reshape(4 * n, hpad // 2, wpad // 2, cp)
    return ph, ho, wo


# ---------------------------------------------------------------------------
# BottleNeck forward (Pallas path)
# ---------------------------------------------------------------------------
def bottleneck_forward(x_nchw, params, stride):
    n, cin, h, w = x_nchw.shape
    cout = params["w1"].shape[0]
    cexp = 4 * cout
    cin_p, cmid_p, cexp_p = _round_up(cin), _round_up(cout), _round_up(cexp)

    # NCHW -> NHWC + bf16 cast + lane padding (fused by XLA into one pass).
    x_nhwc = _pad_last(
        jnp.transpose(x_nchw, (0, 2, 3, 1)).astype(jnp.bfloat16), cin_p)

    # ---- conv1 (1x1) + BN + ReLU -----------------------------------------
    x2d = x_nhwc.reshape(n * h * w, cin_p)
    w1 = _pad2d(params["w1"].reshape(cout, cin).T,
                cin_p, cmid_p).astype(jnp.bfloat16)
    g1 = _pad_vec(params["g1"], cmid_p, 1.0)
    b1 = _pad_vec(params["b1"], cmid_p, 0.0)
    h1 = _conv1x1_bn(x2d, w1, g1, b1, relu=True, out_dtype=jnp.bfloat16)

    # ---- conv2 (3x3, stride, pad=1) + BN + ReLU (fused 9-tap matmul) ------
    ph, ho, wo = _conv2_input(h1.reshape(n, h, w, cmid_p), stride)
    w2 = jnp.transpose(params["w2"], (2, 3, 1, 0)).reshape(9, cout, cout)
    w2 = jnp.pad(w2, ((0, 0), (0, cmid_p - cout),
                      (0, cmid_p - cout))).astype(jnp.bfloat16)
    g2 = _pad_vec(params["g2"], cmid_p, 1.0)
    b2 = _pad_vec(params["b2"], cmid_p, 0.0)
    h2 = _conv3x3_bn_relu(ph, w2, g2, b2, n=n, ho=ho, wo=wo, stride=stride,
                          out_dtype=jnp.bfloat16)

    # ---- conv3 (1x1) + BN + shortcut + ReLU (single fused kernel) ---------
    w3 = _pad2d(params["w3"].reshape(cexp, cout).T,
                cmid_p, cexp_p).astype(jnp.bfloat16)
    g3 = _pad_vec(params["g3"], cexp_p, 1.0)
    b3 = _pad_vec(params["b3"], cexp_p, 0.0)

    if stride != 1 or cin != cexp:
        # TODO(synk): the stride-s subsample of x is done by XLA in the wrapper
        # (one extra activation pass); could be folded into the kernel.
        xs = x_nhwc[:, ::stride, ::stride, :].reshape(n * ho * wo, cin_p)
        ws = _pad2d(params["ws"].reshape(cexp, cin).T,
                    cin_p, cexp_p).astype(jnp.bfloat16)
        gs = _pad_vec(params["gs"], cexp_p, 1.0)
        bs = _pad_vec(params["bs"], cexp_p, 0.0)
        out2d = _final_proj(h2, w3, g3, b3, xs, ws, gs, bs)
    else:
        sc = x_nhwc.reshape(n * h * w, cexp_p)       # cin_p == cexp_p here
        out2d = _final_identity(h2, w3, g3, b3, sc)

    out = out2d.reshape(n, ho, wo, cexp_p)[..., :cexp]
    return jnp.transpose(out, (0, 3, 1, 2))          # back to NCHW (f32)


# ---------------------------------------------------------------------------
# Pure-JAX reference (correctness check only)
# ---------------------------------------------------------------------------
def bottleneck_reference(x, params, stride):
    def conv(x, w, s, p):
        return jax.lax.conv_general_dilated(
            x, w, (s, s), [(p, p), (p, p)],
            dimension_numbers=("NCHW", "OIHW", "NCHW"),
            precision=jax.lax.Precision.HIGHEST)

    def bn(x, g, b):
        mu = jnp.mean(x, axis=(0, 2, 3), keepdims=True)
        var = jnp.mean((x - mu) ** 2, axis=(0, 2, 3), keepdims=True)
        return ((x - mu) * jax.lax.rsqrt(var + EPS)
                * g[None, :, None, None] + b[None, :, None, None])

    r = conv(x, params["w1"], 1, 0)
    r = jnp.maximum(bn(r, params["g1"], params["b1"]), 0.0)
    r = conv(r, params["w2"], stride, 1)
    r = jnp.maximum(bn(r, params["g2"], params["b2"]), 0.0)
    r = conv(r, params["w3"], 1, 0)
    r = bn(r, params["g3"], params["b3"])
    cexp = params["w3"].shape[0]
    if stride != 1 or x.shape[1] != cexp:
        s = conv(x, params["ws"], stride, 0)
        s = bn(s, params["gs"], params["bs"])
    else:
        s = x
    return jnp.maximum(r + s, 0.0)


# ---------------------------------------------------------------------------
def _make_params(key, cin, cout):
    cexp = 4 * cout
    ks = jax.random.split(key, 12)
    p = {
        "w1": 0.2 * jax.random.normal(ks[0], (cout, cin, 1, 1), jnp.float32),
        "g1": 1.0 + 0.1 * jax.random.normal(ks[1], (cout,), jnp.float32),
        "b1": 0.1 * jax.random.normal(ks[2], (cout,), jnp.float32),
        "w2": 0.2 * jax.random.normal(ks[3], (cout, cout, 3, 3), jnp.float32),
        "g2": 1.0 + 0.1 * jax.random.normal(ks[4], (cout,), jnp.float32),
        "b2": 0.1 * jax.random.normal(ks[5], (cout,), jnp.float32),
        "w3": 0.2 * jax.random.normal(ks[6], (cexp, cout, 1, 1), jnp.float32),
        "g3": 1.0 + 0.1 * jax.random.normal(ks[7], (cexp,), jnp.float32),
        "b3": 0.1 * jax.random.normal(ks[8], (cexp,), jnp.float32),
        "ws": 0.2 * jax.random.normal(ks[9], (cexp, cin, 1, 1), jnp.float32),
        "gs": 1.0 + 0.1 * jax.random.normal(ks[10], (cexp,), jnp.float32),
        "bs": 0.1 * jax.random.normal(ks[11], (cexp,), jnp.float32),
    }
    # Round operands to bf16-representable values so the f32 reference and the
    # bf16 kernel path see identical inputs; remaining differences come only
    # from the bf16 inter-stage activations.
    return {k: v.astype(jnp.bfloat16).astype(jnp.float32) for k, v in p.items()}


if __name__ == "__main__":
    fwd = jax.jit(bottleneck_forward, static_argnames=("stride",))

    cases = [
        # (name, in_channels, out_channels, stride, n, h, w)
        ("projection/stride2", 4, 4, 2, 2, 16, 16),
        ("identity/stride1", 16, 4, 1, 2, 16, 16),
    ]
    for name, cin, cout, stride, n, h, w in cases:
        kp, kx = jax.random.split(jax.random.PRNGKey(0))
        params = _make_params(kp, cin, cout)
        x = jax.random.normal(kx, (n, cin, h, w), jnp.float32)
        x = x.astype(jnp.bfloat16).astype(jnp.float32)

        out = jax.block_until_ready(fwd(x, params, stride=stride))
        ref = bottleneck_reference(x, params, stride)

        assert out.shape == ref.shape, (name, out.shape, ref.shape)
        max_err = float(jnp.max(jnp.abs(out - ref)))
        # tolerance sized for bf16 inter-stage activations across 3 BN stages
        if not jnp.allclose(out, ref, atol=4e-2, rtol=4e-2):
            raise AssertionError(
                f"{name}: mismatch vs reference, max abs err = {max_err}")
    print("KERNEL_OK")
</pallas_src>

<mosaic_0001>
module attributes {stable_mosaic.version = 11 : i64} {
  func.func @_matmul_bn_kernel(%arg0: i32, %arg1: memref<512x128xbf16, #tpu.memory_space<vmem>>, %arg2: memref<128x128xbf16, #tpu.memory_space<vmem>>, %arg3: memref<1x128xf32, #tpu.memory_space<vmem>>, %arg4: memref<1x128xf32, #tpu.memory_space<vmem>>, %arg5: memref<512x128xbf16, #tpu.memory_space<vmem>>) attributes {dimension_semantics = [#tpu.dimension_semantics<parallel>], iteration_bounds = array<i64: 1>, scalar_prefetch = 0 : i64, scratch_operands = 0 : i64, tpu.core_type = #tpu.core_type<tc>, window_params = [{pipeline_mode = #tpu.pipeline_mode<synchronous>, transform_indices = @transform_0, window_bounds = array<i64: 512, 128>}, {transform_indices = @transform_1, window_bounds = array<i64: 128, 128>}, {transform_indices = @transform_2, window_bounds = array<i64: 1, 128>}, {transform_indices = @transform_3, window_bounds = array<i64: 1, 128>}, {transform_indices = @transform_4, window_bounds = array<i64: 512, 128>}]} {
    %c0 = arith.constant 0 : index
    %c0_0 = arith.constant 0 : index
    %0 = vector.load %arg1[%c0, %c0_0] : memref<512x128xbf16, #tpu.memory_space<vmem>>, vector<512x128xbf16>
    %c0_1 = arith.constant 0 : index
    %c0_2 = arith.constant 0 : index
    %1 = vector.load %arg2[%c0_1, %c0_2] : memref<128x128xbf16, #tpu.memory_space<vmem>>, vector<128x128xbf16>
    %cst = arith.constant dense<0.000000e+00> : vector<512x128xf32>
    %2 = tpu.matmul %0, %1, %cst {dimension_numbers = #tpu.dot_dimension_numbers<[1], [0], [0], [1], [0, 0, 1, 1], [], []>} : vector<512x128xbf16>, vector<128x128xbf16>, vector<512x128xf32> -> vector<512x128xf32>
    %c0_3 = arith.constant 0 : index
    %c0_4 = arith.constant 0 : index
    %3 = vector.load %arg3[%c0_3, %c0_4] : memref<1x128xf32, #tpu.memory_space<vmem>>, vector<1x128xf32>
    %c0_5 = arith.constant 0 : index
    %c0_6 = arith.constant 0 : index
    %4 = vector.load %arg4[%c0_5, %c0_6] : memref<1x128xf32, #tpu.memory_space<vmem>>, vector<1x128xf32>
    %cst_7 = arith.constant dense<0.000000e+00> : vector<128xf32>
    %5 = vector.multi_reduction <add>, %2, %cst_7 [0] : vector<512x128xf32> to vector<128xf32>
    %6 = vector.shape_cast %5 : vector<128xf32> to vector<1x128xf32>
    %7 = arith.mulf %2, %2 : vector<512x128xf32>
    %cst_8 = arith.constant dense<0.000000e+00> : vector<128xf32>
    %8 = vector.multi_reduction <add>, %7, %cst_8 [0] : vector<512x128xf32> to vector<128xf32>
    %9 = vector.shape_cast %8 : vector<128xf32> to vector<1x128xf32>
    %cst_9 = arith.constant 0.001953125 : f32
    %10 = vector.broadcast %cst_9 : f32 to vector<1x128xf32>
    %11 = arith.mulf %6, %10 : vector<1x128xf32>
    %cst_10 = arith.constant 0.001953125 : f32
    %12 = vector.broadcast %cst_10 : f32 to vector<1x128xf32>
    %13 = arith.mulf %9, %12 : vector<1x128xf32>
    %14 = arith.mulf %11, %11 : vector<1x128xf32>
    %15 = arith.subf %13, %14 : vector<1x128xf32>
    %cst_11 = arith.constant 9.99999974E-6 : f32
    %16 = vector.broadcast %cst_11 : f32 to vector<1x128xf32>
    %17 = arith.addf %15, %16 : vector<1x128xf32>
    %18 = math.rsqrt %17 : vector<1x128xf32>
    %19 = arith.mulf %18, %3 : vector<1x128xf32>
    %20 = arith.mulf %11, %19 : vector<1x128xf32>
    %21 = arith.subf %4, %20 : vector<1x128xf32>
    %22 = vector.broadcast %19 : vector<1x128xf32> to vector<512x128xf32>
    %23 = arith.mulf %2, %22 : vector<512x128xf32>
    %24 = vector.broadcast %21 : vector<1x128xf32> to vector<512x128xf32>
    %25 = arith.addf %23, %24 : vector<512x128xf32>
    %cst_12 = arith.constant 0.000000e+00 : f32
    %26 = vector.broadcast %cst_12 : f32 to vector<512x128xf32>
    %27 = arith.maximumf %25, %26 : vector<512x128xf32>
    %28 = arith.truncf %27 : vector<512x128xf32> to vector<512x128xbf16>
    %c0_13 = arith.constant 0 : index
    %c0_14 = arith.constant 0 : index
    %29 = vector.load %arg5[%c0_13, %c0_14] : memref<512x128xbf16, #tpu.memory_space<vmem>>, vector<512x128xbf16>
    tpu.vector_store %arg5[%c0_13, %c0_14], %28 {strides = array<i32>} : memref<512x128xbf16, #tpu.memory_space<vmem>>, vector<512x128xbf16>,
    return
  }
  func.func @transform_0(%arg0: i32) -> (i32, i32) {
    %c0_i32 = arith.constant 0 : i32
    %c0_i32_0 = arith.constant 0 : i32
    %c0_i32_1 = arith.constant 0 : i32
    return %c0_i32, %c0_i32_0 : i32, i32
  }
  func.func @transform_1(%arg0: i32) -> (i32, i32) {
    %c0_i32 = arith.constant 0 : i32
    %c0_i32_0 = arith.constant 0 : i32
    return %c0_i32, %arg0 : i32, i32
  }
  func.func @transform_2(%arg0: i32) -> (i32, i32) {
    %c0_i32 = arith.constant 0 : i32
    %c0_i32_0 = arith.constant 0 : i32
    return %c0_i32, %arg0 : i32, i32
  }
  func.func @transform_3(%arg0: i32) -> (i32, i32) {
    %c0_i32 = arith.constant 0 : i32
    %c0_i32_0 = arith.constant 0 : i32
    return %c0_i32, %arg0 : i32, i32
  }
  func.func @transform_4(%arg0: i32) -> (i32, i32) {
    %c0_i32 = arith.constant 0 : i32
    %c0_i32_0 = arith.constant 0 : i32
    return %c0_i32, %arg0 : i32, i32
  }
}

module attributes {stable_mosaic.version = 11 : i64} {
  func.func @_conv3x3_bn_relu_kernel(%arg0: i32, %arg1: memref<8x9x9x128xbf16, #tpu.memory_space<vmem>>, %arg2: memref<9x128x128xbf16, #tpu.memory_space<vmem>>, %arg3: memref<1x128xf32, #tpu.memory_space<vmem>>, %arg4: memref<1x128xf32, #tpu.memory_space<vmem>>, %arg5: memref<128x128xbf16, #tpu.memory_space<vmem>>) attributes {dimension_semantics = [#tpu.dimension_semantics<parallel>], iteration_bounds = array<i64: 1>, scalar_prefetch = 0 : i64, scratch_operands = 0 : i64, tpu.core_type = #tpu.core_type<tc>, window_params = [{pipeline_mode = #tpu.pipeline_mode<synchronous>, transform_indices = @transform_0, window_bounds = array<i64: 8, 9, 9, 128>}, {transform_indices = @transform_1, window_bounds = array<i64: 9, 128, 128>}, {transform_indices = @transform_2, window_bounds = array<i64: 1, 128>}, {transform_indices = @transform_3, window_bounds = array<i64: 1, 128>}, {transform_indices = @transform_4, window_bounds = array<i64: 128, 128>}]} {
    %cst = arith.constant 0.000000e+00 : f32
    %0 = vector.broadcast %cst : f32 to vector<128x128xf32>
    %c0 = arith.constant 0 : index
    %c0_0 = arith.constant 0 : index
    %c0_1 = arith.constant 0 : index
    %c0_2 = arith.constant 0 : index
    %1 = vector.load %arg1[%c0, %c0_0, %c0_1, %c0_2] : memref<8x9x9x128xbf16, #tpu.memory_space<vmem>>, vector<2x8x8x128xbf16>
    %2 = arith.extf %1 : vector<2x8x8x128xbf16> to vector<2x8x8x128xf32>
    %3 = vector.shape_cast %2 : vector<2x8x8x128xf32> to vector<128x128xf32>
    %4 = arith.truncf %3 : vector<128x128xf32> to vector<128x128xbf16>
    %c0_3 = arith.constant 0 : index
    %c0_4 = arith.constant 0 : index
    %c0_5 = arith.constant 0 : index
    %5 = vector.load %arg2[%c0_3, %c0_4, %c0_5] : memref<9x128x128xbf16, #tpu.memory_space<vmem>>, vector<1x128x128xbf16>
    %6 = vector.shape_cast %5 : vector<1x128x128xbf16> to vector<128x128xbf16>
    %cst_6 = arith.constant dense<0.000000e+00> : vector<128x128xf32>
    %7 = tpu.matmul %4, %6, %cst_6 {dimension_numbers = #tpu.dot_dimension_numbers<[1], [0], [0], [1], [0, 0, 1, 1], [], []>} : vector<128x128xbf16>, vector<128x128xbf16>, vector<128x128xf32> -> vector<128x128xf32>
    %8 = arith.addf %0, %7 : vector<128x128xf32>
    %c2 = arith.constant 2 : index
    %c0_7 = arith.constant 0 : index
    %c0_8 = arith.constant 0 : index
    %c0_9 = arith.constant 0 : index
    %9 = vector.load %arg1[%c2, %c0_7, %c0_8, %c0_9] : memref<8x9x9x128xbf16, #tpu.memory_space<vmem>>, vector<2x8x8x128xbf16>
    %10 = arith.extf %9 : vector<2x8x8x128xbf16> to vector<2x8x8x128xf32>
    %11 = vector.shape_cast %10 : vector<2x8x8x128xf32> to vector<128x128xf32>
    %12 = arith.truncf %11 : vector<128x128xf32> to vector<128x128xbf16>
    %c1 = arith.constant 1 : index
    %c0_10 = arith.constant 0 : index
    %c0_11 = arith.constant 0 : index
    %13 = vector.load %arg2[%c1, %c0_10, %c0_11] : memref<9x128x128xbf16, #tpu.memory_space<vmem>>, vector<1x128x128xbf16>
    %14 = vector.shape_cast %13 : vector<1x128x128xbf16> to vector<128x128xbf16>
    %cst_12 = arith.constant dense<0.000000e+00> : vector<128x128xf32>
    %15 = tpu.matmul %12, %14, %cst_12 {dimension_numbers = #tpu.dot_dimension_numbers<[1], [0], [0], [1], [0, 0, 1, 1], [], []>} : vector<128x128xbf16>, vector<128x128xbf16>, vector<128x128xf32> -> vector<128x128xf32>
    %16 = arith.addf %8, %15 : vector<128x128xf32>
    %c0_13 = arith.constant 0 : index
    %c0_14 = arith.constant 0 : index
    %c1_15 = arith.constant 1 : index
    %c0_16 = arith.constant 0 : index
    %17 = vector.load %arg1[%c0_13, %c0_14, %c1_15, %c0_16] : memref<8x9x9x128xbf16, #tpu.memory_space<vmem>>, vector<2x8x8x128xbf16>
    %18 = arith.extf %17 : vector<2x8x8x128xbf16> to vector<2x8x8x128xf32>
    %19 = vector.shape_cast %18 : vector<2x8x8x128xf32> to vector<128x128xf32>
    %20 = arith.truncf %19 : vector<128x128xf32> to vector<128x128xbf16>
    %c2_17 = arith.constant 2 : index
    %c0_18 = arith.constant 0 : index
    %c0_19 = arith.constant 0 : index
    %21 = vector.load %arg2[%c2_17, %c0_18, %c0_19] : memref<9x128x128xbf16, #tpu.memory_space<vmem>>, vector<1x128x128xbf16>
    %22 = vector.shape_cast %21 : vector<1x128x128xbf16> to vector<128x128xbf16>
    %cst_20 = arith.constant dense<0.000000e+00> : vector<128x128xf32>
    %23 = tpu.matmul %20, %22, %cst_20 {dimension_numbers = #tpu.dot_dimension_numbers<[1], [0], [0], [1], [0, 0, 1, 1], [], []>} : vector<128x128xbf16>, vector<128x128xbf16>, vector<128x128xf32> -> vector<128x128xf32>
    %24 = arith.addf %16, %23 : vector<128x128xf32>
    %c4 = arith.constant 4 : index
    %c0_21 = arith.constant 0 : index
    %c0_22 = arith.constant 0 : index
    %c0_23 = arith.constant 0 : index
    %25 = vector.load %arg1[%c4, %c0_21, %c0_22, %c0_23] : memref<8x9x9x128xbf16, #tpu.memory_space<vmem>>, vector<2x8x8x128xbf16>
    %26 = arith.extf %25 : vector<2x8x8x128xbf16> to vector<2x8x8x128xf32>
    %27 = vector.shape_cast %26 : vector<2x8x8x128xf32> to vector<128x128xf32>
    %28 = arith.truncf %27 : vector<128x128xf32> to vector<128x128xbf16>
    %c3 = arith.constant 3 : index
    %c0_24 = arith.constant 0 : index
    %c0_25 = arith.constant 0 : index
    %29 = vector.load %arg2[%c3, %c0_24, %c0_25] : memref<9x128x128xbf16, #tpu.memory_space<vmem>>, vector<1x128x128xbf16>
    %30 = vector.shape_cast %29 : vector<1x128x128xbf16> to vector<128x128xbf16>
    %cst_26 = arith.constant dense<0.000000e+00> : vector<128x128xf32>
    %31 = tpu.matmul %28, %30, %cst_26 {dimension_numbers = #tpu.dot_dimension_numbers<[1], [0], [0], [1], [0, 0, 1, 1], [], []>} : vector<128x128xbf16>, vector<128x128xbf16>, vector<128x128xf32> -> vector<128x128xf32>
    %32 = arith.addf %24, %31 : vector<128x128xf32>
    %c6 = arith.constant 6 : index
    %c0_27 = arith.constant 0 : index
    %c0_28 = arith.constant 0 : index
    %c0_29 = arith.constant 0 : index
    %33 = vector.load %arg1[%c6, %c0_27, %c0_28, %c0_29] : memref<8x9x9x128xbf16, #tpu.memory_space<vmem>>, vector<2x8x8x128xbf16>
    %34 = arith.extf %33 : vector<2x8x8x128xbf16> to vector<2x8x8x128xf32>
    %35 = vector.shape_cast %34 : vector<2x8x8x128xf32> to vector<128x128xf32>
    %36 = arith.truncf %35 : vector<128x128xf32> to vector<128x128xbf16>
    %c4_30 = arith.constant 4 : index
    %c0_31 = arith.constant 0 : index
    %c0_32 = arith.constant 0 : index
    %37 = vector.load %arg2[%c4_30, %c0_31, %c0_32] : memref<9x128x128xbf16, #tpu.memory_space<vmem>>, vector<1x128x128xbf16>
    %38 = vector.shape_cast %37 : vector<1x128x128xbf16> to vector<128x128xbf16>
    %cst_33 = arith.constant dense<0.000000e+00> : vector<128x128xf32>
    %39 = tpu.matmul %36, %38, %cst_33 {dimension_numbers = #tpu.dot_dimension_numbers<[1], [0], [0], [1], [0, 0, 1, 1], [], []>} : vector<128x128xbf16>, vector<128x128xbf16>, vector<128x128xf32> -> vector<128x128xf32>
    %40 = arith.addf %32, %39 : vector<128x128xf32>
    %c4_34 = arith.constant 4 : index
    %c0_35 = arith.constant 0 : index
    %c1_36 = arith.constant 1 : index
    %c0_37 = arith.constant 0 : index
    %41 = vector.load %arg1[%c4_34, %c0_35, %c1_36, %c0_37] : memref<8x9x9x128xbf16, #tpu.memory_space<vmem>>, vector<2x8x8x128xbf16>
    %42 = arith.extf %41 : vector<2x8x8x128xbf16> to vector<2x8x8x128xf32>
    %43 = vector.shape_cast %42 : vector<2x8x8x128xf32> to vector<128x128xf32>
    %44 = arith.truncf %43 : vector<128x128xf32> to vector<128x128xbf16>
    %c5 = arith.constant 5 : index
    %c0_38 = arith.constant 0 : index
    %c0_39 = arith.constant 0 : index
    %45 = vector.load %arg2[%c5, %c0_38, %c0_39] : memref<9x128x128xbf16, #tpu.memory_space<vmem>>, vector<1x128x128xbf16>
    %46 = vector.shape_cast %45 : vector<1x128x128xbf16> to vector<128x128xbf16>
    %cst_40 = arith.constant dense<0.000000e+00> : vector<128x128xf32>
    %47 = tpu.matmul %44, %46, %cst_40 {dimension_numbers = #tpu.dot_dimension_numbers<[1], [0], [0], [1], [0, 0, 1, 1], [], []>} : vector<128x128xbf16>, vector<128x128xbf16>, vector<128x128xf32> -> vector<128x128xf32>
    %48 = arith.addf %40, %47 : vector<128x128xf32>
    %c0_41 = arith.constant 0 : index
    %c1_42 = arith.constant 1 : index
    %c0_43 = arith.constant 0 : index
    %c0_44 = arith.constant 0 : index
    %49 = vector.load %arg1[%c0_41, %c1_42, %c0_43, %c0_44] : memref<8x9x9x128xbf16, #tpu.memory_space<vmem>>, vector<2x8x8x128xbf16>
    %50 = arith.extf %49 : vector<2x8x8x128xbf16> to vector<2x8x8x128xf32>
    %51 = vector.shape_cast %50 : vector<2x8x8x128xf32> to vector<128x128xf32>
    %52 = arith.truncf %51 : vector<128x128xf32> to vector<128x128xbf16>
    %c6_45 = arith.constant 6 : index
    %c0_46 = arith.constant 0 : index
    %c0_47 = arith.constant 0 : index
    %53 = vector.load %arg2[%c6_45, %c0_46, %c0_47] : memref<9x128x128xbf16, #tpu.memory_space<vmem>>, vector<1x128x128xbf16>
    %54 = vector.shape_cast %53 : vector<1x128x128xbf16> to vector<128x128xbf16>
    %cst_48 = arith.constant dense<0.000000e+00> : vector<128x128xf32>
    %55 = tpu.matmul %52, %54, %cst_48 {dimension_numbers = #tpu.dot_dimension_numbers<[1], [0], [0], [1], [0, 0, 1, 1], [], []>} : vector<128x128xbf16>, vector<128x128xbf16>, vector<128x128xf32> -> vector<128x128xf32>
    %56 = arith.addf %48, %55 : vector<128x128xf32>
    %c2_49 = arith.constant 2 : index
    %c1_50 = arith.constant 1 : index
    %c0_51 = arith.constant 0 : index
    %c0_52 = arith.constant 0 : index
    %57 = vector.load %arg1[%c2_49, %c1_50, %c0_51, %c0_52] : memref<8x9x9x128xbf16, #tpu.memory_space<vmem>>, vector<2x8x8x128xbf16>
    %58 = arith.extf %57 : vector<2x8x8x128xbf16> to vector<2x8x8x128xf32>
    %59 = vector.shape_cast %58 : vector<2x8x8x128xf32> to vector<128x128xf32>
    %60 = arith.truncf %59 : vector<128x128xf32> to vector<128x128xbf16>
    %c7 = arith.constant 7 : index
    %c0_53 = arith.constant 0 : index
    %c0_54 = arith.constant 0 : index
    %61 = vector.load %arg2[%c7, %c0_53, %c0_54] : memref<9x128x128xbf16, #tpu.memory_space<vmem>>, vector<1x128x128xbf16>
    %62 = vector.shape_cast %61 : vector<1x128x128xbf16> to vector<128x128xbf16>
    %cst_55 = arith.constant dense<0.000000e+00> : vector<128x128xf32>
    %63 = tpu.matmul %60, %62, %cst_55 {dimension_numbers = #tpu.dot_dimension_numbers<[1], [0], [0], [1], [0, 0, 1, 1], [], []>} : vector<128x128xbf16>, vector<128x128xbf16>, vector<128x128xf32> -> vector<128x128xf32>
    %64 = arith.addf %56, %63 : vector<128x128xf32>
    %c0_56 = arith.constant 0 : index
    %c1_57 = arith.constant 1 : index
    %c1_58 = arith.constant 1 : index
    %c0_59 = arith.constant 0 : index
    %65 = vector.load %arg1[%c0_56, %c1_57, %c1_58, %c0_59] : memref<8x9x9x128xbf16, #tpu.memory_space<vmem>>, vector<2x8x8x128xbf16>
    %66 = arith.extf %65 : vector<2x8x8x128xbf16> to vector<2x8x8x128xf32>
    %67 = vector.shape_cast %66 : vector<2x8x8x128xf32> to vector<128x128xf32>
    %68 = arith.truncf %67 : vector<128x128xf32> to vector<128x128xbf16>
    %c8 = arith.constant 8 : index
    %c0_60 = arith.constant 0 : index
    %c0_61 = arith.constant 0 : index
    %69 = vector.load %arg2[%c8, %c0_60, %c0_61] : memref<9x128x128xbf16, #tpu.memory_space<vmem>>, vector<1x128x128xbf16>
    %70 = vector.shape_cast %69 : vector<1x128x128xbf16> to vector<128x128xbf16>
    %cst_62 = arith.constant dense<0.000000e+00> : vector<128x128xf32>
    %71 = tpu.matmul %68, %70, %cst_62 {dimension_numbers = #tpu.dot_dimension_numbers<[1], [0], [0], [1], [0, 0, 1, 1], [], []>} : vector<128x128xbf16>, vector<128x128xbf16>, vector<128x128xf32> -> vector<128x128xf32>
    %72 = arith.addf %64, %71 : vector<128x128xf32>
    %c0_63 = arith.constant 0 : index
    %c0_64 = arith.constant 0 : index
    %73 = vector.load %arg3[%c0_63, %c0_64] : memref<1x128xf32, #tpu.memory_space<vmem>>, vector<1x128xf32>
    %c0_65 = arith.constant 0 : index
    %c0_66 = arith.constant 0 : index
    %74 = vector.load %arg4[%c0_65, %c0_66] : memref<1x128xf32, #tpu.memory_space<vmem>>, vector<1x128xf32>
    %cst_67 = arith.constant dense<0.000000e+00> : vector<128xf32>
    %75 = vector.multi_reduction <add>, %72, %cst_67 [0] : vector<128x128xf32> to vector<128xf32>
    %76 = vector.shape_cast %75 : vector<128xf32> to vector<1x128xf32>
    %77 = arith.mulf %72, %72 : vector<128x128xf32>
    %cst_68 = arith.constant dense<0.000000e+00> : vector<128xf32>
    %78 = vector.multi_reduction <add>, %77, %cst_68 [0] : vector<128x128xf32> to vector<128xf32>
    %79 = vector.shape_cast %78 : vector<128xf32> to vector<1x128xf32>
    %cst_69 = arith.constant 7.812500e-03 : f32
    %80 = vector.broadcast %cst_69 : f32 to vector<1x128xf32>
    %81 = arith.mulf %76, %80 : vector<1x128xf32>
    %cst_70 = arith.constant 7.812500e-03 : f32
    %82 = vector.broadcast %cst_70 : f32 to vector<1x128xf32>
    %83 = arith.mulf %79, %82 : vector<1x128xf32>
    %84 = arith.mulf %81, %81 : vector<1x128xf32>
    %85 = arith.subf %83, %84 : vector<1x128xf32>
    %cst_71 = arith.constant 9.99999974E-6 : f32
    %86 = vector.broadcast %cst_71 : f32 to vector<1x128xf32>
    %87 = arith.addf %85, %86 : vector<1x128xf32>
    %88 = math.rsqrt %87 : vector<1x128xf32>
    %89 = arith.mulf %88, %73 : vector<1x128xf32>
    %90 = arith.mulf %81, %89 : vector<1x128xf32>
    %91 = arith.subf %74, %90 : vector<1x128xf32>
    %92 = vector.broadcast %89 : vector<1x128xf32> to vector<128x128xf32>
    %93 = arith.mulf %72, %92 : vector<128x128xf32>
    %94 = vector.broadcast %91 : vector<1x128xf32> to vector<128x128xf32>
    %95 = arith.addf %93, %94 : vector<128x128xf32>
    %cst_72 = arith.constant 0.000000e+00 : f32
    %96 = vector.broadcast %cst_72 : f32 to vector<128x128xf32>
    %97 = arith.maximumf %95, %96 : vector<128x128xf32>
    %98 = arith.truncf %97 : vector<128x128xf32> to vector<128x128xbf16>
    %c0_73 = arith.constant 0 : index
    %c0_74 = arith.constant 0 : index
    %99 = vector.load %arg5[%c0_73, %c0_74] : memref<128x128xbf16, #tpu.memory_space<vmem>>, vector<128x128xbf16>
    tpu.vector_store %arg5[%c0_73, %c0_74], %98 {strides = array<i32>} : memref<128x128xbf16, #tpu.memory_space<vmem>>, vector<128x128xbf16>,
    return
  }
  func.func @transform_0(%arg0: i32) -> (i32, i32, i32, i32) {
    %c0_i32 = arith.constant 0 : i32
    %c0_i32_0 = arith.constant 0 : i32
    %c0_i32_1 = arith.constant 0 : i32
    %c0_i32_2 = arith.constant 0 : i32
    %c0_i32_3 = arith.constant 0 : i32
    return %c0_i32, %c0_i32_0, %c0_i32_1, %c0_i32_2 : i32, i32, i32, i32
  }
  func.func @transform_1(%arg0: i32) -> (i32, i32, i32) {
    %c0_i32 = arith.constant 0 : i32
    %c0_i32_0 = arith.constant 0 : i32
    %c0_i32_1 = arith.constant 0 : i32
    return %c0_i32, %c0_i32_0, %arg0 : i32, i32, i32
  }
  func.func @transform_2(%arg0: i32) -> (i32, i32) {
    %c0_i32 = arith.constant 0 : i32
    %c0_i32_0 = arith.constant 0 : i32
    return %c0_i32, %arg0 : i32, i32
  }
  func.func @transform_3(%arg0: i32) -> (i32, i32) {
    %c0_i32 = arith.constant 0 : i32
    %c0_i32_0 = arith.constant 0 : i32
    return %c0_i32, %arg0 : i32, i32
  }
  func.func @transform_4(%arg0: i32) -> (i32, i32) {
    %c0_i32 = arith.constant 0 : i32
    %c0_i32_0 = arith.constant 0 : i32
    return %c0_i32, %arg0 : i32, i32
  }
}

module attributes {stable_mosaic.version = 11 : i64} {
  func.func @_final_proj_kernel(%arg0: i32, %arg1: memref<128x128xbf16, #tpu.memory_space<vmem>>, %arg2: memref<128x128xbf16, #tpu.memory_space<vmem>>, %arg3: memref<1x128xf32, #tpu.memory_space<vmem>>, %arg4: memref<1x128xf32, #tpu.memory_space<vmem>>, %arg5: memref<128x128xbf16, #tpu.memory_space<vmem>>, %arg6: memref<128x128xbf16, #tpu.memory_space<vmem>>, %arg7: memref<1x128xf32, #tpu.memory_space<vmem>>, %arg8: memref<1x128xf32, #tpu.memory_space<vmem>>, %arg9: memref<128x128xf32, #tpu.memory_space<vmem>>) attributes {dimension_semantics = [#tpu.dimension_semantics<parallel>], iteration_bounds = array<i64: 1>, scalar_prefetch = 0 : i64, scratch_operands = 0 : i64, tpu.core_type = #tpu.core_type<tc>, window_params = [{pipeline_mode = #tpu.pipeline_mode<synchronous>, transform_indices = @transform_0, window_bounds = array<i64: 128, 128>}, {transform_indices = @transform_1, window_bounds = array<i64: 128, 128>}, {transform_indices = @transform_2, window_bounds = array<i64: 1, 128>}, {transform_indices = @transform_3, window_bounds = array<i64: 1, 128>}, {pipeline_mode = #tpu.pipeline_mode<synchronous>, transform_indices = @transform_4, window_bounds = array<i64: 128, 128>}, {transform_indices = @transform_5, window_bounds = array<i64: 128, 128>}, {transform_indices = @transform_6, window_bounds = array<i64: 1, 128>}, {transform_indices = @transform_7, window_bounds = array<i64: 1, 128>}, {transform_indices = @transform_8, window_bounds = array<i64: 128, 128>}]} {
    %c0 = arith.constant 0 : index
    %c0_0 = arith.constant 0 : index
    %0 = vector.load %arg1[%c0, %c0_0] : memref<128x128xbf16, #tpu.memory_space<vmem>>, vector<128x128xbf16>
    %c0_1 = arith.constant 0 : index
    %c0_2 = arith.constant 0 : index
    %1 = vector.load %arg2[%c0_1, %c0_2] : memref<128x128xbf16, #tpu.memory_space<vmem>>, vector<128x128xbf16>
    %cst = arith.constant dense<0.000000e+00> : vector<128x128xf32>
    %2 = tpu.matmul %0, %1, %cst {dimension_numbers = #tpu.dot_dimension_numbers<[1], [0], [0], [1], [0, 0, 1, 1], [], []>} : vector<128x128xbf16>, vector<128x128xbf16>, vector<128x128xf32> -> vector<128x128xf32>
    %c0_3 = arith.constant 0 : index
    %c0_4 = arith.constant 0 : index
    %3 = vector.load %arg3[%c0_3, %c0_4] : memref<1x128xf32, #tpu.memory_space<vmem>>, vector<1x128xf32>
    %c0_5 = arith.constant 0 : index
    %c0_6 = arith.constant 0 : index
    %4 = vector.load %arg4[%c0_5, %c0_6] : memref<1x128xf32, #tpu.memory_space<vmem>>, vector<1x128xf32>
    %cst_7 = arith.constant dense<0.000000e+00> : vector<128xf32>
    %5 = vector.multi_reduction <add>, %2, %cst_7 [0] : vector<128x128xf32> to vector<128xf32>
    %6 = vector.shape_cast %5 : vector<128xf32> to vector<1x128xf32>
    %7 = arith.mulf %2, %2 : vector<128x128xf32>
    %cst_8 = arith.constant dense<0.000000e+00> : vector<128xf32>
    %8 = vector.multi_reduction <add>, %7, %cst_8 [0] : vector<128x128xf32> to vector<128xf32>
    %9 = vector.shape_cast %8 : vector<128xf32> to vector<1x128xf32>
    %cst_9 = arith.constant 7.812500e-03 : f32
    %10 = vector.broadcast %cst_9 : f32 to vector<1x128xf32>
    %11 = arith.mulf %6, %10 : vector<1x128xf32>
    %cst_10 = arith.constant 7.812500e-03 : f32
    %12 = vector.broadcast %cst_10 : f32 to vector<1x128xf32>
    %13 = arith.mulf %9, %12 : vector<1x128xf32>
    %14 = arith.mulf %11, %11 : vector<1x128xf32>
    %15 = arith.subf %13, %14 : vector<1x128xf32>
    %cst_11 = arith.constant 9.99999974E-6 : f32
    %16 = vector.broadcast %cst_11 : f32 to vector<1x128xf32>
    %17 = arith.addf %15, %16 : vector<1x128xf32>
    %18 = math.rsqrt %17 : vector<1x128xf32>
    %19 = arith.mulf %18, %3 : vector<1x128xf32>
    %20 = arith.mulf %11, %19 : vector<1x128xf32>
    %21 = arith.subf %4, %20 : vector<1x128xf32>
    %22 = vector.broadcast %19 : vector<1x128xf32> to vector<128x128xf32>
    %23 = arith.mulf %2, %22 : vector<128x128xf32>
    %24 = vector.broadcast %21 : vector<1x128xf32> to vector<128x128xf32>
    %25 = arith.addf %23, %24 : vector<128x128xf32>
    %c0_12 = arith.constant 0 : index
    %c0_13 = arith.constant 0 : index
    %26 = vector.load %arg5[%c0_12, %c0_13] : memref<128x128xbf16, #tpu.memory_space<vmem>>, vector<128x128xbf16>
    %c0_14 = arith.constant 0 : index
    %c0_15 = arith.constant 0 : index
    %27 = vector.load %arg6[%c0_14, %c0_15] : memref<128x128xbf16, #tpu.memory_space<vmem>>, vector<128x128xbf16>
    %cst_16 = arith.constant dense<0.000000e+00> : vector<128x128xf32>
    %28 = tpu.matmul %26, %27, %cst_16 {dimension_numbers = #tpu.dot_dimension_numbers<[1], [0], [0], [1], [0, 0, 1, 1], [], []>} : vector<128x128xbf16>, vector<128x128xbf16>, vector<128x128xf32> -> vector<128x128xf32>
    %c0_17 = arith.constant 0 : index
    %c0_18 = arith.constant 0 : index
    %29 = vector.load %arg7[%c0_17, %c0_18] : memref<1x128xf32, #tpu.memory_space<vmem>>, vector<1x128xf32>
    %c0_19 = arith.constant 0 : index
    %c0_20 = arith.constant 0 : index
    %30 = vector.load %arg8[%c0_19, %c0_20] : memref<1x128xf32, #tpu.memory_space<vmem>>, vector<1x128xf32>
    %cst_21 = arith.constant dense<0.000000e+00> : vector<128xf32>
    %31 = vector.multi_reduction <add>, %28, %cst_21 [0] : vector<128x128xf32> to vector<128xf32>
    %32 = vector.shape_cast %31 : vector<128xf32> to vector<1x128xf32>
    %33 = arith.mulf %28, %28 : vector<128x128xf32>
    %cst_22 = arith.constant dense<0.000000e+00> : vector<128xf32>
    %34 = vector.multi_reduction <add>, %33, %cst_22 [0] : vector<128x128xf32> to vector<128xf32>
    %35 = vector.shape_cast %34 : vector<128xf32> to vector<1x128xf32>
    %cst_23 = arith.constant 7.812500e-03 : f32
    %36 = vector.broadcast %cst_23 : f32 to vector<1x128xf32>
    %37 = arith.mulf %32, %36 : vector<1x128xf32>
    %cst_24 = arith.constant 7.812500e-03 : f32
    %38 = vector.broadcast %cst_24 : f32 to vector<1x128xf32>
    %39 = arith.mulf %35, %38 : vector<1x128xf32>
    %40 = arith.mulf %37, %37 : vector<1x128xf32>
    %41 = arith.subf %39, %40 : vector<1x128xf32>
    %cst_25 = arith.constant 9.99999974E-6 : f32
    %42 = vector.broadcast %cst_25 : f32 to vector<1x128xf32>
    %43 = arith.addf %41, %42 : vector<1x128xf32>
    %44 = math.rsqrt %43 : vector<1x128xf32>
    %45 = arith.mulf %44, %29 : vector<1x128xf32>
    %46 = arith.mulf %37, %45 : vector<1x128xf32>
    %47 = arith.subf %30, %46 : vector<1x128xf32>
    %48 = vector.broadcast %45 : vector<1x128xf32> to vector<128x128xf32>
    %49 = arith.mulf %28, %48 : vector<128x128xf32>
    %50 = vector.broadcast %47 : vector<1x128xf32> to vector<128x128xf32>
    %51 = arith.addf %49, %50 : vector<128x128xf32>
    %52 = arith.addf %25, %51 : vector<128x128xf32>
    %cst_26 = arith.constant 0.000000e+00 : f32
    %53 = vector.broadcast %cst_26 : f32 to vector<128x128xf32>
    %54 = arith.maximumf %52, %53 : vector<128x128xf32>
    %c0_27 = arith.constant 0 : index
    %c0_28 = arith.constant 0 : index
    %55 = vector.load %arg9[%c0_27, %c0_28] : memref<128x128xf32, #tpu.memory_space<vmem>>, vector<128x128xf32>
    tpu.vector_store %arg9[%c0_27, %c0_28], %54 {strides = array<i32>} : memref<128x128xf32, #tpu.memory_space<vmem>>, vector<128x128xf32>,
    return
  }
  func.func @transform_0(%arg0: i32) -> (i32, i32) {
    %c0_i32 = arith.constant 0 : i32
    %c0_i32_0 = arith.constant 0 : i32
    %c0_i32_1 = arith.constant 0 : i32
    return %c0_i32, %c0_i32_0 : i32, i32
  }
  func.func @transform_1(%arg0: i32) -> (i32, i32) {
    %c0_i32 = arith.constant 0 : i32
    %c0_i32_0 = arith.constant 0 : i32
    return %c0_i32, %arg0 : i32, i32
  }
  func.func @transform_2(%arg0: i32) -> (i32, i32) {
    %c0_i32 = arith.constant 0 : i32
    %c0_i32_0 = arith.constant 0 : i32
    return %c0_i32, %arg0 : i32, i32
  }
  func.func @transform_3(%arg0: i32) -> (i32, i32) {
    %c0_i32 = arith.constant 0 : i32
    %c0_i32_0 = arith.constant 0 : i32
    return %c0_i32, %arg0 : i32, i32
  }
  func.func @transform_4(%arg0: i32) -> (i32, i32) {
    %c0_i32 = arith.constant 0 : i32
    %c0_i32_0 = arith.constant 0 : i32
    %c0_i32_1 = arith.constant 0 : i32
    return %c0_i32, %c0_i32_0 : i32, i32
  }
  func.func @transform_5(%arg0: i32) -> (i32, i32) {
    %c0_i32 = arith.constant 0 : i32
    %c0_i32_0 = arith.constant 0 : i32
    return %c0_i32, %arg0 : i32, i32
  }
  func.func @transform_6(%arg0: i32) -> (i32, i32) {
    %c0_i32 = arith.constant 0 : i32
    %c0_i32_0 = arith.constant 0 : i32
    return %c0_i32, %arg0 : i32, i32
  }
  func.func @transform_7(%arg0: i32) -> (i32, i32) {
    %c0_i32 = arith.constant 0 : i32
    %c0_i32_0 = arith.constant 0 : i32
    return %c0_i32, %arg0 : i32, i32
  }
  func.func @transform_8(%arg0: i32) -> (i32, i32) {
    %c0_i32 = arith.constant 0 : i32
    %c0_i32_0 = arith.constant 0 : i32
    return %c0_i32, %arg0 : i32, i32
  }
}

</mosaic_0001>

<bundles_post_ra>
// kernel: bottleneck_forward.3
= control target key start
LH: loop header
LB: loop body
LE: loop exit
PB: predicated region body
PF: predicated region fallthrough
CT: control target
= control target key end

     0   :  { %s3073_s1 = inlined_call_operand.vmem [shape: bf16[128,128], index: 1, kind: input, shape index: {}]   ;;  %s3074_s0 = inlined_call_operand.vmem [shape: bf16[512,128], index: 0, kind: input, shape index: {}]   ;;  %s3075_s2 = inlined_call_operand.vmem [shape: f32[1,128], index: 2, kind: input, shape index: {}]   ;;  %s3076_s3 = inlined_call_operand.vmem [shape: f32[1,128], index: 3, kind: input, shape index: {}]   ;;  %s3077_s4 = inlined_call_operand.vmem [shape: bf16[512,128], index: 4, kind: output, shape index: {}]  }
   0x1   :  { %v1861_v0 = vld [vmem:[%s3073_s1 + $0x38] sm:$0xff]   ;;  %v1862_v1 = vld [vmem:[%s3073_s1 + $0x30] sm:$0xff]   ;;  %v1863_v2 = vld [vmem:[%s3073_s1 + $0x28] sm:$0xff]  }
   0x2   :  { %1765 = vmatprep.subr.bf16.mxu0 %v1861_v0  ;;  %1845 = vmatprep.subr.bf16.mxu1 %v1861_v0  ;;  %v1864_v3 = vld [vmem:[%s3073_s1 + $0x20] sm:$0xff]   ;;  %v1865_v5 = vld [vmem:[%s3073_s1 + $0x18] sm:$0xff]   ;;  %v1866_v6 = vld [vmem:[%s3073_s1 + $0x10] sm:$0xff]  }
   0x3   :  { %1766 = vmatpush3.bf16.msra.mxu0 %v1861_v0  ;;  %1853 = vmatpush3.bf16.msra.mxu1 %v1861_v0  ;;  %v1869_v4 = vld [vmem:[%s3074_s0] sm:$0xff]   ;;  %v1867_v7 = vld [vmem:[%s3073_s1 + $0x8] sm:$0xff]   ;;  %v1871_v11 = vld [vmem:[%s3074_s0 + $0x10] sm:$0xff]  }
   0x4   :  { %1767 = vmatprep.subr.bf16.mxu0 %v1862_v1  ;;  %1846 = vmatprep.subr.bf16.mxu1 %v1862_v1  ;;  %v1868_v8 = vld [vmem:[%s3073_s1] sm:$0xff]   ;;  %v1870_v10 = vld [vmem:[%s3074_s0 + $0x8] sm:$0xff]   ;;  %v1887_v13 = vld [vmem:[%s3074_s0 + $0x90] sm:$0xff]  }
   0x5   :  { %1781 = vmatprep.mubr.bf16.mxu0 %v1869_v4  ;;  %v1885_v9 = vld [vmem:[%s3074_s0 + $0x80] sm:$0xff]   ;;  %v1886_v12 = vld [vmem:[%s3074_s0 + $0x88] sm:$0xff]   ;;  %v1872_v14 = vld [vmem:[%s3074_s0 + $0x18] sm:$0xff]  }
   0x6   :  { %1813 = vmatprep.mubr.bf16.mxu1 %v1885_v9  ;;  %v1873_v15 = vld [vmem:[%s3074_s0 + $0x20] sm:$0xff]   ;;  %v1888_v16 = vld [vmem:[%s3074_s0 + $0x98] sm:$0xff]   ;;  %v1874_v18 = vld [vmem:[%s3074_s0 + $0x28] sm:$0xff]  }
   0x7   :  { %1768 = vmatpush3.bf16.msra.mxu0 %v1862_v1  ;;  %1854 = vmatpush3.bf16.msra.mxu1 %v1862_v1  ;;  %v1889_v17 = vld [vmem:[%s3074_s0 + $0xa0] sm:$0xff]   ;;  %v1890_v19 = vld [vmem:[%s3074_s0 + $0xa8] sm:$0xff]   ;;  %v1875_v20 = vld [vmem:[%s3074_s0 + $0x30] sm:$0xff]  }
   0x8   :  { %1769 = vmatprep.subr.bf16.mxu0 %v1863_v2  ;;  %1847 = vmatprep.subr.bf16.mxu1 %v1863_v2  ;;  %v1891_v21 = vld [vmem:[%s3074_s0 + $0xb0] sm:$0xff]   ;;  %v1876_v22 = vld [vmem:[%s3074_s0 + $0x38] sm:$0xff]   ;;  %v1877_v24 = vld [vmem:[%s3074_s0 + $0x40] sm:$0xff]  }
   0x9   :  { %v1892_v23 = vld [vmem:[%s3074_s0 + $0xb8] sm:$0xff]   ;;  %v1893_v25 = vld [vmem:[%s3074_s0 + $0xc0] sm:$0xff]   ;;  %v1878_v26 = vld [vmem:[%s3074_s0 + $0x48] sm:$0xff]  }
   0xa   :  { %v1894_v27 = vld [vmem:[%s3074_s0 + $0xc8] sm:$0xff]   ;;  %v1879_v28 = vld [vmem:[%s3074_s0 + $0x50] sm:$0xff]   ;;  %v1880_v30 = vld [vmem:[%s3074_s0 + $0x58] sm:$0xff]  }
   0xb   :  { %1770 = vmatpush3.bf16.msra.mxu0 %v1863_v2  ;;  %1855 = vmatpush3.bf16.msra.mxu1 %v1863_v2  ;;  %v1895_v29 = vld [vmem:[%s3074_s0 + $0xd0] sm:$0xff]   ;;  %v1896_v31 = vld [vmem:[%s3074_s0 + $0xd8] sm:$0xff]   ;;  %v1881_v32 = vld [vmem:[%s3074_s0 + $0x60] sm:$0xff]  }
   0xc   :  { %1771 = vmatprep.subr.bf16.mxu0 %v1864_v3  ;;  %1848 = vmatprep.subr.bf16.mxu1 %v1864_v3  ;;  %v1897_v33 = vld [vmem:[%s3074_s0 + $0xe0] sm:$0xff]   ;;  %v1882_v34 = vld [vmem:[%s3074_s0 + $0x68] sm:$0xff]   ;;  %v1883_v36 = vld [vmem:[%s3074_s0 + $0x70] sm:$0xff]  }
   0xd   :  { %v1898_v35 = vld [vmem:[%s3074_s0 + $0xe8] sm:$0xff]   ;;  %v1899_v37 = vld [vmem:[%s3074_s0 + $0xf0] sm:$0xff]   ;;  %v1884_v38 = vld [vmem:[%s3074_s0 + $0x78] sm:$0xff]  }
   0xe   :  { %v1900_v39 = vld [vmem:[%s3074_s0 + $0xf8] sm:$0xff]  }
   0xf   :  { %1772 = vmatpush3.bf16.msra.mxu0 %v1864_v3  ;;  %1856 = vmatpush3.bf16.msra.mxu1 %v1864_v3 }
  0x10   :  { %1773 = vmatprep.subr.bf16.mxu0 %v1865_v5  ;;  %1849 = vmatprep.subr.bf16.mxu1 %v1865_v5 }
  0x13   :  { %1774 = vmatpush3.bf16.msra.mxu0 %v1865_v5  ;;  %1857 = vmatpush3.bf16.msra.mxu1 %v1865_v5 }
  0x14   :  { %1775 = vmatprep.subr.bf16.mxu0 %v1866_v6  ;;  %1850 = vmatprep.subr.bf16.mxu1 %v1866_v6 }
  0x17   :  { %1776 = vmatpush3.bf16.msra.mxu0 %v1866_v6  ;;  %1858 = vmatpush3.bf16.msra.mxu1 %v1866_v6 }
  0x18   :  { %1777 = vmatprep.subr.bf16.mxu0 %v1867_v7  ;;  %1851 = vmatprep.subr.bf16.mxu1 %v1867_v7 }
  0x1b   :  { %1778 = vmatpush3.bf16.msra.mxu0 %v1867_v7  ;;  %1859 = vmatpush3.bf16.msra.mxu1 %v1867_v7 }
  0x1c   :  { %1779 = vmatprep.subr.bf16.mxu0 %v1868_v8  ;;  %1852 = vmatprep.subr.bf16.mxu1 %v1868_v8 }
  0x1f   :  { %1780 = vmatpush3.bf16.msra.mxu0 %v1868_v8  ;;  %1860 = vmatpush3.bf16.msra.mxu1 %v1868_v8 }
  0x22   :  { %1782 = vmatmul.mubr.bf16.vlgmr.msra.gmra.mxu0 %v1870_v10  ;;  %1814 = vmatmul.mubr.bf16.vlgmr.msra.gmra.mxu1 %v1886_v12 }
  0x23   :  { %1785 = vmatprep.mubr.bf16.mxu0 %v1871_v11  ;;  %1817 = vmatprep.mubr.bf16.mxu1 %v1887_v13 }
  0x2a   :  { %1786 = vmatmul.mubr.bf16.gmra.mxu0 %v1872_v14  ;;  %1818 = vmatmul.mubr.bf16.gmra.mxu1 %v1888_v16 }
  0x2b   :  { %1789 = vmatprep.mubr.bf16.mxu0 %v1873_v15  ;;  %1821 = vmatprep.mubr.bf16.mxu1 %v1889_v17 }
  0x32   :  { %1790 = vmatmul.mubr.bf16.gmra.mxu0 %v1874_v18  ;;  %1822 = vmatmul.mubr.bf16.gmra.mxu1 %v1890_v19 }
  0x33   :  { %1793 = vmatprep.mubr.bf16.mxu0 %v1875_v20  ;;  %1825 = vmatprep.mubr.bf16.mxu1 %v1891_v21 }
  0x3a   :  { %1794 = vmatmul.mubr.bf16.gmra.mxu0 %v1876_v22  ;;  %1826 = vmatmul.mubr.bf16.gmra.mxu1 %v1892_v23 }
  0x3b   :  { %1797 = vmatprep.mubr.bf16.mxu0 %v1877_v24  ;;  %1829 = vmatprep.mubr.bf16.mxu1 %v1893_v25 }
  0x42   :  { %1798 = vmatmul.mubr.bf16.gmra.mxu0 %v1878_v26  ;;  %1830 = vmatmul.mubr.bf16.gmra.mxu1 %v1894_v27 }
  0x43   :  { %1801 = vmatprep.mubr.bf16.mxu0 %v1879_v28  ;;  %1833 = vmatprep.mubr.bf16.mxu1 %v1895_v29 }
  0x4a   :  { %1802 = vmatmul.mubr.bf16.gmra.mxu0 %v1880_v30  ;;  %1834 = vmatmul.mubr.bf16.gmra.mxu1 %v1896_v31 }
  0x4b   :  { %1805 = vmatprep.mubr.bf16.mxu0 %v1881_v32  ;;  %1837 = vmatprep.mubr.bf16.mxu1 %v1897_v33 }
  0x52   :  { %1806 = vmatmul.mubr.bf16.gmra.mxu0 %v1882_v34  ;;  %1838 = vmatmul.mubr.bf16.gmra.mxu1 %v1898_v35 }
  0x53   :  { %1809 = vmatprep.mubr.bf16.mxu0 %v1883_v36  ;;  %1841 = vmatprep.mubr.bf16.mxu1 %v1899_v37 }
  0x5a   :  { %1810 = vmatmul.mubr.bf16.gmra.mxu0 %v1884_v38  ;;  %1842 = vmatmul.mubr.bf16.gmra.mxu1 %v1900_v39 }
  0xe2   :  { %v2048_v40 = vpop.f32.mrf.mxu0  ;;  %v2050_v41 = vpop.f32.mrf.mxu1 }
  0xe3   :  { %v700_v51 = vmul.f32 %v2048_v40, %v2048_v40 }
  0xe4   :  { %v2052_v42 = vpop.f32.mrf.mxu0  ;;  %v2056_v44 = vpop.f32.mrf.mxu1 }
  0xe5   :  { %3108 = vst [vmem:[#allocation2_spill] sm:$0xff] %v2056_v44  ;;  %v698_v46 = vmul.f32 %v2052_v42, %v2052_v42 }
  0xe6   :  { %v2054_v43 = vpop.f32.mrf.mxu0  ;;  %v2068_v50 = vpop.f32.mrf.mxu1 }
  0xe7   :  { %v701_v55 = vmul.f32 %v2054_v43, %v2054_v43 }
  0xe8   :  { %v2058_v45 = vpop.f32.mrf.mxu0  ;;  %v2080_v59 = vpop.f32.mrf.mxu1 }
  0xe9   :  { %v629_v47 = vadd.f32 %v2058_v45, %v2052_v42  ;;  %v699_v48 = vmul.f32 %v2058_v45, %v2058_v45  ;;  %3109 = vst [vmem:[#allocation3_spill] sm:$0xff] %v2080_v59 }
  0xea   :  { %v2066_v49 = vpop.f32.mrf.mxu0  ;;  %v2092_v4 = vpop.f32.mrf.mxu1 }
  0xeb   :  { %v630_v52 = vadd.f32 %v2048_v40, %v629_v47  ;;  %v762_v53 = vadd.f32 %v699_v48, %v698_v46  ;;  %v704_v5 = vmul.f32 %v2066_v49, %v2066_v49 }
  0xec   :  { %v2073_v54 = vpop.f32.mrf.mxu0  ;;  %v2104_v13 = vpop.f32.mrf.mxu1 }
  0xed   :  { %v763_v56 = vadd.f32 %v762_v53, %v700_v51  ;;  %v631_v57 = vadd.f32 %v2054_v43, %v630_v52  ;;  %v702_v61 = vmul.f32 %v2073_v54, %v2073_v54  ;;  %3110 = vst [vmem:[#allocation4_spill] sm:$0xff] %v2104_v13 }
  0xee   :  { %v2078_v58 = vpop.f32.mrf.mxu0  ;;  %v2116_v22 = vpop.f32.mrf.mxu1 }
  0xef   :  { %v632_v60 = vadd.f32 %v631_v57, %v2073_v54  ;;  %v764_v62 = vadd.f32 %v763_v56, %v701_v55  ;;  %v705_v9 = vmul.f32 %v2078_v58, %v2078_v58 }
  0xf0   :  { %v2085_v63 = vpop.f32.mrf.mxu0  ;;  %v2128_v31 = vpop.f32.mrf.mxu1 }
  0xf1   :  { %v765_v0 = vadd.f32 %v764_v62, %v702_v61  ;;  %v633_v1 = vadd.f32 %v632_v60, %v2085_v63  ;;  %v703_v2 = vmul.f32 %v2085_v63, %v2085_v63  ;;  %3111 = vst [vmem:[#allocation5_spill] sm:$0xff] %v2128_v31 }
  0xf2   :  { %v2090_v3 = vpop.f32.mrf.mxu0  ;;  %v2140_v46 = vpop.f32.mrf.mxu1 }
  0xf3   :  { %v634_v6 = vadd.f32 %v2066_v49, %v633_v1  ;;  %v766_v7 = vadd.f32 %v765_v0, %v703_v2  ;;  %v708_v23 = vmul.f32 %v2090_v3, %v2090_v3 }
  0xf4   :  { %v2097_v8 = vpop.f32.mrf.mxu0  ;;  %v2152_v60 = vpop.f32.mrf.mxu1 }
  0xf5   :  { %v767_v10 = vadd.f32 %v766_v7, %v704_v5  ;;  %v635_v11 = vadd.f32 %v2078_v58, %v634_v6  ;;  %v706_v15 = vmul.f32 %v2097_v8, %v2097_v8  ;;  %3112 = vst [vmem:[#allocation6_spill] sm:$0xff] %v2152_v60 }
  0xf6   :  { %v2102_v12 = vpop.f32.mrf.mxu0 }
  0xf7   :  { %v636_v14 = vadd.f32 %v635_v11, %v2097_v8  ;;  %v768_v16 = vadd.f32 %v767_v10, %v705_v9  ;;  %v709_v27 = vmul.f32 %v2102_v12, %v2102_v12  ;;  %v2164_v9 = vpop.f32.mrf.mxu1 }
  0xf8   :  { %v2109_v17 = vpop.f32.mrf.mxu0 }
  0xf9   :  { %v769_v18 = vadd.f32 %v768_v16, %v706_v15  ;;  %v637_v19 = vadd.f32 %v636_v14, %v2109_v17  ;;  %v707_v20 = vmul.f32 %v2109_v17, %v2109_v17 }
  0xfa   :  { %v2114_v21 = vpop.f32.mrf.mxu0 }
  0xfb   :  { %v638_v24 = vadd.f32 %v2090_v3, %v637_v19  ;;  %v770_v25 = vadd.f32 %v769_v18, %v707_v20  ;;  %v712_v47 = vmul.f32 %v2114_v21, %v2114_v21 }
  0xfc   :  { %v2121_v26 = vpop.f32.mrf.mxu0 }
  0xfd   :  { %v771_v28 = vadd.f32 %v770_v25, %v708_v23  ;;  %v639_v29 = vadd.f32 %v2102_v12, %v638_v24  ;;  %v710_v33 = vmul.f32 %v2121_v26, %v2121_v26  ;;  %v2176_v23 = vpop.f32.mrf.mxu1 }
  0xfe   :  { %v2126_v30 = vpop.f32.mrf.mxu0  ;;  %3113 = vst [vmem:[#allocation7_spill] sm:$0xff] %v2176_v23 }
  0xff   :  { %v640_v32 = vadd.f32 %v639_v29, %v2121_v26  ;;  %v772_v34 = vadd.f32 %v771_v28, %v709_v27  ;;  %v713_v53 = vmul.f32 %v2126_v30, %v2126_v30 }
 0x100   :  { %v2133_v35 = vpop.f32.mrf.mxu0 }
 0x101   :  { %v773_v36 = vadd.f32 %v772_v34, %v710_v33  ;;  %v641_v37 = vadd.f32 %v640_v32, %v2133_v35  ;;  %v711_v38 = vmul.f32 %v2133_v35, %v2133_v35 }
 0x102   :  { %v2138_v39 = vpop.f32.mrf.mxu0 }
 0x103   :  { %v642_v48 = vadd.f32 %v2114_v21, %v641_v37  ;;  %v774_v51 = vadd.f32 %v773_v36, %v711_v38  ;;  %v716_v10 = vmul.f32 %v2138_v39, %v2138_v39  ;;  %v2188_v36 = vpop.f32.mrf.mxu1 }
 0x104   :  { %v2145_v52 = vpop.f32.mrf.mxu0 }
 0x105   :  { %v775_v55 = vadd.f32 %v774_v51, %v712_v47  ;;  %v643_v56 = vadd.f32 %v2126_v30, %v642_v48  ;;  %v714_v62 = vmul.f32 %v2145_v52, %v2145_v52 }
 0x106   :  { %v2150_v57 = vpop.f32.mrf.mxu0 }
 0x107   :  { %v644_v61 = vadd.f32 %v643_v56, %v2145_v52  ;;  %v776_v0 = vadd.f32 %v775_v55, %v713_v53  ;;  %v717_v16 = vmul.f32 %v2150_v57, %v2150_v57 }
 0x108   :  { %v2157_v1 = vpop.f32.mrf.mxu0 }
 0x109   :  { %v777_v2 = vadd.f32 %v776_v0, %v714_v62  ;;  %v645_v5 = vadd.f32 %v644_v61, %v2157_v1  ;;  %v715_v6 = vmul.f32 %v2157_v1, %v2157_v1  ;;  %v2200_v61 = vpop.f32.mrf.mxu1 }
 0x10a   :  { %v2162_v7 = vpop.f32.mrf.mxu0  ;;  %3114 = vst [vmem:[#allocation8_spill] sm:$0xff] %v2200_v61 }
 0x10b   :  { %v646_v11 = vadd.f32 %v2138_v39, %v645_v5  ;;  %v778_v14 = vadd.f32 %v777_v2, %v715_v6  ;;  %v720_v37 = vmul.f32 %v2162_v7, %v2162_v7 }
 0x10c   :  { %v2169_v15 = vpop.f32.mrf.mxu0 }
 0x10d   :  { %v779_v18 = vadd.f32 %v778_v14, %v716_v10  ;;  %v647_v19 = vadd.f32 %v2150_v57, %v646_v11  ;;  %v718_v25 = vmul.f32 %v2169_v15, %v2169_v15 }
 0x10e   :  { %v2174_v20 = vpop.f32.mrf.mxu0 }
 0x10f   :  { %v648_v24 = vadd.f32 %v647_v19, %v2169_v15  ;;  %v780_v27 = vadd.f32 %v779_v18, %v717_v16  ;;  %v721_v51 = vmul.f32 %v2174_v20, %v2174_v20  ;;  %v2212_v16 = vpop.f32.mrf.mxu1 }
 0x110   :  { %v2181_v28 = vpop.f32.mrf.mxu0  ;;  %3115 = vst [vmem:[#allocation9_spill] sm:$0xff] %v2212_v16 }
 0x111   :  { %v781_v29 = vadd.f32 %v780_v27, %v718_v25  ;;  %v649_v32 = vadd.f32 %v648_v24, %v2181_v28  ;;  %v719_v33 = vmul.f32 %v2181_v28, %v2181_v28 }
 0x112   :  { %v2186_v34 = vpop.f32.mrf.mxu0 }
 0x113   :  { %v650_v38 = vadd.f32 %v2162_v7, %v649_v32  ;;  %v782_v47 = vadd.f32 %v781_v29, %v719_v33  ;;  %v724_v18 = vmul.f32 %v2186_v34, %v2186_v34 }
 0x114   :  { %v2193_v48 = vpop.f32.mrf.mxu0 }
 0x115   :  { %v783_v53 = vadd.f32 %v782_v47, %v720_v37  ;;  %v651_v55 = vadd.f32 %v2174_v20, %v650_v38  ;;  %v722_v0 = vmul.f32 %v2193_v48, %v2193_v48  ;;  %v2224_v37 = vpop.f32.mrf.mxu1 }
 0x116   :  { %v2198_v56 = vpop.f32.mrf.mxu0  ;;  %3116 = vst [vmem:[#allocation10_spill] sm:$0xff] %v2224_v37 }
 0x117   :  { %v652_v62 = vadd.f32 %v651_v55, %v2193_v48  ;;  %v784_v2 = vadd.f32 %v783_v53, %v721_v51  ;;  %v725_v27 = vmul.f32 %v2198_v56, %v2198_v56 }
 0x118   :  { %v2205_v5 = vpop.f32.mrf.mxu0 }
 0x119   :  { %v785_v6 = vadd.f32 %v784_v2, %v722_v0  ;;  %v653_v10 = vadd.f32 %v652_v62, %v2205_v5  ;;  %v723_v11 = vmul.f32 %v2205_v5, %v2205_v5  ;;  %v2234_v2 = vpop.f32.mrf.mxu1 }
 0x11a   :  { %v2210_v14 = vpop.f32.mrf.mxu0  ;;  %3117 = vst [vmem:[#allocation11_spill] sm:$0xff] %v2234_v2 }
 0x11b   :  { %v654_v19 = vadd.f32 %v2186_v34, %v653_v10  ;;  %v786_v24 = vadd.f32 %v785_v6, %v723_v11  ;;  %v728_v6 = vmul.f32 %v2210_v14, %v2210_v14 }
 0x11c   :  { %v2217_v25 = vpop.f32.mrf.mxu0 }
 0x11d   :  { %v787_v29 = vadd.f32 %v786_v24, %v724_v18  ;;  %v655_v32 = vadd.f32 %v2198_v56, %v654_v19  ;;  %v726_v47 = vmul.f32 %v2217_v25, %v2217_v25 }
 0x11e   :  { %v2222_v33 = vpop.f32.mrf.mxu0 }
 0x11f   :  { %v656_v38 = vadd.f32 %v655_v32, %v2217_v25  ;;  %v788_v51 = vadd.f32 %v787_v29, %v725_v27  ;;  %v729_v18 = vmul.f32 %v2222_v33, %v2222_v33  ;;  %v2242_v27 = vpop.f32.mrf.mxu1  ;;  %v730_v29 = vmul.f32 %v2056_v44, %v2056_v44 }
 0x120   :  { %v2229_v53 = vpop.f32.mrf.mxu0  ;;  %3118 = vst [vmem:[#allocation12_spill] sm:$0xff] %v2242_v27 }
 0x121   :  { %v789_v55 = vadd.f32 %v788_v51, %v726_v47  ;;  %v657_v62 = vadd.f32 %v656_v38, %v2229_v53  ;;  %v727_v0 = vmul.f32 %v2229_v53, %v2229_v53  ;;  %v731_v51 = vmul.f32 %v2080_v59, %v2080_v59 }
 0x123   :  { %v658_v10 = vadd.f32 %v2210_v14, %v657_v62  ;;  %v790_v11 = vadd.f32 %v789_v55, %v727_v0  ;;  %v2250_v62 = vpop.f32.mrf.mxu1  ;;  %v732_v0 = vmul.f32 %v2050_v41, %v2050_v41 }
 0x124   :  { %3119 = vst [vmem:[#allocation13_spill] sm:$0xff] %v2250_v62 }
 0x125   :  { %v659_v19 = vadd.f32 %v2222_v33, %v658_v10  ;;  %v791_v24 = vadd.f32 %v790_v11, %v728_v6  ;;  %v733_v11 = vmul.f32 %v2068_v50, %v2068_v50 }
 0x127   :  { %v792_v32 = vadd.f32 %v791_v24, %v729_v18  ;;  %v660_v38 = vadd.f32 %v659_v19, %v2056_v44  ;;  %v2258_v24 = vpop.f32.mrf.mxu1 }
 0x128   :  { %3120 = vst [vmem:[#allocation14_spill] sm:$0xff] %v2258_v24 }
 0x129   :  { %v661_v47 = vadd.f32 %v660_v38, %v2080_v59  ;;  %v793_v55 = vadd.f32 %v792_v32, %v730_v29  ;;  %v734_v29 = vmul.f32 %v2104_v13, %v2104_v13 }
 0x12b   :  { %v662_v6 = vadd.f32 %v2050_v41, %v661_v47  ;;  %v794_v10 = vadd.f32 %v793_v55, %v731_v51  ;;  %v735_v47 = vmul.f32 %v2128_v31, %v2128_v31  ;;  %v2266_v51 = vpop.f32.mrf.mxu1  ;;  %v736_v55 = vmul.f32 %v2092_v4, %v2092_v4 }
 0x12c   :  { %3121 = vst [vmem:[#allocation15_spill] sm:$0xff] %v2266_v51 }
 0x12d   :  { %v795_v18 = vadd.f32 %v794_v10, %v732_v0  ;;  %v663_v19 = vadd.f32 %v2068_v50, %v662_v6  ;;  %v737_v10 = vmul.f32 %v2116_v22, %v2116_v22 }
 0x12f   :  { %v664_v38 = vadd.f32 %v663_v19, %v2104_v13  ;;  %v796_v32 = vadd.f32 %v795_v18, %v733_v11  ;;  %v2274_v18 = vpop.f32.mrf.mxu1 }
 0x130   :  { %3122 = vst [vmem:[#allocation16_spill] sm:$0xff] %v2274_v18 }
 0x131   :  { %v797_v59 = vadd.f32 %v796_v32, %v734_v29  ;;  %v665_v44 = vadd.f32 %v664_v38, %v2128_v31  ;;  %v738_v29 = vmul.f32 %v2152_v60, %v2152_v60 }
 0x133   :  { %v666_v0 = vadd.f32 %v2092_v4, %v665_v44  ;;  %v798_v6 = vadd.f32 %v797_v59, %v735_v47  ;;  %v739_v44 = vmul.f32 %v2176_v23, %v2176_v23  ;;  %v2282_v59 = vpop.f32.mrf.mxu1  ;;  %v740_v47 = vmul.f32 %v2140_v46, %v2140_v46 }
 0x134   :  { %3123 = vst [vmem:[#allocation17_spill] sm:$0xff] %v2282_v59 }
 0x135   :  { %v799_v19 = vadd.f32 %v798_v6, %v736_v55  ;;  %v667_v11 = vadd.f32 %v2116_v22, %v666_v0  ;;  %v741_v6 = vmul.f32 %v2164_v9, %v2164_v9 }
 0x137   :  { %v668_v38 = vadd.f32 %v667_v11, %v2152_v60  ;;  %v800_v32 = vadd.f32 %v799_v19, %v737_v10  ;;  %v2290_v19 = vpop.f32.mrf.mxu1 }
 0x138   :  { %3124 = vst [vmem:[#allocation18_spill] sm:$0xff] %v2290_v19 }
 0x139   :  { %v801_v31 = vadd.f32 %v800_v32, %v738_v29  ;;  %v669_v13 = vadd.f32 %v668_v38, %v2176_v23  ;;  %v742_v29 = vmul.f32 %v2200_v61, %v2200_v61 }
 0x13b   :  { %v670_v55 = vadd.f32 %v2140_v46, %v669_v13  ;;  %v802_v0 = vadd.f32 %v801_v31, %v739_v44  ;;  %v743_v13 = vmul.f32 %v2224_v37, %v2224_v37  ;;  %v2298_v31 = vpop.f32.mrf.mxu1  ;;  %v744_v44 = vmul.f32 %v2188_v36, %v2188_v36 }
 0x13c   :  { %3125 = vst [vmem:[#allocation19_spill] sm:$0xff] %v2298_v31 }
 0x13d   :  { %v803_v11 = vadd.f32 %v802_v0, %v740_v47  ;;  %v671_v10 = vadd.f32 %v2164_v9, %v670_v55  ;;  %v745_v0 = vmul.f32 %v2212_v16, %v2212_v16 }
 0x13f   :  { %v672_v38 = vadd.f32 %v671_v10, %v2200_v61  ;;  %v804_v32 = vadd.f32 %v803_v11, %v741_v6  ;;  %v2306_v11 = vpop.f32.mrf.mxu1 }
 0x140   :  { %3126 = vst [vmem:[#allocation20_spill] sm:$0xff] %v2306_v11 }
 0x141   :  { %v805_v23 = vadd.f32 %v804_v32, %v742_v29  ;;  %v673_v60 = vadd.f32 %v672_v38, %v2224_v37  ;;  %v746_v29 = vmul.f32 %v2242_v27, %v2242_v27 }
 0x143   :  { %v674_v47 = vadd.f32 %v2188_v36, %v673_v60  ;;  %v806_v55 = vadd.f32 %v805_v23, %v743_v13  ;;  %v747_v60 = vmul.f32 %v2258_v24, %v2258_v24  ;;  %v2314_v23 = vpop.f32.mrf.mxu1  ;;  %v748_v13 = vmul.f32 %v2234_v2, %v2234_v2 }
 0x144   :  { %3127 = vst [vmem:[#allocation21_spill] sm:$0xff] %v2314_v23 }
 0x145   :  { %v807_v10 = vadd.f32 %v806_v55, %v744_v44  ;;  %v675_v6 = vadd.f32 %v2212_v16, %v674_v47  ;;  %v749_v55 = vmul.f32 %v2250_v62, %v2250_v62 }
 0x147   :  { %v676_v38 = vadd.f32 %v675_v6, %v2242_v27  ;;  %v808_v32 = vadd.f32 %v807_v10, %v745_v0  ;;  %v2322_v10 = vpop.f32.mrf.mxu1 }
 0x148   :  { %3128 = vst [vmem:[#allocation22_spill] sm:$0xff] %v2322_v10 }
 0x149   :  { %v809_v37 = vadd.f32 %v808_v32, %v746_v29  ;;  %v677_v61 = vadd.f32 %v676_v38, %v2258_v24  ;;  %v750_v29 = vmul.f32 %v2274_v18, %v2274_v18 }
 0x14b   :  { %v678_v44 = vadd.f32 %v2234_v2, %v677_v61  ;;  %v810_v47 = vadd.f32 %v809_v37, %v747_v60  ;;  %v751_v61 = vmul.f32 %v2290_v19, %v2290_v19  ;;  %v2330_v37 = vpop.f32.mrf.mxu1  ;;  %v752_v60 = vmul.f32 %v2266_v51, %v2266_v51 }
 0x14c   :  { %3129 = vst [vmem:[#allocation23_spill] sm:$0xff] %v2330_v37 }
 0x14d   :  { %v811_v6 = vadd.f32 %v810_v47, %v748_v13  ;;  %v679_v0 = vadd.f32 %v2250_v62, %v678_v44  ;;  %v753_v47 = vmul.f32 %v2282_v59, %v2282_v59 }
 0x14f   :  { %v680_v38 = vadd.f32 %v679_v0, %v2274_v18  ;;  %v812_v32 = vadd.f32 %v811_v6, %v749_v55  ;;  %v2338_v6 = vpop.f32.mrf.mxu1 }
 0x150   :  { %3130 = vst [vmem:[#allocation24_spill] sm:$0xff] %v2338_v6 }
 0x151   :  { %v813_v24 = vadd.f32 %v812_v32, %v750_v29  ;;  %v681_v27 = vadd.f32 %v680_v38, %v2290_v19  ;;  %v754_v29 = vmul.f32 %v2306_v11, %v2306_v11 }
 0x153   :  { %v682_v13 = vadd.f32 %v2266_v51, %v681_v27  ;;  %v814_v44 = vadd.f32 %v813_v24, %v751_v61  ;;  %v755_v27 = vmul.f32 %v2322_v10, %v2322_v10  ;;  %v2346_v24 = vpop.f32.mrf.mxu1  ;;  %v756_v61 = vmul.f32 %v2298_v31, %v2298_v31 }
 0x155   :  { %v815_v0 = vadd.f32 %v814_v44, %v752_v60  ;;  %v683_v55 = vadd.f32 %v2282_v59, %v682_v13  ;;  %v757_v44 = vmul.f32 %v2314_v23, %v2314_v23 }
 0x157   :  { %v684_v38 = vadd.f32 %v683_v55, %v2306_v11  ;;  %v816_v32 = vadd.f32 %v815_v0, %v753_v47  ;;  %v2354_v0 = vpop.f32.mrf.mxu1 }
 0x158   :  { %3131 = vst [vmem:[#allocation25_spill] sm:$0xff] %v2354_v0 }
 0x159   :  { %v817_v19 = vadd.f32 %v816_v32, %v754_v29  ;;  %v685_v18 = vadd.f32 %v684_v38, %v2322_v10  ;;  %v758_v29 = vmul.f32 %v2338_v6, %v2338_v6 }
 0x15b   :  { %v686_v60 = vadd.f32 %v2298_v31, %v685_v18  ;;  %v818_v13 = vadd.f32 %v817_v19, %v755_v27  ;;  %v759_v18 = vmul.f32 %v2354_v0, %v2354_v0  ;;  %v760_v19 = vmul.f32 %v2330_v37, %v2330_v37 }
 0x15d   :  { %v819_v55 = vadd.f32 %v818_v13, %v756_v61  ;;  %v687_v47 = vadd.f32 %v2314_v23, %v686_v60  ;;  %v761_v60 = vmul.f32 %v2346_v24, %v2346_v24 }
 0x15f   :  { %v688_v38 = vadd.f32 %v687_v47, %v2338_v6  ;;  %v820_v32 = vadd.f32 %v819_v55, %v757_v44 }
 0x161   :  { %v821_v10 = vadd.f32 %v820_v32, %v758_v29  ;;  %v689_v11 = vadd.f32 %v688_v38, %v2354_v0 }
 0x163   :  { %v690_v27 = vadd.f32 %v2330_v37, %v689_v11  ;;  %v822_v61 = vadd.f32 %v821_v10, %v759_v18 }
 0x165   :  { %v691_v13 = vadd.f32 %v2346_v24, %v690_v27  ;;  %v823_v47 = vadd.f32 %v822_v61, %v760_v19  ;;  %v840_v19 = vlaneseq }
 0x167   :  { %v692_v6 = vrot.slane %v691_v13, 4  ;;  %v824_v44 = vadd.f32 %v823_v47, %v761_v60  ;;  %v2368_v27 = vshrl.u32 %v840_v19, 7  ;;  %v3132_v47 = vld [vmem:[#allocation2_spill] sm:$0xff] }
 0x169   :  { %v693_v55 = vadd.f32 %v692_v6, %v691_v13  ;;  %v825_v29 = vrot.slane %v824_v44, 4  ;;  %v627_v6 = vld [vmem:[%s3075_s2] sm:$0x1]  ;;  %v3102_v61 = vsub.s32 0, %v2368_v27 }
 0x16b   :  { %v694_v38 = vrot.slane %v693_v55, 2  ;;  %v826_v32 = vadd.f32 %v825_v29, %v824_v44  ;;  %v3133_v44 = vld [vmem:[#allocation3_spill] sm:$0xff]  ;;  %v3135_v29 = vld [vmem:[#allocation5_spill] sm:$0xff] }
 0x16d   :  { %v695_v23 = vadd.f32 %v694_v38, %v693_v55  ;;  %v827_v0 = vrot.slane %v826_v32, 2  ;;  %v3134_v55 = vld [vmem:[#allocation4_spill] sm:$0xff] }
 0x16f   :  { %v696_v31 = vrot.slane %v695_v23, 1  ;;  %v828_v59 = vadd.f32 %v827_v0, %v826_v32 }
 0x171   :  { %v697_v51 = vadd.f32 %v696_v31, %v695_v23  ;;  %v829_v62 = vrot.slane %v828_v59, 1 }
 0x173   :  { %v830_v11 = vadd.f32 %v829_v62, %v828_v59  ;;  %v831_v10 = vmul.f32 0.001953125, %v697_v51  ;;  %v2377_v62 = vld [vmem:[%s3076_s3] sm:$0x1] }
 0x175   :  { %v832_v18 = vmul.f32 0.001953125, %v830_v11  ;;  %v833_v37 = vmul.f32 %v831_v10, %v831_v10  ;;  %v3136_v11 = vld [vmem:[#allocation6_spill] sm:$0xff] }
 0x177   :  { %v834_v2 = vsub.f32 %v832_v18, %v833_v37 }
 0x179   :  { %v835_v16 = vadd.f32 1e-05, %v834_v2 }
 0x17b   :  { %1901 = vrsqrt.f32 %v835_v16 }
 0x188   :  { %v1902_v60 = vpop.eup %1901 }
 0x189   :  { %v837_v0 = vmul.f32 %v1902_v60, %v627_v6  ;;  %v3138_v6 = vld [vmem:[#allocation8_spill] sm:$0xff]  ;;  %v3139_v60 = vld [vmem:[#allocation10_spill] sm:$0xff] }
 0x18b   :  { %v2379_v51 = vmul.f32 %v837_v0, %v831_v10  ;;  %v2383_v16 = vrot.slane %v837_v0, %v3102_v61  ;;  %v3137_v10 = vld [vmem:[#allocation7_spill] sm:$0xff] }
 0x18c   :  { %v3152_v61 = vld [vmem:[#allocation15_spill] sm:$0xff] }
 0x18d   :  { %v839_v2 = vsub.f32 %v2377_v62, %v2379_v51  ;;  %v2389_v59 = vmul.f32 %v2383_v16, %v2052_v42  ;;  %v2393_v31 = vmul.f32 %v2383_v16, %v2058_v45  ;;  %v2397_v23 = vmul.f32 %v2048_v40, %v2383_v16  ;;  %v3140_v51 = vld [vmem:[#allocation9_spill] sm:$0xff] }
 0x18e   :  { %v2401_v37 = vmul.f32 %v2054_v43, %v2383_v16  ;;  %v2405_v13 = vmul.f32 %v2383_v16, %v2073_v54  ;;  %v2409_v42 = vmul.f32 %v2383_v16, %v2085_v63  ;;  %v2413_v45 = vmul.f32 %v2066_v49, %v2383_v16 }
 0x18f   :  { %v2417_v40 = vmul.f32 %v2078_v58, %v2383_v16  ;;  %v2421_v43 = vmul.f32 %v2383_v16, %v2097_v8  ;;  %v2425_v54 = vmul.f32 %v2383_v16, %v2109_v17  ;;  %v2429_v63 = vmul.f32 %v2090_v3, %v2383_v16 }
 0x190   :  { %v2433_v49 = vmul.f32 %v2102_v12, %v2383_v16  ;;  %v2437_v58 = vmul.f32 %v2383_v16, %v2121_v26  ;;  %v2441_v8 = vmul.f32 %v2383_v16, %v2133_v35  ;;  %v2445_v17 = vmul.f32 %v2114_v21, %v2383_v16 }
 0x191   :  { %v2449_v3 = vmul.f32 %v2126_v30, %v2383_v16  ;;  %v2453_v12 = vmul.f32 %v2383_v16, %v2145_v52  ;;  %v2457_v26 = vmul.f32 %v2383_v16, %v2157_v1  ;;  %v2461_v35 = vmul.f32 %v2138_v39, %v2383_v16 }
 0x192   :  { %v2465_v21 = vmul.f32 %v2150_v57, %v2383_v16  ;;  %v2469_v30 = vmul.f32 %v2383_v16, %v2169_v15  ;;  %v2473_v52 = vmul.f32 %v2383_v16, %v2181_v28  ;;  %v2477_v1 = vmul.f32 %v2162_v7, %v2383_v16 }
 0x193   :  { %v2481_v39 = vmul.f32 %v2174_v20, %v2383_v16  ;;  %v2485_v57 = vmul.f32 %v2383_v16, %v2193_v48  ;;  %v2489_v15 = vmul.f32 %v2383_v16, %v2205_v5  ;;  %v2493_v28 = vmul.f32 %v2186_v34, %v2383_v16 }
 0x194   :  { %v2497_v7 = vmul.f32 %v2198_v56, %v2383_v16  ;;  %v2501_v20 = vmul.f32 %v2383_v16, %v2217_v25  ;;  %v2505_v48 = vmul.f32 %v2383_v16, %v2229_v53  ;;  %v2509_v5 = vmul.f32 %v2210_v14, %v2383_v16 }
 0x195   :  { %v2513_v34 = vmul.f32 %v2222_v33, %v2383_v16  ;;  %v2517_v56 = vmul.f32 %v2383_v16, %v3132_v47  ;;  %v2521_v25 = vmul.f32 %v2383_v16, %v3133_v44  ;;  %v2525_v53 = vmul.f32 %v2050_v41, %v2383_v16  ;;  %v3141_v47 = vld [vmem:[#allocation12_spill] sm:$0xff]  ;;  %v3142_v44 = vld [vmem:[#allocation14_spill] sm:$0xff] }
 0x196   :  { %v2529_v14 = vmul.f32 %v2068_v50, %v2383_v16  ;;  %v2533_v33 = vmul.f32 %v2383_v16, %v3134_v55  ;;  %v2537_v38 = vmul.f32 %v2383_v16, %v3135_v29  ;;  %v2541_v32 = vmul.f32 %v2092_v4, %v2383_v16  ;;  %v3144_v29 = vld [vmem:[#allocation11_spill] sm:$0xff] }
 0x197   :  { %v2545_v41 = vmul.f32 %v2116_v22, %v2383_v16  ;;  %v2549_v50 = vmul.f32 %v2383_v16, %v3136_v11  ;;  %v2553_v18 = vmul.f32 %v2383_v16, %v3137_v10  ;;  %v2557_v19 = vmul.f32 %v2140_v46, %v2383_v16  ;;  %v3146_v10 = vld [vmem:[#allocation13_spill] sm:$0xff] }
 0x198   :  { %v2561_v4 = vmul.f32 %v2164_v9, %v2383_v16  ;;  %v2565_v22 = vmul.f32 %v2383_v16, %v3138_v6  ;;  %v2569_v0 = vmul.f32 %v2383_v16, %v3139_v60  ;;  %v2573_v62 = vmul.f32 %v2188_v36, %v2383_v16  ;;  %v3148_v6 = vld [vmem:[#allocation16_spill] sm:$0xff] }
 0x199   :  { %v2577_v46 = vmul.f32 %v3140_v51, %v2383_v16  ;;  %v2581_v9 = vmul.f32 %v2383_v16, %v3141_v47  ;;  %v2585_v55 = vmul.f32 %v2383_v16, %v3142_v44  ;;  %v2589_v11 = vmul.f32 %v3144_v29, %v2383_v16  ;;  %v3150_v51 = vld [vmem:[#allocation18_spill] sm:$0xff] }
 0x19a   :  { %v2593_v36 = vmul.f32 %v3146_v10, %v2383_v16  ;;  %v2597_v60 = vmul.f32 %v2383_v16, %v3148_v6  ;;  %v2601_v47 = vmul.f32 %v2383_v16, %v3150_v51  ;;  %v2605_v44 = vmul.f32 %v3152_v61, %v2383_v16 }
 0x19b   :  { %3143 = vst [vmem:[#allocation2_spill] sm:$0xff] %v2585_v55  ;;  %3145 = vst [vmem:[#allocation3_spill] sm:$0xff] %v2589_v11  ;;  %v3154_v55 = vld [vmem:[#allocation17_spill] sm:$0xff]  ;;  %v3156_v11 = vld [vmem:[#allocation20_spill] sm:$0xff] }
 0x19c   :  { %3147 = vst [vmem:[#allocation4_spill] sm:$0xff] %v2593_v36  ;;  %3149 = vst [vmem:[#allocation5_spill] sm:$0xff] %v2597_v60  ;;  %v2609_v29 = vmul.f32 %v3154_v55, %v2383_v16  ;;  %v2613_v10 = vmul.f32 %v2383_v16, %v3156_v11  ;;  %v3158_v36 = vld [vmem:[#allocation22_spill] sm:$0xff]  ;;  %v3160_v60 = vld [vmem:[#allocation19_spill] sm:$0xff] }
 0x19d   :  { %3151 = vst [vmem:[#allocation6_spill] sm:$0xff] %v2601_v47  ;;  %3153 = vst [vmem:[#allocation7_spill] sm:$0xff] %v2605_v44  ;;  %v2617_v6 = vmul.f32 %v2383_v16, %v3158_v36  ;;  %v2621_v51 = vmul.f32 %v3160_v60, %v2383_v16  ;;  %v3161_v47 = vld [vmem:[#allocation21_spill] sm:$0xff]  ;;  %v3162_v44 = vsub.s32 0, %v2368_v27 }
 0x19e   :  { %3155 = vst [vmem:[#allocation8_spill] sm:$0xff] %v2609_v29  ;;  %3157 = vst [vmem:[#allocation10_spill] sm:$0xff] %v2613_v10  ;;  %v2625_v61 = vmul.f32 %v3161_v47, %v2383_v16  ;;  %v3163_v29 = vld [vmem:[#allocation24_spill] sm:$0xff]  ;;  %v3164_v10 = vld [vmem:[#allocation25_spill] sm:$0xff]  ;;  %v2645_v47 = vmul.f32 %v2346_v24, %v2383_v16 }
 0x19f   :  { %3159 = vst [vmem:[#allocation9_spill] sm:$0xff] %v2617_v6  ;;  %v2629_v55 = vrot.slane %v839_v2, %v3162_v44  ;;  %v2633_v11 = vmul.f32 %v2383_v16, %v3163_v29  ;;  %v2637_v36 = vmul.f32 %v2383_v16, %v3164_v10  ;;  %v3165_v6 = vld [vmem:[#allocation23_spill] sm:$0xff] }
 0x1a0   :  { %v2641_v60 = vmul.f32 %v3165_v6, %v2383_v16 }
 0x1a1   :  { %v2649_v27 = vadd.f32 %v2629_v55, %v2389_v59  ;;  %v2653_v2 = vadd.f32 %v2629_v55, %v2393_v31  ;;  %v2657_v44 = vadd.f32 %v2629_v55, %v2397_v23  ;;  %v2661_v29 = vadd.f32 %v2629_v55, %v2401_v37 }
 0x1a2   :  { %v2665_v24 = vadd.f32 %v2629_v55, %v2405_v13  ;;  %v2669_v16 = vadd.f32 %v2629_v55, %v2409_v42  ;;  %v2673_v59 = vadd.f32 %v2629_v55, %v2413_v45  ;;  %v2677_v31 = vadd.f32 %v2629_v55, %v2417_v40  ;;  %v3176_v10 = vld [vmem:[#allocation3_spill] sm:$0xff] }
 0x1a3   :  { %3166 = vst [vmem:[#allocation12_spill] sm:$0xff] %v2649_v27  ;;  %3167 = vst [vmem:[#allocation14_spill] sm:$0xff] %v2653_v2  ;;  %v2681_v23 = vadd.f32 %v2629_v55, %v2421_v43  ;;  %v2685_v37 = vadd.f32 %v2629_v55, %v2425_v54  ;;  %v2689_v13 = vadd.f32 %v2629_v55, %v2429_v63  ;;  %v3178_v6 = vld [vmem:[#allocation4_spill] sm:$0xff] }
 0x1a4   :  { %3168 = vst [vmem:[#allocation11_spill] sm:$0xff] %v2657_v44  ;;  %3169 = vst [vmem:[#allocation13_spill] sm:$0xff] %v2661_v29  ;;  %v2693_v42 = vadd.f32 %v2629_v55, %v2433_v49  ;;  %v2697_v45 = vadd.f32 %v2629_v55, %v2437_v58  ;;  %v2701_v40 = vadd.f32 %v2629_v55, %v2441_v8 }
 0x1a5   :  { %3170 = vst [vmem:[#allocation16_spill] sm:$0xff] %v2665_v24  ;;  %v2705_v43 = vadd.f32 %v2629_v55, %v2445_v17  ;;  %v2709_v54 = vadd.f32 %v2629_v55, %v2449_v3  ;;  %v2713_v63 = vadd.f32 %v2629_v55, %v2453_v12  ;;  %v2717_v49 = vadd.f32 %v2629_v55, %v2457_v26 }
 0x1a6   :  { %v2721_v58 = vadd.f32 %v2629_v55, %v2461_v35  ;;  %v2725_v8 = vadd.f32 %v2629_v55, %v2465_v21  ;;  %v2729_v17 = vadd.f32 %v2629_v55, %v2469_v30  ;;  %v2733_v3 = vadd.f32 %v2629_v55, %v2473_v52 }
 0x1a7   :  { %v2737_v12 = vadd.f32 %v2629_v55, %v2477_v1  ;;  %v2741_v26 = vadd.f32 %v2629_v55, %v2481_v39  ;;  %v2745_v35 = vadd.f32 %v2629_v55, %v2485_v57  ;;  %v2749_v21 = vadd.f32 %v2629_v55, %v2489_v15 }
 0x1a8   :  { %v2753_v30 = vadd.f32 %v2629_v55, %v2493_v28  ;;  %v2757_v52 = vadd.f32 %v2629_v55, %v2497_v7  ;;  %v2761_v1 = vadd.f32 %v2629_v55, %v2501_v20  ;;  %v2765_v39 = vadd.f32 %v2629_v55, %v2505_v48 }
 0x1a9   :  { %v2769_v57 = vadd.f32 %v2629_v55, %v2509_v5  ;;  %v2773_v15 = vadd.f32 %v2629_v55, %v2513_v34  ;;  %v2777_v28 = vadd.f32 %v2629_v55, %v2517_v56  ;;  %v2781_v7 = vadd.f32 %v2629_v55, %v2521_v25 }
 0x1aa   :  { %v2785_v20 = vadd.f32 %v2629_v55, %v2525_v53  ;;  %v2789_v48 = vadd.f32 %v2629_v55, %v2529_v14  ;;  %v2793_v5 = vadd.f32 %v2629_v55, %v2533_v33  ;;  %v2797_v34 = vadd.f32 %v2629_v55, %v2537_v38 }
 0x1ab   :  { %v2801_v56 = vadd.f32 %v2629_v55, %v2541_v32  ;;  %v2805_v25 = vadd.f32 %v2629_v55, %v2545_v41  ;;  %v2809_v53 = vadd.f32 %v2629_v55, %v2549_v50  ;;  %v2813_v14 = vadd.f32 %v2629_v55, %v2553_v18 }
 0x1ac   :  { %v2817_v33 = vadd.f32 %v2629_v55, %v2557_v19  ;;  %v2821_v38 = vadd.f32 %v2629_v55, %v2561_v4  ;;  %v2825_v32 = vadd.f32 %v2629_v55, %v2565_v22  ;;  %v2829_v41 = vadd.f32 %v2629_v55, %v2569_v0  ;;  %v3174_v4 = vld [vmem:[#allocation2_spill] sm:$0xff] }
 0x1ad   :  { %v2833_v50 = vadd.f32 %v2629_v55, %v2573_v62  ;;  %v2837_v18 = vadd.f32 %v2629_v55, %v2577_v46  ;;  %v2841_v19 = vadd.f32 %v2629_v55, %v2581_v9  ;;  %v2845_v22 = vadd.f32 %v2629_v55, %v3174_v4 }
 0x1ae   :  { %v2849_v0 = vadd.f32 %v2629_v55, %v3176_v10  ;;  %v2853_v62 = vadd.f32 %v2629_v55, %v3178_v6 }
 0x1af   :  { %3171 = vst [vmem:[#allocation18_spill] sm:$0xff] %v2833_v50  ;;  %3172 = vst [vmem:[#allocation15_spill] sm:$0xff] %v2837_v18  ;;  %v3180_v50 = vld [vmem:[#allocation5_spill] sm:$0xff]  ;;  %v3181_v18 = vld [vmem:[#allocation6_spill] sm:$0xff] }
 0x1b0   :  { %3173 = vst [vmem:[#allocation17_spill] sm:$0xff] %v2841_v19  ;;  %3175 = vst [vmem:[#allocation20_spill] sm:$0xff] %v2845_v22  ;;  %v2857_v46 = vadd.f32 %v2629_v55, %v3180_v50  ;;  %v2861_v9 = vadd.f32 %v2629_v55, %v3181_v18  ;;  %v3182_v19 = vld [vmem:[#allocation7_spill] sm:$0xff]  ;;  %v3183_v22 = vld [vmem:[#allocation8_spill] sm:$0xff]  ;;  %v2881_v18 = vadd.f32 %v2629_v55, %v2621_v51 }
 0x1b1   :  { %3177 = vst [vmem:[#allocation22_spill] sm:$0xff] %v2849_v0  ;;  %3179 = vst [vmem:[#allocation19_spill] sm:$0xff] %v2853_v62  ;;  %v2865_v4 = vadd.f32 %v2629_v55, %v3182_v19  ;;  %v2869_v10 = vadd.f32 %v2629_v55, %v3183_v22  ;;  %v3184_v0 = vld [vmem:[#allocation10_spill] sm:$0xff]  ;;  %v3185_v62 = vld [vmem:[#allocation9_spill] sm:$0xff]  ;;  %v2885_v19 = vadd.f32 %v2629_v55, %v2625_v61  ;;  %v989_v61 = vmax.f32 %v2693_v42, 0.0 }
 0x1b2   :  { %v2873_v6 = vadd.f32 %v2629_v55, %v3184_v0  ;;  %v2877_v50 = vadd.f32 %v2629_v55, %v3185_v62  ;;  %3186 = vst [vmem:[#allocation21_spill] sm:$0xff] %v2881_v18  ;;  %v2889_v22 = vadd.f32 %v2629_v55, %v2633_v11  ;;  %v2893_v0 = vadd.f32 %v2629_v55, %v2637_v36 }
 0x1b3   :  { %3187 = vst [vmem:[#allocation24_spill] sm:$0xff] %v2885_v19  ;;  %v2897_v62 = vadd.f32 %v2629_v55, %v2641_v60  ;;  %v2901_v51 = vadd.f32 %v2629_v55, %v2645_v47  ;;  %v983_v36 = vmax.f32 %v2669_v16, 0.0  ;;  %v985_v60 = vmax.f32 %v2677_v31, 0.0 }
 0x1b4   :  { %3188 = vst [vmem:[#allocation25_spill] sm:$0xff] %v2889_v22  ;;  %3189 = vst [vmem:[#allocation23_spill] sm:$0xff] %v2893_v0  ;;  %v984_v0 = vmax.f32 %v2673_v59, 0.0  ;;  %v987_v55 = vmax.f32 %v2685_v37, 0.0  ;;  %v988_v47 = vmax.f32 %v2689_v13, 0.0  ;;  %v990_v19 = vmax.f32 %v2697_v45, 0.0 }
 0x1b5   :  { %3190 = vst [vmem:[#allocation2_spill] sm:$0xff] %v2897_v62  ;;  %3191 = vst [vmem:[#allocation3_spill] sm:$0xff] %v2901_v51  ;;  %v986_v62 = vmax.f32 %v2681_v23, 0.0  ;;  %v991_v11 = vmax.f32 %v2701_v40, 0.0  ;;  %v992_v22 = vmax.f32 %v2705_v43, 0.0  ;;  %v993_v16 = vmax.f32 %v2709_v54, 0.0 }
 0x1b6   :  { %v994_v59 = vmax.f32 %v2713_v63, 0.0  ;;  %v995_v31 = vmax.f32 %v2717_v49, 0.0  ;;  %v996_v23 = vmax.f32 %v2721_v58, 0.0  ;;  %v997_v37 = vmax.f32 %v2725_v8, 0.0  ;;  %v3192_v18 = vld [vmem:[#allocation18_spill] sm:$0xff]  ;;  %v3193_v24 = vld [vmem:[#allocation15_spill] sm:$0xff] }
 0x1b7   :  { %v998_v13 = vmax.f32 %v2729_v17, 0.0  ;;  %v999_v42 = vmax.f32 %v2733_v3, 0.0  ;;  %v1000_v45 = vmax.f32 %v2737_v12, 0.0  ;;  %v1001_v40 = vmax.f32 %v2741_v26, 0.0  ;;  %v3194_v29 = vld [vmem:[#allocation17_spill] sm:$0xff]  ;;  %v3195_v44 = vld [vmem:[#allocation20_spill] sm:$0xff] }
 0x1b8   :  { %v1002_v43 = vmax.f32 %v2745_v35, 0.0  ;;  %v1003_v54 = vmax.f32 %v2749_v21, 0.0  ;;  %v1004_v63 = vmax.f32 %v2753_v30, 0.0  ;;  %v1005_v49 = vmax.f32 %v2757_v52, 0.0  ;;  %v3196_v2 = vld [vmem:[#allocation22_spill] sm:$0xff]  ;;  %v3197_v27 = vld [vmem:[#allocation19_spill] sm:$0xff] }
 0x1b9   :  { %v1006_v58 = vmax.f32 %v2761_v1, 0.0  ;;  %v1007_v8 = vmax.f32 %v2765_v39, 0.0  ;;  %v1008_v17 = vmax.f32 %v2769_v57, 0.0  ;;  %v1009_v3 = vmax.f32 %v2773_v15, 0.0  ;;  %v3198_v51 = vld [vmem:[#allocation21_spill] sm:$0xff] }
 0x1ba   :  { %v1010_v12 = vmax.f32 %v2777_v28, 0.0  ;;  %v1011_v26 = vmax.f32 %v2781_v7, 0.0  ;;  %v1012_v35 = vmax.f32 %v2785_v20, 0.0  ;;  %v1013_v21 = vmax.f32 %v2789_v48, 0.0 }
 0x1bb   :  { %v1014_v30 = vmax.f32 %v2793_v5, 0.0  ;;  %v1015_v52 = vmax.f32 %v2797_v34, 0.0  ;;  %v1016_v1 = vmax.f32 %v2801_v56, 0.0  ;;  %v1017_v39 = vmax.f32 %v2805_v25, 0.0 }
 0x1bc   :  { %v1018_v57 = vmax.f32 %v2809_v53, 0.0  ;;  %v1019_v15 = vmax.f32 %v2813_v14, 0.0  ;;  %v1020_v28 = vmax.f32 %v2817_v33, 0.0  ;;  %v1021_v7 = vmax.f32 %v2821_v38, 0.0 }
 0x1bd   :  { %v1022_v20 = vmax.f32 %v2825_v32, 0.0  ;;  %v1023_v48 = vmax.f32 %v2829_v41, 0.0  ;;  %v1024_v5 = vmax.f32 %v3192_v18, 0.0  ;;  %v1025_v34 = vmax.f32 %v3193_v24, 0.0 }
 0x1be   :  { %v1026_v56 = vmax.f32 %v3194_v29, 0.0  ;;  %v1027_v25 = vmax.f32 %v3195_v44, 0.0  ;;  %v1028_v53 = vmax.f32 %v3196_v2, 0.0  ;;  %v1029_v14 = vmax.f32 %v3197_v27, 0.0  ;;  %v3199_v44 = vld [vmem:[#allocation24_spill] sm:$0xff]  ;;  %v3200_v27 = vld [vmem:[#allocation25_spill] sm:$0xff] }
 0x1bf   :  { %v1030_v33 = vmax.f32 %v2857_v46, 0.0  ;;  %v1031_v38 = vmax.f32 %v2861_v9, 0.0  ;;  %v1032_v32 = vmax.f32 %v2865_v4, 0.0  ;;  %v1033_v41 = vmax.f32 %v2869_v10, 0.0  ;;  %v3201_v9 = vld [vmem:[#allocation23_spill] sm:$0xff]  ;;  %v3202_v10 = vld [vmem:[#allocation2_spill] sm:$0xff] }
 0x1c0   :  { %v1034_v18 = vmax.f32 %v2873_v6, 0.0  ;;  %v1035_v24 = vmax.f32 %v2877_v50, 0.0  ;;  %v1036_v29 = vmax.f32 %v3198_v51, 0.0  ;;  %v1037_v2 = vmax.f32 %v3199_v44, 0.0  ;;  %v3203_v50 = vld [vmem:[#allocation3_spill] sm:$0xff]  ;;  %v3204_v44 = vld [vmem:[#allocation12_spill] sm:$0xff] }
 0x1c1   :  { %v1038_v46 = vmax.f32 %v3200_v27, 0.0  ;;  %v1039_v4 = vmax.f32 %v3201_v9, 0.0  ;;  %v1040_v6 = vmax.f32 %v3202_v10, 0.0  ;;  %v1041_v51 = vmax.f32 %v3203_v50, 0.0  ;;  %v3206_v9 = vld [vmem:[#allocation14_spill] sm:$0xff] }
 0x1c2   :  { %v3205_v27 = vmax.f32 %v3204_v44, 0.0  ;;  %v3207_v10 = vmax.f32 %v3206_v9, 0.0  ;;  %v3208_v44 = vld [vmem:[#allocation11_spill] sm:$0xff] }
 0x1c3   :  { %v3209_v9 = vmax.f32 %v3208_v44, 0.0 }
 0x1c4   :  { %v1537_v50 = vpack.c.bf16 %v3207_v10, %v3205_v27  ;;  %v3210_v10 = vld [vmem:[#allocation13_spill] sm:$0xff] }
 0x1c5   :  { %v3211_v27 = vmax.f32 %v3210_v10, 0.0  ;;  %v3212_v10 = vld [vmem:[#allocation16_spill] sm:$0xff] }
 0x1c6   :  { %1538 = vst [vmem:[%s3077_s4] sm:$0xff] %v1537_v50  }
 0x1c7   :  { %v1542_v44 = vpack.c.bf16 %v3211_v27, %v3209_v9  ;;  %v3213_v9 = vmax.f32 %v3212_v10, 0.0  ;;  %v1552_v10 = vpack.c.bf16 %v985_v60, %v984_v0  ;;  %v1567_v0 = vpack.c.bf16 %v991_v11, %v990_v19 }
 0x1c8   :  { %v1572_v60 = vpack.c.bf16 %v993_v16, %v992_v22  ;;  %v1587_v19 = vpack.c.bf16 %v999_v42, %v998_v13  ;;  %v1592_v22 = vpack.c.bf16 %v1001_v40, %v1000_v45  ;;  %v1597_v11 = vpack.c.bf16 %v1003_v54, %v1002_v43 }
 0x1c9   :  { %v1547_v27 = vpack.c.bf16 %v983_v36, %v3213_v9  ;;  %v1557_v9 = vpack.c.bf16 %v987_v55, %v986_v62  ;;  %v1562_v36 = vpack.c.bf16 %v989_v61, %v988_v47  ;;  %1694 = vst [vmem:[%s3077_s4 + $0x8] sm:$0xff] %v1542_v44   ;;  %1696 = vst [vmem:[%s3077_s4 + $0x18] sm:$0xff] %v1552_v10  }
 0x1ca   :  { %v1577_v62 = vpack.c.bf16 %v995_v31, %v994_v59  ;;  %v1582_v61 = vpack.c.bf16 %v997_v37, %v996_v23  ;;  %1699 = vst [vmem:[%s3077_s4 + $0x30] sm:$0xff] %v1567_v0   ;;  %1700 = vst [vmem:[%s3077_s4 + $0x38] sm:$0xff] %v1572_v60   ;;  %v1602_v55 = vpack.c.bf16 %v1005_v49, %v1004_v63 }
 0x1cb   :  { %1695 = vst [vmem:[%s3077_s4 + $0x10] sm:$0xff] %v1547_v27   ;;  %1697 = vst [vmem:[%s3077_s4 + $0x20] sm:$0xff] %v1557_v9   ;;  %v1607_v47 = vpack.c.bf16 %v1007_v8, %v1006_v58  ;;  %v1612_v16 = vpack.c.bf16 %v1009_v3, %v1008_v17  ;;  %v1617_v59 = vpack.c.bf16 %v1011_v26, %v1010_v12 }
 0x1cc   :  { %1698 = vst [vmem:[%s3077_s4 + $0x28] sm:$0xff] %v1562_v36   ;;  %1701 = vst [vmem:[%s3077_s4 + $0x40] sm:$0xff] %v1577_v62   ;;  %v1622_v31 = vpack.c.bf16 %v1013_v21, %v1012_v35  ;;  %v1627_v23 = vpack.c.bf16 %v1015_v52, %v1014_v30  ;;  %v1632_v37 = vpack.c.bf16 %v1017_v39, %v1016_v1 }
 0x1cd   :  { %1702 = vst [vmem:[%s3077_s4 + $0x48] sm:$0xff] %v1582_v61   ;;  %1703 = vst [vmem:[%s3077_s4 + $0x50] sm:$0xff] %v1587_v19   ;;  %v1637_v13 = vpack.c.bf16 %v1019_v15, %v1018_v57  ;;  %v1642_v42 = vpack.c.bf16 %v1021_v7, %v1020_v28  ;;  %v1647_v45 = vpack.c.bf16 %v1023_v48, %v1022_v20 }
 0x1ce   :  { %1704 = vst [vmem:[%s3077_s4 + $0x58] sm:$0xff] %v1592_v22   ;;  %1705 = vst [vmem:[%s3077_s4 + $0x60] sm:$0xff] %v1597_v11   ;;  %v1652_v40 = vpack.c.bf16 %v1025_v34, %v1024_v5  ;;  %v1657_v43 = vpack.c.bf16 %v1027_v25, %v1026_v56  ;;  %v1662_v54 = vpack.c.bf16 %v1029_v14, %v1028_v53 }
 0x1cf   :  { %1706 = vst [vmem:[%s3077_s4 + $0x68] sm:$0xff] %v1602_v55   ;;  %1707 = vst [vmem:[%s3077_s4 + $0x70] sm:$0xff] %v1607_v47   ;;  %v1667_v63 = vpack.c.bf16 %v1031_v38, %v1030_v33  ;;  %v1672_v49 = vpack.c.bf16 %v1033_v41, %v1032_v32  ;;  %v1677_v58 = vpack.c.bf16 %v1035_v24, %v1034_v18 }
 0x1d0   :  { %1708 = vst [vmem:[%s3077_s4 + $0x78] sm:$0xff] %v1612_v16   ;;  %1709 = vst [vmem:[%s3077_s4 + $0x80] sm:$0xff] %v1617_v59   ;;  %v1682_v8 = vpack.c.bf16 %v1037_v2, %v1036_v29  ;;  %v1687_v17 = vpack.c.bf16 %v1039_v4, %v1038_v46  ;;  %v1692_v3 = vpack.c.bf16 %v1041_v51, %v1040_v6 }
 0x1d1   :  { %1710 = vst [vmem:[%s3077_s4 + $0x88] sm:$0xff] %v1622_v31   ;;  %1711 = vst [vmem:[%s3077_s4 + $0x90] sm:$0xff] %v1627_v23  }
 0x1d2   :  { %1712 = vst [vmem:[%s3077_s4 + $0x98] sm:$0xff] %v1632_v37   ;;  %1713 = vst [vmem:[%s3077_s4 + $0xa0] sm:$0xff] %v1637_v13  }
 0x1d3   :  { %1714 = vst [vmem:[%s3077_s4 + $0xa8] sm:$0xff] %v1642_v42   ;;  %1715 = vst [vmem:[%s3077_s4 + $0xb0] sm:$0xff] %v1647_v45  }
 0x1d4   :  { %1716 = vst [vmem:[%s3077_s4 + $0xb8] sm:$0xff] %v1652_v40   ;;  %1717 = vst [vmem:[%s3077_s4 + $0xc0] sm:$0xff] %v1657_v43  }
 0x1d5   :  { %1718 = vst [vmem:[%s3077_s4 + $0xc8] sm:$0xff] %v1662_v54   ;;  %1719 = vst [vmem:[%s3077_s4 + $0xd0] sm:$0xff] %v1667_v63  }
 0x1d6   :  { %1720 = vst [vmem:[%s3077_s4 + $0xd8] sm:$0xff] %v1672_v49   ;;  %1721 = vst [vmem:[%s3077_s4 + $0xe0] sm:$0xff] %v1677_v58  }
 0x1d7   :  { %1722 = vst [vmem:[%s3077_s4 + $0xe8] sm:$0xff] %v1682_v8   ;;  %1723 = vst [vmem:[%s3077_s4 + $0xf0] sm:$0xff] %v1687_v17  }
 0x1d8   :  { %1724 = vst [vmem:[%s3077_s4 + $0xf8] sm:$0xff] %v1692_v3  }

// kernel: bottleneck_forward.4
= control target key start
LH: loop header
LB: loop body
LE: loop exit
PB: predicated region body
PF: predicated region fallthrough
CT: control target
= control target key end

     0   :  { %vm518_vm0 = vcmask 1046528   ;;  %s4538_s1 = inlined_call_operand.vmem [shape: bf16[9,128,128], index: 1, kind: input, shape index: {}]   ;;  %s4539_s0 = inlined_call_operand.vmem [shape: bf16[8,9,9,128], index: 0, kind: input, shape index: {}]   ;;  %s4540_s2 = inlined_call_operand.vmem [shape: f32[1,128], index: 2, kind: input, shape index: {}]   ;;  %s4541_s3 = inlined_call_operand.vmem [shape: f32[1,128], index: 3, kind: input, shape index: {}]   ;;  %s4542_s4 = inlined_call_operand.vmem [shape: bf16[128,128], index: 4, kind: output, shape index: {}]  }
   0x1   :  { %v3467_v0 = vld [vmem:[%s4538_s1 + $0x78] sm:$0xff]   ;;  %v3469_v2 = vld [vmem:[%s4538_s1 + $0x70] sm:$0xff]   ;;  %v3471_v4 = vld [vmem:[%s4538_s1 + $0x68] sm:$0xff]  }
   0x2   :  { %v3468_v1 = vld [vmem:[%s4538_s1 + $0x38] sm:$0xff]   ;;  %3163 = vmatprep.subr.bf16.mxu0 %v3467_v0  ;;  %v3470_v3 = vld [vmem:[%s4538_s1 + $0x30] sm:$0xff]   ;;  %v3472_v5 = vld [vmem:[%s4538_s1 + $0x28] sm:$0xff]  }
   0x3   :  { %3195 = vmatprep.subr.bf16.mxu1 %v3468_v1  ;;  %3164 = vmatpush3.bf16.msra.mxu0 %v3467_v0  ;;  %v3473_v6 = vld [vmem:[%s4538_s1 + $0x60] sm:$0xff]   ;;  %v3475_v8 = vld [vmem:[%s4538_s1 + $0x58] sm:$0xff]   ;;  %v3477_v10 = vld [vmem:[%s4538_s1 + $0x50] sm:$0xff]  }
   0x4   :  { %3196 = vmatpush3.bf16.msra.mxu1 %v3468_v1  ;;  %3165 = vmatprep.subr.bf16.mxu0 %v3469_v2  ;;  %v3474_v7 = vld [vmem:[%s4538_s1 + $0x20] sm:$0xff]   ;;  %v3476_v9 = vld [vmem:[%s4538_s1 + $0x18] sm:$0xff]   ;;  %v3478_v11 = vld [vmem:[%s4538_s1 + $0x10] sm:$0xff]  }
   0x5   :  { %3197 = vmatprep.subr.bf16.mxu1 %v3470_v3  ;;  %v3483_v12 = vld [vmem:[%s4539_s0 + $0x90] ss:$8 sps:$4 sm:$0xff]   ;;  %v3484_v13 = vld [vmem:[%s4539_s0] ss:$8 sps:$4 sm:$0xff]   ;;  %v423_v42 = vld [vmem:[%s4539_s0 + $0x4] sm:$0x1] }
   0x6   :  { %3179 = vmatprep.mubr.bf16.mxu0 %v3483_v12  ;;  %3211 = vmatprep.mubr.bf16.mxu1 %v3484_v13  ;;  %v3479_v14 = vld [vmem:[%s4538_s1 + $0x48] sm:$0xff]   ;;  %v3481_v16 = vld [vmem:[%s4538_s1 + $0x40] sm:$0xff]   ;;  %v3487_v19 = vld [vmem:[%s4538_s1 + $0xb8] sm:$0xff]   ;;  %v455_v46 = vunpack.c.l.bf16 %v423_v42 }
   0x7   :  { %3166 = vmatpush3.bf16.msra.mxu0 %v3469_v2  ;;  %v3480_v15 = vld [vmem:[%s4538_s1 + $0x8] sm:$0xff]   ;;  %v3482_v17 = vld [vmem:[%s4538_s1] sm:$0xff]   ;;  %v3488_v20 = vld [vmem:[%s4538_s1 + $0xf8] sm:$0xff]  }
   0x8   :  { %3198 = vmatpush3.bf16.msra.mxu1 %v3470_v3  ;;  %3167 = vmatprep.subr.bf16.mxu0 %v3471_v4  ;;  %v3485_v18 = vld [vmem:[%s4539_s0 + $0xa0] ss:$8 sps:$4 sm:$0xff]   ;;  %v3486_v21 = vld [vmem:[%s4539_s0 + $0x10] ss:$8 sps:$4 sm:$0xff]   ;;  %v425_v43 = vld [vmem:[%s4539_s0 + $0xc] sm:$0x1] }
   0x9   :  { %3199 = vmatprep.subr.bf16.mxu1 %v3472_v5  ;;  %v3489_v22 = vld [vmem:[%s4538_s1 + $0xb0] sm:$0xff]   ;;  %v3492_v25 = vld [vmem:[%s4539_s0 + $0x20] ss:$8 sps:$4 sm:$0xff]   ;;  %v3503_v35 = vld [vmem:[%s4538_s1 + $0x98] sm:$0xff]   ;;  %v457_v48 = vunpack.c.l.bf16 %v425_v43  ;;  %v520_v53 = vrot.slane %v455_v46, 1 }
   0xa   :  { %v3490_v23 = vld [vmem:[%s4538_s1 + $0xf0] sm:$0xff]   ;;  %v3493_v26 = vld [vmem:[%s4539_s0 + $0xc0] ss:$8 sps:$4 sm:$0xff]   ;;  %v3504_v37 = vld [vmem:[%s4538_s1 + $0xd8] sm:$0xff]  }
   0xb   :  { %3168 = vmatpush3.bf16.msra.mxu0 %v3471_v4  ;;  %v3491_v24 = vld [vmem:[%s4539_s0 + $0xb0] ss:$8 sps:$4 sm:$0xff]   ;;  %v3495_v27 = vld [vmem:[%s4538_s1 + $0xa8] sm:$0xff]   ;;  %v3497_v30 = vld [vmem:[%s4538_s1 + $0xa0] sm:$0xff]   ;;  %v523_v55 = vrot.slane %v457_v48, 1 }
   0xc   :  { %3200 = vmatpush3.bf16.msra.mxu1 %v3472_v5  ;;  %3169 = vmatprep.subr.bf16.mxu0 %v3473_v6  ;;  %v3496_v28 = vld [vmem:[%s4538_s1 + $0xe8] sm:$0xff]   ;;  %v3494_v29 = vld [vmem:[%s4539_s0 + $0x30] ss:$8 sps:$4 sm:$0xff]   ;;  %v3498_v31 = vld [vmem:[%s4538_s1 + $0xe0] sm:$0xff]  }
   0xd   :  { %3201 = vmatprep.subr.bf16.mxu1 %v3474_v7  ;;  %v3499_v32 = vld [vmem:[%s4539_s0 + $0xd8] ss:$8 sps:$4 sm:$0xff]   ;;  %v3500_v33 = vld [vmem:[%s4539_s0 + $0x48] ss:$8 sps:$4 sm:$0xff]   ;;  %v427_v50 = vld [vmem:[%s4539_s0 + $0x14] sm:$0x1] }
   0xe   :  { %v3501_v34 = vld [vmem:[%s4539_s0 + $0xe8] ss:$8 sps:$4 sm:$0xff]   ;;  %v3502_v36 = vld [vmem:[%s4539_s0 + $0x58] ss:$8 sps:$4 sm:$0xff]   ;;  %v429_v51 = vld [vmem:[%s4539_s0 + $0x1c] sm:$0x1]  ;;  %v459_v59 = vunpack.c.l.bf16 %v427_v50 }
   0xf   :  { %3170 = vmatpush3.bf16.msra.mxu0 %v3473_v6  ;;  %v3505_v38 = vld [vmem:[%s4538_s1 + $0x90] sm:$0xff]   ;;  %v3507_v40 = vld [vmem:[%s4539_s0 + $0xf8] ss:$8 sps:$4 sm:$0xff]   ;;  %v3511_v57 = vld [vmem:[%s4538_s1 + $0x88] sm:$0xff]   ;;  %v461_v61 = vunpack.c.l.bf16 %v429_v51 }
  0x10   :  { %3202 = vmatpush3.bf16.msra.mxu1 %v3474_v7  ;;  %3171 = vmatprep.subr.bf16.mxu0 %v3475_v8  ;;  %v3506_v39 = vld [vmem:[%s4538_s1 + $0xd0] sm:$0xff]   ;;  %v422_v41 = vld [vmem:[%s4539_s0] ss:$8 sps:$4 sm:$0xff]   ;;  %v526_v4 = vrot.slane %v459_v59, 1  ;;  %v439_v46 = vld [vmem:[%s4539_s0 + $0x4c] sm:$0x1] }
  0x11   :  { %3203 = vmatprep.subr.bf16.mxu1 %v3476_v9  ;;  %v3508_v44 = vld [vmem:[%s4539_s0 + $0x68] ss:$8 sps:$4 sm:$0xff]   ;;  %v454_v45 = vunpack.c.l.bf16 %v422_v41  ;;  %v456_v47 = vunpack.c.h.bf16 %v422_v41  ;;  %v3510_v62 = vld [vmem:[%s4539_s0 + $0x78] ss:$8 sps:$4 sm:$0xff]   ;;  %v529_v6 = vrot.slane %v461_v61, 1 }
  0x12   :  { %v426_v49 = vld [vmem:[%s4539_s0 + $0x10] ss:$8 sps:$4 sm:$0xff]   ;;  %v3512_v63 = vld [vmem:[%s4538_s1 + $0xc8] sm:$0xff]   ;;  %v3513_v0 = vld [vmem:[%s4538_s1 + $0x80] sm:$0xff]  }
  0x13   :  { %3172 = vmatpush3.bf16.msra.mxu0 %v3475_v8  ;;  %v519_v52 = vrot.slane %v454_v45, 1  ;;  %v522_v54 = vrot.slane %v456_v47, 1  ;;  %v3509_v56 = vld [vmem:[%s4539_s0 + $0x108] ss:$8 sps:$4 sm:$0xff]   ;;  %v458_v58 = vunpack.c.l.bf16 %v426_v49  ;;  %v460_v60 = vunpack.c.h.bf16 %v426_v49  ;;  %v3514_v7 = vld [vmem:[%s4538_s1 + $0xc0] sm:$0xff]  }
  0x14   :  { %3204 = vmatpush3.bf16.msra.mxu1 %v3476_v9  ;;  %3173 = vmatprep.subr.bf16.mxu0 %v3477_v10  ;;  %v430_v9 = vld [vmem:[%s4539_s0 + $0x20] ss:$8 sps:$4 sm:$0xff]   ;;  %v441_v47 = vld [vmem:[%s4539_s0 + $0x54] sm:$0x1]  ;;  %v445_v59 = vld [vmem:[%s4539_s0 + $0x64] sm:$0x1] }
  0x15   :  { %3205 = vmatprep.subr.bf16.mxu1 %v3478_v11  ;;  %v521_v1 = vsel %vm518_vm0, %v519_v52, %v520_v53  ;;  %v524_v2 = vsel %vm518_vm0, %v522_v54, %v523_v55  ;;  %v525_v3 = vrot.slane %v458_v58, 1  ;;  %v528_v5 = vrot.slane %v460_v60, 1  ;;  %v3515_v12 = vld [vmem:[%s4539_s0 + $0x120] ss:$8 sps:$4 sm:$0xff]   ;;  %v443_v58 = vld [vmem:[%s4539_s0 + $0x5c] sm:$0x1] }
  0x16   :  { %v583_v8 = vpack.c.bf16 %v524_v2, %v521_v1  ;;  %v462_v13 = vunpack.c.l.bf16 %v430_v9  ;;  %v3521_v42 = vld [vmem:[%s4539_s0 + $0x140] ss:$8 sps:$4 sm:$0xff]   ;;  %v471_v53 = vunpack.c.l.bf16 %v439_v46  ;;  %v473_v54 = vunpack.c.l.bf16 %v441_v47 }
  0x17   :  { %3174 = vmatpush3.bf16.msra.mxu0 %v3477_v10  ;;  %v431_v10 = vld [vmem:[%s4539_s0 + $0x24] sm:$0x1]  ;;  %v3523_v45 = vld [vmem:[%s4538_s1 + $0x128] sm:$0xff]   ;;  %v442_v55 = vld [vmem:[%s4539_s0 + $0x58] ss:$8 sps:$4 sm:$0xff]   ;;  %v477_v1 = vunpack.c.l.bf16 %v445_v59 }
  0x18   :  { %3206 = vmatpush3.bf16.msra.mxu1 %v3478_v11  ;;  %3175 = vmatprep.subr.bf16.mxu0 %v3479_v14  ;;  %v433_v11 = vld [vmem:[%s4539_s0 + $0x2c] sm:$0x1]  ;;  %v474_v60 = vunpack.c.l.bf16 %v442_v55  ;;  %v476_v61 = vunpack.c.h.bf16 %v442_v55  ;;  %v3533_v47 = vld [vmem:[%s4539_s0 + $0x188] ss:$8 sps:$4 sm:$0xff]   ;;  %v3537_v59 = vld [vmem:[%s4538_s1 + $0x100] sm:$0xff]  }
  0x19   :  { %3207 = vmatprep.subr.bf16.mxu1 %v3480_v15  ;;  %v3524_v52 = vld [vmem:[%s4538_s1 + $0x168] sm:$0xff]  }
  0x1a   :  { %v2735_v55 = vld [vmem:[%s4539_s0 + $0x12c] sm:$0x1] }
  0x1b   :  { %3176 = vmatpush3.bf16.msra.mxu0 %v3479_v14  ;;  %v463_v14 = vunpack.c.l.bf16 %v431_v10 }
  0x1c   :  { %3208 = vmatpush3.bf16.msra.mxu1 %v3480_v15  ;;  %3177 = vmatprep.subr.bf16.mxu0 %v3481_v16  ;;  %v464_v15 = vunpack.c.h.bf16 %v430_v9 }
  0x1d   :  { %3209 = vmatprep.subr.bf16.mxu1 %v3482_v17 }
  0x1f   :  { %3178 = vmatpush3.bf16.msra.mxu0 %v3481_v16  ;;  %v527_v16 = vsel %vm518_vm0, %v525_v3, %v526_v4  ;;  %v3522_v3 = vld [vmem:[%s4539_s0 + $0x150] ss:$8 sps:$4 sm:$0xff]   ;;  %v549_v4 = vrot.slane %v474_v60, 1 }
  0x20   :  { %3210 = vmatpush3.bf16.msra.mxu1 %v3482_v17  ;;  %3227 = vmatprep.subr.bf16.mxu0 %v3487_v19  ;;  %v530_v17 = vsel %vm518_vm0, %v528_v5, %v529_v6  ;;  %v552_v5 = vrot.slane %v476_v61, 1  ;;  %v3525_v6 = vld [vmem:[%s4538_s1 + $0x120] sm:$0xff]   ;;  %v1242_v61 = vunpack.c.l.bf16 %v2735_v55 }
  0x21   :  { %3259 = vmatprep.subr.bf16.mxu1 %v3488_v20 }
  0x22   :  { %3180 = vmatmul.mubr.bf16.vlgmr.msra.gmra.mxu0 %v3485_v18  ;;  %v465_v18 = vunpack.c.l.bf16 %v433_v11  ;;  %v553_v11 = vrot.slane %v477_v1, 1 }
  0x23   :  { %3212 = vmatmul.mubr.bf16.vlgmr.msra.gmra.mxu1 %v3486_v21  ;;  %3228 = vmatpush3.bf16.msra.mxu0 %v3487_v19  ;;  %v434_v19 = vld [vmem:[%s4539_s0 + $0x30] ss:$8 sps:$4 sm:$0xff]   ;;  %v437_v21 = vld [vmem:[%s4539_s0 + $0x3c] sm:$0x1] }
  0x24   :  { %3260 = vmatpush3.bf16.msra.mxu1 %v3488_v20  ;;  %3229 = vmatprep.subr.bf16.mxu0 %v3489_v22  ;;  %v435_v20 = vld [vmem:[%s4539_s0 + $0x34] sm:$0x1] }
  0x25   :  { %3261 = vmatprep.subr.bf16.mxu1 %v3490_v23  ;;  %3183 = vmatprep.mubr.bf16.mxu0 %v3491_v24  ;;  %v532_v24 = vrot.slane %v463_v14, 1 }
  0x26   :  { %3215 = vmatprep.mubr.bf16.mxu1 %v3492_v25  ;;  %v534_v25 = vrot.slane %v464_v15, 1  ;;  %v554_v15 = vsel %vm518_vm0, %v552_v5, %v553_v11 }
  0x27   :  { %3230 = vmatpush3.bf16.msra.mxu0 %v3489_v22  ;;  %v3517_v22 = vld [vmem:[%s4538_s1 + $0x138] sm:$0xff]  }
  0x28   :  { %3262 = vmatpush3.bf16.msra.mxu1 %v3490_v23  ;;  %3231 = vmatprep.subr.bf16.mxu0 %v3495_v27  ;;  %v531_v23 = vrot.slane %v462_v13, 1  ;;  %v3527_v13 = vld [vmem:[%s4539_s0 + $0x168] ss:$8 sps:$4 sm:$0xff]  }
  0x29   :  { %3263 = vmatprep.subr.bf16.mxu1 %v3496_v28 }
  0x2a   :  { %3184 = vmatmul.mubr.bf16.gmra.mxu0 %v3493_v26  ;;  %v466_v26 = vunpack.c.l.bf16 %v434_v19 }
  0x2b   :  { %3216 = vmatmul.mubr.bf16.gmra.mxu1 %v3494_v29  ;;  %3232 = vmatpush3.bf16.msra.mxu0 %v3495_v27  ;;  %v3516_v27 = vld [vmem:[%s4539_s0 + $0x130] ss:$8 sps:$4 sm:$0xff]   ;;  %v535_v29 = vrot.slane %v465_v18, 1  ;;  %v447_v18 = vld [vmem:[%s4539_s0 + $0x6c] sm:$0x1] }
  0x2c   :  { %3264 = vmatpush3.bf16.msra.mxu1 %v3496_v28  ;;  %3233 = vmatprep.subr.bf16.mxu0 %v3497_v30  ;;  %v3518_v28 = vld [vmem:[%s4538_s1 + $0x178] sm:$0xff]  }
  0x2d   :  { %3265 = vmatprep.subr.bf16.mxu1 %v3498_v31  ;;  %3187 = vmatprep.mubr.bf16.mxu0 %v3499_v32  ;;  %v469_v32 = vunpack.c.l.bf16 %v437_v21 }
  0x2e   :  { %3219 = vmatprep.mubr.bf16.mxu1 %v3500_v33  ;;  %v584_v33 = vpack.c.bf16 %v530_v17, %v527_v16  ;;  %v3529_v16 = vld [vmem:[%s4538_s1 + $0x118] sm:$0xff]   ;;  %v446_v17 = vld [vmem:[%s4539_s0 + $0x68] ss:$8 sps:$4 sm:$0xff]  }
  0x2f   :  { %3234 = vmatpush3.bf16.msra.mxu0 %v3497_v30  ;;  %v467_v30 = vunpack.c.l.bf16 %v435_v20  ;;  %v541_v41 = vrot.slane %v469_v32, 1  ;;  %v478_v20 = vunpack.c.l.bf16 %v446_v17  ;;  %v480_v21 = vunpack.c.h.bf16 %v446_v17 }
  0x30   :  { %3266 = vmatpush3.bf16.msra.mxu1 %v3498_v31  ;;  %3235 = vmatprep.subr.bf16.mxu0 %v3503_v35  ;;  %v468_v31 = vunpack.c.h.bf16 %v434_v19  ;;  %v449_v19 = vld [vmem:[%s4539_s0 + $0x74] sm:$0x1] }
  0x31   :  { %3267 = vmatprep.subr.bf16.mxu1 %v3504_v37 }
  0x32   :  { %3188 = vmatmul.mubr.bf16.gmra.mxu0 %v3501_v34  ;;  %v3519_v34 = vld [vmem:[%s4538_s1 + $0x130] sm:$0xff]  }
  0x33   :  { %3220 = vmatmul.mubr.bf16.gmra.mxu1 %v3502_v36  ;;  %3236 = vmatpush3.bf16.msra.mxu0 %v3503_v35  ;;  %v533_v35 = vsel %vm518_vm0, %v531_v23, %v532_v24  ;;  %v537_v36 = vrot.slane %v466_v26, 1  ;;  %v3530_v23 = vld [vmem:[%s4538_s1 + $0x158] sm:$0xff]   ;;  %v479_v24 = vunpack.c.l.bf16 %v447_v18  ;;  %v3540_v18 = vld [vmem:[%s4539_s0 + $0x1c0] ss:$8 sps:$4 sm:$0xff]  }
  0x34   :  { %3268 = vmatpush3.bf16.msra.mxu1 %v3504_v37  ;;  %3237 = vmatprep.subr.bf16.mxu0 %v3505_v38  ;;  %v3520_v37 = vld [vmem:[%s4538_s1 + $0x170] sm:$0xff]   ;;  %v450_v26 = vld [vmem:[%s4539_s0 + $0x78] ss:$8 sps:$4 sm:$0xff]  }
  0x35   :  { %3269 = vmatprep.subr.bf16.mxu1 %v3506_v39  ;;  %3191 = vmatprep.mubr.bf16.mxu0 %v3507_v40  ;;  %v540_v40 = vrot.slane %v468_v31, 1  ;;  %v482_v31 = vunpack.c.l.bf16 %v450_v26  ;;  %v484_v32 = vunpack.c.h.bf16 %v450_v26  ;;  %v2743_v26 = vld [vmem:[%s4539_s0 + $0x14c] sm:$0x1] }
  0x36   :  { %3223 = vmatprep.mubr.bf16.mxu1 %v3508_v44  ;;  %v438_v44 = vld [vmem:[%s4539_s0 + $0x48] ss:$8 sps:$4 sm:$0xff]  }
  0x37   :  { %3238 = vmatpush3.bf16.msra.mxu0 %v3505_v38  ;;  %v536_v38 = vsel %vm518_vm0, %v534_v25, %v535_v29  ;;  %v470_v48 = vunpack.c.l.bf16 %v438_v44  ;;  %v472_v49 = vunpack.c.h.bf16 %v438_v44  ;;  %v542_v51 = vsel %vm518_vm0, %v540_v40, %v541_v41  ;;  %v451_v29 = vld [vmem:[%s4539_s0 + $0x7c] sm:$0x1]  ;;  %v3531_v40 = vld [vmem:[%s4538_s1 + $0x110] sm:$0xff]  }
  0x38   :  { %3270 = vmatpush3.bf16.msra.mxu1 %v3506_v39  ;;  %3239 = vmatprep.subr.bf16.mxu0 %v3511_v57  ;;  %v538_v39 = vrot.slane %v467_v30, 1  ;;  %v585_v43 = vpack.c.bf16 %v536_v38, %v533_v35  ;;  %v481_v25 = vunpack.c.l.bf16 %v449_v19  ;;  %v453_v30 = vld [vmem:[%s4539_s0 + $0x84] sm:$0x1]  ;;  %v483_v35 = vunpack.c.l.bf16 %v451_v29  ;;  %v3532_v41 = vld [vmem:[%s4538_s1 + $0x150] sm:$0xff]  }
  0x39   :  { %3271 = vmatprep.subr.bf16.mxu1 %v3512_v63  ;;  %v561_v38 = vrot.slane %v482_v31, 1  ;;  %v3545_v31 = vld [vmem:[%s4539_s0 + $0x1d0] ss:$8 sps:$4 sm:$0xff]  }
  0x3a   :  { %3192 = vmatmul.mubr.bf16.gmra.mxu0 %v3509_v56  ;;  %v539_v50 = vsel %vm518_vm0, %v537_v36, %v538_v39  ;;  %v543_v56 = vrot.slane %v470_v48, 1  ;;  %v485_v36 = vunpack.c.l.bf16 %v453_v30  ;;  %v564_v39 = vrot.slane %v484_v32, 1  ;;  %v3544_v30 = vld [vmem:[%s4538_s1 + $0x1f0] sm:$0xff]  }
  0x3b   :  { %3224 = vmatmul.mubr.bf16.gmra.mxu1 %v3510_v62  ;;  %3240 = vmatpush3.bf16.msra.mxu0 %v3511_v57  ;;  %v546_v57 = vrot.slane %v472_v49, 1  ;;  %v544_v62 = vrot.slane %v471_v53, 1  ;;  %v586_v2 = vpack.c.bf16 %v542_v51, %v539_v50  ;;  %v562_v44 = vrot.slane %v483_v35, 1  ;;  %v3535_v50 = vld [vmem:[%s4538_s1 + $0x108] sm:$0xff]   ;;  %v3534_v53 = vld [vmem:[%s4539_s0 + $0x198] ss:$8 sps:$4 sm:$0xff]  }
  0x3c   :  { %3272 = vmatpush3.bf16.msra.mxu1 %v3512_v63  ;;  %3241 = vmatprep.subr.bf16.mxu0 %v3513_v0  ;;  %v547_v63 = vrot.slane %v473_v54, 1  ;;  %v3536_v51 = vld [vmem:[%s4538_s1 + $0x148] sm:$0xff]   ;;  %v2733_v54 = vld [vmem:[%s4539_s0 + $0x124] sm:$0x1] }
  0x3d   :  { %3273 = vmatprep.subr.bf16.mxu1 %v3514_v7  ;;  %3243 = vmatprep.mubr.bf16.mxu0 %v583_v8  ;;  %v545_v8 = vsel %vm518_vm0, %v543_v56, %v544_v62  ;;  %v563_v48 = vsel %vm518_vm0, %v561_v38, %v562_v44  ;;  %v1240_v60 = vunpack.c.l.bf16 %v2733_v54  ;;  %v2736_v62 = vld [vmem:[%s4539_s0 + $0x130] ss:$8 sps:$4 sm:$0xff]   ;;  %v2747_v38 = vld [vmem:[%s4539_s0 + $0x15c] sm:$0x1] }
  0x3e   :  { %3275 = vmatprep.mubr.bf16.mxu1 %v3515_v12  ;;  %v548_v9 = vsel %vm518_vm0, %v546_v57, %v547_v63  ;;  %v3538_v63 = vld [vmem:[%s4538_s1 + $0x140] sm:$0xff]   ;;  %v1245_v5 = vunpack.c.h.bf16 %v2736_v62  ;;  %v1254_v44 = vunpack.c.l.bf16 %v2747_v38 }
  0x3f   :  { %3242 = vmatpush3.bf16.msra.mxu0 %v3513_v0  ;;  %v475_v0 = vunpack.c.l.bf16 %v443_v58  ;;  %v587_v12 = vpack.c.bf16 %v548_v9, %v545_v8  ;;  %v2760_v38 = vld [vmem:[%s4539_s0 + $0x198] ss:$8 sps:$4 sm:$0xff]  }
  0x40   :  { %3274 = vmatpush3.bf16.msra.mxu1 %v3514_v7  ;;  %3291 = vmatprep.subr.bf16.mxu0 %v3517_v22  ;;  %v3526_v7 = vld [vmem:[%s4538_s1 + $0x160] sm:$0xff]  }
  0x41   :  { %3323 = vmatprep.subr.bf16.mxu1 %v3518_v28  ;;  %v550_v10 = vrot.slane %v475_v0, 1 }
  0x42   :  { %3244 = vmatmul.mubr.bf16.vlgmr.msra.gmra.mxu0 %v584_v33  ;;  %v556_v33 = vrot.slane %v479_v24, 1  ;;  %v3543_v24 = vld [vmem:[%s4538_s1 + $0x1b0] sm:$0xff]  }
  0x43   :  { %3276 = vmatmul.mubr.bf16.vlgmr.msra.gmra.mxu1 %v3516_v27  ;;  %3292 = vmatpush3.bf16.msra.mxu0 %v3517_v22  ;;  %v551_v14 = vsel %vm518_vm0, %v549_v4, %v550_v10  ;;  %v555_v27 = vrot.slane %v478_v20, 1  ;;  %v1243_v4 = vunpack.c.l.bf16 %v2736_v62  ;;  %v3539_v10 = vld [vmem:[%s4539_s0 + $0x1b0] ss:$8 sps:$4 sm:$0xff]   ;;  %v2751_v62 = vld [vmem:[%s4539_s0 + $0x174] sm:$0x1] }
  0x44   :  { %3324 = vmatpush3.bf16.msra.mxu1 %v3518_v28  ;;  %3293 = vmatprep.subr.bf16.mxu0 %v3519_v34  ;;  %v588_v22 = vpack.c.bf16 %v554_v15, %v551_v14  ;;  %v558_v28 = vrot.slane %v480_v21, 1  ;;  %v3541_v21 = vld [vmem:[%s4538_s1 + $0x1b8] sm:$0xff]  }
  0x45   :  { %3325 = vmatprep.subr.bf16.mxu1 %v3520_v37  ;;  %3247 = vmatprep.mubr.bf16.mxu0 %v585_v43  ;;  %v1309_v11 = vrot.slane %v1243_v4, 1  ;;  %v2752_v4 = vld [vmem:[%s4539_s0 + $0x178] ss:$8 sps:$4 sm:$0xff]  }
  0x46   :  { %3279 = vmatprep.mubr.bf16.mxu1 %v3521_v42  ;;  %v557_v42 = vsel %vm518_vm0, %v555_v27, %v556_v33  ;;  %v1250_v33 = vunpack.c.l.bf16 %v2743_v26 }
  0x47   :  { %3294 = vmatpush3.bf16.msra.mxu0 %v3519_v34  ;;  %v559_v34 = vrot.slane %v481_v25, 1  ;;  %v2741_v25 = vld [vmem:[%s4539_s0 + $0x144] sm:$0x1] }
  0x48   :  { %3326 = vmatpush3.bf16.msra.mxu1 %v3520_v37  ;;  %3295 = vmatprep.subr.bf16.mxu0 %v3523_v45  ;;  %v3528_v37 = vld [vmem:[%s4539_s0 + $0x178] ss:$8 sps:$4 sm:$0xff]   ;;  %v1248_v32 = vunpack.c.l.bf16 %v2741_v25 }
  0x49   :  { %3327 = vmatprep.subr.bf16.mxu1 %v3524_v52  ;;  %v560_v43 = vsel %vm518_vm0, %v558_v28, %v559_v34  ;;  %v2744_v34 = vld [vmem:[%s4539_s0 + $0x150] ss:$8 sps:$4 sm:$0xff]  }
  0x4a   :  { %3248 = vmatmul.mubr.bf16.gmra.mxu0 %v586_v2  ;;  %v589_v46 = vpack.c.bf16 %v560_v43, %v557_v42  ;;  %v2737_v2 = vld [vmem:[%s4539_s0 + $0x134] sm:$0x1]  ;;  %v1319_v42 = vrot.slane %v1250_v33, 1 }
  0x4b   :  { %3280 = vmatmul.mubr.bf16.gmra.mxu1 %v3522_v3  ;;  %3296 = vmatpush3.bf16.msra.mxu0 %v3523_v45  ;;  %v565_v45 = vrot.slane %v485_v36, 1  ;;  %v2739_v3 = vld [vmem:[%s4539_s0 + $0x13c] sm:$0x1]  ;;  %v1244_v8 = vunpack.c.l.bf16 %v2737_v2 }
  0x4c   :  { %3328 = vmatpush3.bf16.msra.mxu1 %v3524_v52  ;;  %3297 = vmatprep.subr.bf16.mxu0 %v3525_v6  ;;  %v2732_v52 = vld [vmem:[%s4539_s0 + $0x120] ss:$8 sps:$4 sm:$0xff]   ;;  %v1246_v9 = vunpack.c.l.bf16 %v2739_v3  ;;  %v1258_v3 = vunpack.c.l.bf16 %v2751_v62 }
  0x4d   :  { %3329 = vmatprep.subr.bf16.mxu1 %v3526_v7  ;;  %3251 = vmatprep.mubr.bf16.mxu0 %v587_v12  ;;  %v566_v49 = vsel %vm518_vm0, %v564_v39, %v565_v45  ;;  %v1239_v56 = vunpack.c.l.bf16 %v2732_v52  ;;  %v1241_v57 = vunpack.c.h.bf16 %v2732_v52  ;;  %v1312_v12 = vrot.slane %v1245_v5, 1  ;;  %v3546_v52 = vld [vmem:[%s4539_s0 + $0x1e0] ss:$8 sps:$4 sm:$0xff]  }
  0x4e   :  { %3283 = vmatprep.mubr.bf16.mxu1 %v3527_v13  ;;  %v590_v58 = vpack.c.bf16 %v566_v49, %v563_v48  ;;  %v1310_v15 = vrot.slane %v1244_v8, 1  ;;  %v1251_v39 = vunpack.c.l.bf16 %v2744_v34  ;;  %v2755_v8 = vld [vmem:[%s4539_s0 + $0x184] sm:$0x1] }
  0x4f   :  { %3298 = vmatpush3.bf16.msra.mxu0 %v3525_v6  ;;  %v1303_v0 = vrot.slane %v1239_v56, 1  ;;  %v1306_v1 = vrot.slane %v1241_v57, 1  ;;  %v1304_v6 = vrot.slane %v1240_v60, 1  ;;  %v3548_v56 = vld [vmem:[%s4538_s1 + $0x1e8] sm:$0xff]   ;;  %v3549_v57 = vld [vmem:[%s4538_s1 + $0x1a0] sm:$0xff]  }
  0x50   :  { %3330 = vmatpush3.bf16.msra.mxu1 %v3526_v7  ;;  %3299 = vmatprep.subr.bf16.mxu0 %v3529_v16  ;;  %v1307_v7 = vrot.slane %v1242_v61, 1  ;;  %v1311_v19 = vsel %vm518_vm0, %v1309_v11, %v1310_v15  ;;  %v1321_v45 = vrot.slane %v1251_v39, 1  ;;  %v3550_v60 = vld [vmem:[%s4538_s1 + $0x1e0] sm:$0xff]   ;;  %v2749_v61 = vld [vmem:[%s4539_s0 + $0x16c] sm:$0x1] }
  0x51   :  { %3331 = vmatprep.subr.bf16.mxu1 %v3530_v23  ;;  %v1305_v13 = vsel %vm518_vm0, %v1303_v0, %v1304_v6  ;;  %v1256_v2 = vunpack.c.l.bf16 %v2749_v61  ;;  %v3561_v61 = vld [vmem:[%s4538_s1 + $0x180] sm:$0xff]  }
  0x52   :  { %3252 = vmatmul.mubr.bf16.gmra.mxu0 %v588_v22  ;;  %v1308_v14 = vsel %vm518_vm0, %v1306_v1, %v1307_v7  ;;  %v3542_v22 = vld [vmem:[%s4538_s1 + $0x1f8] sm:$0xff]  }
  0x53   :  { %3284 = vmatmul.mubr.bf16.gmra.mxu1 %v3528_v37  ;;  %3300 = vmatpush3.bf16.msra.mxu0 %v3529_v16  ;;  %v1313_v16 = vrot.slane %v1246_v9, 1  ;;  %v1367_v17 = vpack.c.bf16 %v1308_v14, %v1305_v13  ;;  %v2745_v37 = vld [vmem:[%s4539_s0 + $0x154] sm:$0x1]  ;;  %v3551_v1 = vld [vmem:[%s4539_s0 + $0x1f8] ss:$8 sps:$4 sm:$0xff]   ;;  %v1259_v9 = vunpack.c.l.bf16 %v2752_v4  ;;  %v1328_v11 = vrot.slane %v1256_v2, 1 }
  0x54   :  { %3332 = vmatpush3.bf16.msra.mxu1 %v3530_v23  ;;  %3301 = vmatprep.subr.bf16.mxu0 %v3531_v40  ;;  %v2740_v23 = vld [vmem:[%s4539_s0 + $0x140] ss:$8 sps:$4 sm:$0xff]   ;;  %v1252_v43 = vunpack.c.l.bf16 %v2745_v37  ;;  %v2753_v7 = vld [vmem:[%s4539_s0 + $0x17c] sm:$0x1]  ;;  %v1262_v14 = vunpack.c.l.bf16 %v2755_v8 }
  0x55   :  { %3333 = vmatprep.subr.bf16.mxu1 %v3532_v41  ;;  %3255 = vmatprep.mubr.bf16.mxu0 %v589_v46  ;;  %v1314_v20 = vsel %vm518_vm0, %v1312_v12, %v1313_v16  ;;  %v1247_v27 = vunpack.c.l.bf16 %v2740_v23  ;;  %v1249_v28 = vunpack.c.h.bf16 %v2740_v23  ;;  %v1331_v12 = vrot.slane %v1258_v3, 1  ;;  %v3567_v2 = vld [vmem:[%s4538_s1 + $0x238] sm:$0xff]   ;;  %v3573_v8 = vld [vmem:[%s4538_s1 + $0x228] sm:$0xff]  }
  0x56   :  { %3287 = vmatprep.mubr.bf16.mxu1 %v3533_v47  ;;  %v1368_v29 = vpack.c.bf16 %v1314_v20, %v1311_v19  ;;  %v1322_v49 = vrot.slane %v1252_v43, 1  ;;  %v1260_v13 = vunpack.c.l.bf16 %v2753_v7  ;;  %v1333_v15 = vrot.slane %v1259_v9, 1  ;;  %v3552_v20 = vld [vmem:[%s4539_s0 + $0x208] ss:$8 sps:$4 sm:$0xff]   ;;  %v3565_v3 = vld [vmem:[%s4539_s0 + $0x18] ss:$8 sps:$4 sm:$0xff]  }
  0x57   :  { %3302 = vmatpush3.bf16.msra.mxu0 %v3531_v40  ;;  %v1315_v35 = vrot.slane %v1247_v27, 1  ;;  %v1318_v36 = vrot.slane %v1249_v28, 1  ;;  %v1253_v40 = vunpack.c.h.bf16 %v2744_v34  ;;  %v3555_v27 = vld [vmem:[%s4538_s1 + $0x190] sm:$0xff]   ;;  %v1267_v43 = vunpack.c.l.bf16 %v2760_v38  ;;  %v3570_v7 = vld [vmem:[%s4539_s0 + $0xb8] ss:$8 sps:$4 sm:$0xff]  }
  0x58   :  { %3334 = vmatpush3.bf16.msra.mxu1 %v3532_v41  ;;  %3303 = vmatprep.subr.bf16.mxu0 %v3535_v50  ;;  %v1316_v41 = vrot.slane %v1248_v32, 1  ;;  %v1323_v54 = vsel %vm518_vm0, %v1321_v45, %v1322_v49  ;;  %v2759_v32 = vld [vmem:[%s4539_s0 + $0x194] sm:$0x1]  ;;  %v3571_v9 = vld [vmem:[%s4539_s0 + $0x38] ss:$8 sps:$4 sm:$0xff]  }
  0x59   :  { %3335 = vmatprep.subr.bf16.mxu1 %v3536_v51  ;;  %v1324_v46 = vrot.slane %v1253_v40, 1  ;;  %v1320_v48 = vsel %vm518_vm0, %v1318_v36, %v1319_v42  ;;  %v1266_v37 = vunpack.c.l.bf16 %v2759_v32  ;;  %v2763_v42 = vld [vmem:[%s4539_s0 + $0x1a4] sm:$0x1]  ;;  %v1345_v49 = vrot.slane %v1267_v43, 1  ;;  %v2888_v32 = vld [vmem:[%s4539_s0 + $0x18] ss:$8 sps:$4 sm:$0xff]  }
  0x5a   :  { %3256 = vmatmul.mubr.bf16.gmra.mxu0 %v590_v58  ;;  %v1317_v47 = vsel %vm518_vm0, %v1315_v35, %v1316_v41  ;;  %v2748_v58 = vld [vmem:[%s4539_s0 + $0x168] ss:$8 sps:$4 sm:$0xff]   ;;  %v3557_v35 = vld [vmem:[%s4539_s0 + $0x218] ss:$8 sps:$4 sm:$0xff]   ;;  %v2761_v41 = vld [vmem:[%s4539_s0 + $0x19c] sm:$0x1] }
  0x5b   :  { %3288 = vmatmul.mubr.bf16.gmra.mxu1 %v3534_v53  ;;  %3304 = vmatpush3.bf16.msra.mxu0 %v3535_v50  ;;  %v1325_v50 = vrot.slane %v1254_v44, 1  ;;  %v3547_v53 = vld [vmem:[%s4538_s1 + $0x1a8] sm:$0xff]   ;;  %v1257_v0 = vunpack.c.h.bf16 %v2748_v58  ;;  %v1269_v44 = vunpack.c.h.bf16 %v2760_v38  ;;  %v2891_v38 = vld [vmem:[%s4539_s0 + $0x24] sm:$0x1] }
  0x5c   :  { %3336 = vmatpush3.bf16.msra.mxu1 %v3536_v51  ;;  %3305 = vmatprep.subr.bf16.mxu0 %v3537_v59  ;;  %v1369_v51 = vpack.c.bf16 %v1320_v48, %v1317_v47  ;;  %v1268_v47 = vunpack.c.l.bf16 %v2761_v41  ;;  %v1270_v48 = vunpack.c.l.bf16 %v2763_v42  ;;  %v3583_v43 = vld [vmem:[%s4539_s0 + $0x80] ss:$8 sps:$4 sm:$0xff]  }
  0x5d   :  { %3337 = vmatprep.subr.bf16.mxu1 %v3538_v63  ;;  %3307 = vmatprep.mubr.bf16.mxu0 %v3539_v10  ;;  %v1326_v55 = vsel %vm518_vm0, %v1324_v46, %v1325_v50  ;;  %v1330_v6 = vrot.slane %v1257_v0, 1  ;;  %v1261_v10 = vunpack.c.h.bf16 %v2752_v4  ;;  %v1343_v46 = vrot.slane %v1266_v37, 1  ;;  %v3563_v0 = vld [vmem:[%s4539_s0 + $0x8] ss:$8 sps:$4 sm:$0xff]   ;;  %v2889_v37 = vld [vmem:[%s4539_s0 + $0x1c] sm:$0x1] }
  0x5e   :  { %3339 = vmatprep.mubr.bf16.mxu1 %v1367_v17  ;;  %v3553_v17 = vld [vmem:[%s4538_s1 + $0x198] sm:$0xff]   ;;  %v1348_v50 = vrot.slane %v1269_v44, 1  ;;  %v3566_v4 = vld [vmem:[%s4539_s0 + $0xa8] ss:$8 sps:$4 sm:$0xff]  }
  0x5f   :  { %3306 = vmatpush3.bf16.msra.mxu0 %v3537_v59  ;;  %v1370_v59 = vpack.c.bf16 %v1326_v55, %v1323_v54  ;;  %v1336_v16 = vrot.slane %v1261_v10, 1  ;;  %v1332_v19 = vsel %vm518_vm0, %v1330_v6, %v1331_v12  ;;  %v1346_v55 = vrot.slane %v1268_v47, 1  ;;  %v3569_v6 = vld [vmem:[%s4539_s0 + $0x28] ss:$8 sps:$4 sm:$0xff]  }
  0x60   :  { %3338 = vmatpush3.bf16.msra.mxu1 %v3538_v63  ;;  %3355 = vmatprep.subr.bf16.mxu0 %v3541_v21  ;;  %v1255_v63 = vunpack.c.l.bf16 %v2748_v58  ;;  %v3558_v58 = vld [vmem:[%s4539_s0 + $0x228] ss:$8 sps:$4 sm:$0xff]   ;;  %v2027_v47 = vunpack.c.l.bf16 %v2888_v32 }
  0x61   :  { %3387 = vmatprep.subr.bf16.mxu1 %v3542_v22  ;;  %v3572_v10 = vld [vmem:[%s4539_s0 + $0xc8] ss:$8 sps:$4 sm:$0xff]  }
  0x62   :  { %3308 = vmatmul.mubr.bf16.vlgmr.msra.gmra.mxu0 %v3540_v18  ;;  %v1327_v5 = vrot.slane %v1255_v63, 1  ;;  %v3562_v63 = vld [vmem:[%s4538_s1 + $0x1c0] sm:$0xff]   ;;  %v3575_v12 = vld [vmem:[%s4539_s0 + $0x50] ss:$8 sps:$4 sm:$0xff]   ;;  %v3585_v44 = vld [vmem:[%s4538_s1 + $0x208] sm:$0xff]  }
  0x63   :  { %3340 = vmatmul.mubr.bf16.vlgmr.msra.gmra.mxu1 %v1368_v29  ;;  %3356 = vmatpush3.bf16.msra.mxu0 %v3541_v21  ;;  %v1334_v21 = vrot.slane %v1260_v13, 1  ;;  %v3556_v29 = vld [vmem:[%s4538_s1 + $0x1d0] sm:$0xff]   ;;  %v3576_v13 = vld [vmem:[%s4539_s0 + $0xe0] ss:$8 sps:$4 sm:$0xff]  }
  0x64   :  { %3388 = vmatpush3.bf16.msra.mxu1 %v3542_v22  ;;  %3357 = vmatprep.subr.bf16.mxu0 %v3543_v24  ;;  %v1329_v18 = vsel %vm518_vm0, %v1327_v5, %v1328_v11  ;;  %v1337_v22 = vrot.slane %v1262_v14, 1  ;;  %v3568_v5 = vld [vmem:[%s4538_s1 + $0x230] sm:$0xff]   ;;  %v3574_v11 = vld [vmem:[%s4538_s1 + $0x220] sm:$0xff]  }
  0x65   :  { %3389 = vmatprep.subr.bf16.mxu1 %v3544_v30  ;;  %3311 = vmatprep.mubr.bf16.mxu0 %v3545_v31  ;;  %v1371_v23 = vpack.c.bf16 %v1332_v19, %v1329_v18  ;;  %v1335_v25 = vsel %vm518_vm0, %v1333_v15, %v1334_v21  ;;  %v2757_v31 = vld [vmem:[%s4539_s0 + $0x18c] sm:$0x1]  ;;  %v3577_v14 = vld [vmem:[%s4539_s0 + $0x60] ss:$8 sps:$4 sm:$0xff]   ;;  %v3579_v15 = vld [vmem:[%s4538_s1 + $0x218] sm:$0xff]  }
  0x66   :  { %3343 = vmatprep.mubr.bf16.mxu1 %v1369_v51  ;;  %v1338_v26 = vsel %vm518_vm0, %v1336_v16, %v1337_v22  ;;  %v1264_v36 = vunpack.c.l.bf16 %v2757_v31  ;;  %v3559_v51 = vld [vmem:[%s4538_s1 + $0x188] sm:$0xff]   ;;  %v3578_v16 = vld [vmem:[%s4539_s0 + $0xf0] ss:$8 sps:$4 sm:$0xff]   ;;  %v2887_v22 = vld [vmem:[%s4539_s0 + $0x14] sm:$0x1] }
  0x67   :  { %3358 = vmatpush3.bf16.msra.mxu0 %v3543_v24  ;;  %v3554_v24 = vld [vmem:[%s4538_s1 + $0x1d8] sm:$0xff]   ;;  %v1372_v28 = vpack.c.bf16 %v1338_v26, %v1335_v25  ;;  %v2884_v19 = vld [vmem:[%s4539_s0 + $0x8] ss:$8 sps:$4 sm:$0xff]   ;;  %v2885_v21 = vld [vmem:[%s4539_s0 + $0xc] sm:$0x1] }
  0x68   :  { %3390 = vmatpush3.bf16.msra.mxu1 %v3544_v30  ;;  %3359 = vmatprep.subr.bf16.mxu0 %v3547_v53  ;;  %v2756_v30 = vld [vmem:[%s4539_s0 + $0x188] ss:$8 sps:$4 sm:$0xff]   ;;  %v1340_v45 = vrot.slane %v1264_v36, 1  ;;  %v2024_v26 = vunpack.c.l.bf16 %v2885_v21 }
  0x69   :  { %3391 = vmatprep.subr.bf16.mxu1 %v3548_v56  ;;  %v1263_v33 = vunpack.c.l.bf16 %v2756_v30  ;;  %v1265_v34 = vunpack.c.h.bf16 %v2756_v30  ;;  %v3581_v18 = vld [vmem:[%s4539_s0 + $0x70] ss:$8 sps:$4 sm:$0xff]  }
  0x6a   :  { %3312 = vmatmul.mubr.bf16.gmra.mxu0 %v3546_v52  ;;  %v3560_v52 = vld [vmem:[%s4538_s1 + $0x1c8] sm:$0xff]   ;;  %v2900_v25 = vld [vmem:[%s4539_s0 + $0x50] ss:$8 sps:$4 sm:$0xff]  }
  0x6b   :  { %3344 = vmatmul.mubr.bf16.gmra.mxu1 %v1370_v59  ;;  %3360 = vmatpush3.bf16.msra.mxu0 %v3547_v53  ;;  %v1339_v39 = vrot.slane %v1263_v33, 1  ;;  %v1342_v40 = vrot.slane %v1265_v34, 1  ;;  %v1347_v59 = vsel %vm518_vm0, %v1345_v49, %v1346_v55  ;;  %v2039_v30 = vunpack.c.l.bf16 %v2900_v25  ;;  %v2907_v55 = vld [vmem:[%s4539_s0 + $0x6c] sm:$0x1] }
  0x6c   :  { %3392 = vmatpush3.bf16.msra.mxu1 %v3548_v56  ;;  %3361 = vmatprep.subr.bf16.mxu0 %v3549_v57  ;;  %v1349_v56 = vrot.slane %v1270_v48, 1  ;;  %v2041_v31 = vunpack.c.h.bf16 %v2900_v25  ;;  %v2028_v48 = vunpack.c.l.bf16 %v2889_v37 }
  0x6d   :  { %3393 = vmatprep.subr.bf16.mxu1 %v3550_v60  ;;  %3315 = vmatprep.mubr.bf16.mxu0 %v3551_v1  ;;  %v1341_v53 = vsel %vm518_vm0, %v1339_v39, %v1340_v45  ;;  %v1344_v54 = vsel %vm518_vm0, %v1342_v40, %v1343_v46  ;;  %v3564_v1 = vld [vmem:[%s4539_s0 + $0x98] ss:$8 sps:$4 sm:$0xff]   ;;  %v2088_v39 = vrot.slane %v2024_v26, 1  ;;  %v2111_v41 = vrot.slane %v2039_v30, 1 }
  0x6e   :  { %3347 = vmatprep.mubr.bf16.mxu1 %v1371_v23  ;;  %v2023_v23 = vunpack.c.l.bf16 %v2884_v19  ;;  %v2114_v42 = vrot.slane %v2041_v31, 1 }
  0x6f   :  { %3362 = vmatpush3.bf16.msra.mxu0 %v3549_v57  ;;  %v1373_v57 = vpack.c.bf16 %v1344_v54, %v1341_v53  ;;  %v2904_v53 = vld [vmem:[%s4539_s0 + $0x60] ss:$8 sps:$4 sm:$0xff]   ;;  %v2905_v54 = vld [vmem:[%s4539_s0 + $0x64] sm:$0x1] }
  0x70   :  { %3394 = vmatpush3.bf16.msra.mxu1 %v3550_v60  ;;  %3363 = vmatprep.subr.bf16.mxu0 %v3553_v17  ;;  %v1350_v60 = vsel %vm518_vm0, %v1348_v50, %v1349_v56  ;;  %v2087_v33 = vrot.slane %v2023_v23, 1  ;;  %v2911_v23 = vld [vmem:[%s4539_s0 + $0x7c] sm:$0x1] }
  0x71   :  { %3395 = vmatprep.subr.bf16.mxu1 %v3554_v24  ;;  %v1374_v62 = vpack.c.bf16 %v1350_v60, %v1347_v59  ;;  %v2093_v59 = vrot.slane %v2027_v47, 1  ;;  %v2892_v60 = vld [vmem:[%s4539_s0 + $0x28] ss:$8 sps:$4 sm:$0xff]  }
  0x72   :  { %3316 = vmatmul.mubr.bf16.gmra.mxu0 %v3552_v20  ;;  %v3582_v20 = vld [vmem:[%s4539_s0 + $0x100] ss:$8 sps:$4 sm:$0xff]   ;;  %v2089_v49 = vsel %vm518_vm0, %v2087_v33, %v2088_v39  ;;  %v2897_v33 = vld [vmem:[%s4539_s0 + $0x3c] sm:$0x1] }
  0x73   :  { %3348 = vmatmul.mubr.bf16.gmra.mxu1 %v1372_v28  ;;  %3364 = vmatpush3.bf16.msra.mxu0 %v3553_v17  ;;  %v3580_v17 = vld [vmem:[%s4538_s1 + $0x210] sm:$0xff]   ;;  %v2912_v39 = vld [vmem:[%s4539_s0 + $0x80] ss:$8 sps:$4 sm:$0xff]   ;;  %v2036_v47 = vunpack.c.l.bf16 %v2897_v33 }
  0x74   :  { %3396 = vmatpush3.bf16.msra.mxu1 %v3554_v24  ;;  %3365 = vmatprep.subr.bf16.mxu0 %v3555_v27  ;;  %v2025_v24 = vunpack.c.h.bf16 %v2884_v19  ;;  %v2901_v28 = vld [vmem:[%s4539_s0 + $0x54] sm:$0x1] }
  0x75   :  { %3397 = vmatprep.subr.bf16.mxu1 %v3556_v29  ;;  %3319 = vmatprep.mubr.bf16.mxu0 %v3557_v35  ;;  %v2040_v35 = vunpack.c.l.bf16 %v2901_v28  ;;  %v2896_v28 = vld [vmem:[%s4539_s0 + $0x38] ss:$8 sps:$4 sm:$0xff]  }
  0x76   :  { %3351 = vmatprep.mubr.bf16.mxu1 %v1373_v57  ;;  %v2090_v34 = vrot.slane %v2025_v24, 1 }
  0x77   :  { %3366 = vmatpush3.bf16.msra.mxu0 %v3555_v27  ;;  %v2026_v27 = vunpack.c.l.bf16 %v2887_v22  ;;  %v2112_v45 = vrot.slane %v2040_v35, 1 }
  0x78   :  { %3398 = vmatpush3.bf16.msra.mxu1 %v3556_v29  ;;  %3367 = vmatprep.subr.bf16.mxu0 %v3559_v51  ;;  %v2903_v29 = vld [vmem:[%s4539_s0 + $0x5c] sm:$0x1] }
  0x79   :  { %3399 = vmatprep.subr.bf16.mxu1 %v3560_v52  ;;  %v2042_v36 = vunpack.c.l.bf16 %v2903_v29  ;;  %v2091_v40 = vrot.slane %v2026_v27, 1  ;;  %v2113_v57 = vsel %vm518_vm0, %v2111_v41, %v2112_v45 }
  0x7a   :  { %3320 = vmatmul.mubr.bf16.gmra.mxu0 %v3558_v58 }
  0x7b   :  { %3352 = vmatmul.mubr.bf16.gmra.mxu1 %v1374_v62  ;;  %3368 = vmatpush3.bf16.msra.mxu0 %v3559_v51  ;;  %v2115_v46 = vrot.slane %v2042_v36, 1  ;;  %v2092_v50 = vsel %vm518_vm0, %v2090_v34, %v2091_v40  ;;  %v2029_v51 = vunpack.c.h.bf16 %v2888_v32  ;;  %v3584_v62 = vld [vmem:[%s4539_s0 + $0x110] ss:$8 sps:$4 sm:$0xff]   ;;  %v2050_v36 = vunpack.c.l.bf16 %v2911_v23 }
  0x7c   :  { %3400 = vmatpush3.bf16.msra.mxu1 %v3560_v52  ;;  %3369 = vmatprep.subr.bf16.mxu0 %v3561_v61  ;;  %v2030_v52 = vunpack.c.l.bf16 %v2891_v38  ;;  %v2151_v56 = vpack.c.bf16 %v2092_v50, %v2089_v49  ;;  %v2899_v38 = vld [vmem:[%s4539_s0 + $0x44] sm:$0x1]  ;;  %v2915_v49 = vld [vmem:[%s4539_s0 + $0x8c] sm:$0x1] }
  0x7d   :  { %3401 = vmatprep.subr.bf16.mxu1 %v3562_v63  ;;  %3371 = vmatprep.mubr.bf16.mxu0 %v3563_v0  ;;  %v2116_v58 = vsel %vm518_vm0, %v2114_v42, %v2115_v46  ;;  %v2094_v0 = vrot.slane %v2028_v48, 1  ;;  %v2127_v46 = vrot.slane %v2050_v36, 1  ;;  %v2037_v48 = vunpack.c.h.bf16 %v2896_v28 }
  0x7e   :  { %3403 = vmatprep.mubr.bf16.mxu1 %v3564_v1  ;;  %v2096_v1 = vrot.slane %v2029_v51, 1  ;;  %v2038_v51 = vunpack.c.l.bf16 %v2899_v38 }
  0x7f   :  { %3370 = vmatpush3.bf16.msra.mxu0 %v3561_v61  ;;  %v2893_v61 = vld [vmem:[%s4539_s0 + $0x2c] sm:$0x1] }
  0x80   :  { %3402 = vmatpush3.bf16.msra.mxu1 %v3562_v63  ;;  %3419 = vmatprep.subr.bf16.mxu0 %v3567_v2  ;;  %v2155_v63 = vpack.c.bf16 %v2116_v58, %v2113_v57 }
  0x81   :  { %3451 = vmatprep.subr.bf16.mxu1 %v3567_v2 }
  0x82   :  { %3372 = vmatmul.mubr.bf16.vlgmr.msra.gmra.mxu0 %v3565_v3  ;;  %v3586_v3 = vld [vmem:[%s4538_s1 + $0x200] sm:$0xff]  }
  0x83   :  { %3404 = vmatmul.mubr.bf16.vlgmr.msra.gmra.mxu1 %v3566_v4  ;;  %3420 = vmatpush3.bf16.msra.mxu0 %v3567_v2  ;;  %v2043_v4 = vunpack.c.l.bf16 %v2904_v53 }
  0x84   :  { %3459 = vmatpush3.bf16.msra.mxu1 %v3567_v2  ;;  %3421 = vmatprep.subr.bf16.mxu0 %v3568_v5  ;;  %v2097_v2 = vrot.slane %v2030_v52, 1 }
  0x85   :  { %3452 = vmatprep.subr.bf16.mxu1 %v3568_v5  ;;  %3375 = vmatprep.mubr.bf16.mxu0 %v3569_v6  ;;  %v2045_v6 = vunpack.c.h.bf16 %v2904_v53  ;;  %v2051_v53 = vunpack.c.l.bf16 %v2912_v39 }
  0x86   :  { %3407 = vmatprep.mubr.bf16.mxu1 %v3570_v7  ;;  %v2046_v7 = vunpack.c.l.bf16 %v2907_v55  ;;  %v2106_v55 = vrot.slane %v2036_v47, 1 }
  0x87   :  { %3422 = vmatpush3.bf16.msra.mxu0 %v3568_v5 }
  0x88   :  { %3460 = vmatpush3.bf16.msra.mxu1 %v3568_v5  ;;  %3423 = vmatprep.subr.bf16.mxu0 %v3573_v8  ;;  %v2044_v5 = vunpack.c.l.bf16 %v2905_v54  ;;  %v2121_v19 = vrot.slane %v2046_v7, 1 }
  0x89   :  { %3453 = vmatprep.subr.bf16.mxu1 %v3573_v8 }
  0x8a   :  { %3376 = vmatmul.mubr.bf16.gmra.mxu0 %v3571_v9  ;;  %v2095_v9 = vsel %vm518_vm0, %v2093_v59, %v2094_v0  ;;  %v2109_v59 = vrot.slane %v2038_v51, 1 }
  0x8b   :  { %3408 = vmatmul.mubr.bf16.gmra.mxu1 %v3572_v10  ;;  %3424 = vmatpush3.bf16.msra.mxu0 %v3573_v8  ;;  %v2098_v10 = vsel %vm518_vm0, %v2096_v1, %v2097_v2 }
  0x8c   :  { %3461 = vmatpush3.bf16.msra.mxu1 %v3573_v8  ;;  %3425 = vmatprep.subr.bf16.mxu0 %v3574_v11  ;;  %v2895_v8 = vld [vmem:[%s4539_s0 + $0x34] sm:$0x1] }
  0x8d   :  { %3454 = vmatprep.subr.bf16.mxu1 %v3574_v11  ;;  %3379 = vmatprep.mubr.bf16.mxu0 %v3575_v12  ;;  %v2032_v12 = vunpack.c.l.bf16 %v2893_v61  ;;  %v2034_v21 = vunpack.c.l.bf16 %v2895_v8  ;;  %v2054_v61 = vunpack.c.l.bf16 %v2915_v49 }
  0x8e   :  { %3411 = vmatprep.mubr.bf16.mxu1 %v3576_v13  ;;  %v2908_v13 = vld [vmem:[%s4539_s0 + $0x70] ss:$8 sps:$4 sm:$0xff]  }
  0x8f   :  { %3426 = vmatpush3.bf16.msra.mxu0 %v3574_v11  ;;  %v2100_v25 = vrot.slane %v2032_v12, 1  ;;  %v2047_v26 = vunpack.c.l.bf16 %v2908_v13  ;;  %v2103_v31 = vrot.slane %v2034_v21, 1  ;;  %v2049_v32 = vunpack.c.h.bf16 %v2908_v13 }
  0x90   :  { %3462 = vmatpush3.bf16.msra.mxu1 %v3574_v11  ;;  %3427 = vmatprep.subr.bf16.mxu0 %v3579_v15  ;;  %v2031_v11 = vunpack.c.l.bf16 %v2892_v60 }
  0x91   :  { %3455 = vmatprep.subr.bf16.mxu1 %v3579_v15  ;;  %v2123_v37 = vrot.slane %v2047_v26, 1  ;;  %v2126_v42 = vrot.slane %v2049_v32, 1 }
  0x92   :  { %3380 = vmatmul.mubr.bf16.gmra.mxu0 %v3577_v14  ;;  %v2909_v14 = vld [vmem:[%s4539_s0 + $0x74] sm:$0x1]  ;;  %v2099_v22 = vrot.slane %v2031_v11, 1 }
  0x93   :  { %3412 = vmatmul.mubr.bf16.gmra.mxu1 %v3578_v16  ;;  %3428 = vmatpush3.bf16.msra.mxu0 %v3579_v15  ;;  %v2117_v16 = vrot.slane %v2043_v4, 1  ;;  %v2048_v27 = vunpack.c.l.bf16 %v2909_v14  ;;  %v2128_v54 = vsel %vm518_vm0, %v2126_v42, %v2127_v46 }
  0x94   :  { %3463 = vmatpush3.bf16.msra.mxu1 %v3579_v15  ;;  %3429 = vmatprep.subr.bf16.mxu0 %v3580_v17  ;;  %v2152_v15 = vpack.c.bf16 %v2098_v10, %v2095_v9  ;;  %v2101_v35 = vsel %vm518_vm0, %v2099_v22, %v2100_v25 }
  0x95   :  { %3456 = vmatprep.subr.bf16.mxu1 %v3580_v17  ;;  %3383 = vmatprep.mubr.bf16.mxu0 %v3581_v18  ;;  %v2120_v18 = vrot.slane %v2045_v6, 1  ;;  %v2124_v41 = vrot.slane %v2048_v27, 1 }
  0x96   :  { %3415 = vmatprep.mubr.bf16.mxu1 %v3582_v20  ;;  %v2033_v20 = vunpack.c.h.bf16 %v2892_v60  ;;  %v2053_v60 = vunpack.c.h.bf16 %v2912_v39 }
  0x97   :  { %3430 = vmatpush3.bf16.msra.mxu0 %v3580_v17  ;;  %v2122_v29 = vsel %vm518_vm0, %v2120_v18, %v2121_v19  ;;  %v2125_v50 = vsel %vm518_vm0, %v2123_v37, %v2124_v41 }
  0x98   :  { %3464 = vmatpush3.bf16.msra.mxu1 %v3580_v17  ;;  %3431 = vmatprep.subr.bf16.mxu0 %v3585_v44  ;;  %v2118_v17 = vrot.slane %v2044_v5, 1  ;;  %v2102_v30 = vrot.slane %v2033_v20, 1  ;;  %v2157_v58 = vpack.c.bf16 %v2128_v54, %v2125_v50  ;;  %v2132_v2 = vrot.slane %v2053_v60, 1 }
  0x99   :  { %3457 = vmatprep.subr.bf16.mxu1 %v3585_v44 }
  0x9a   :  { %3384 = vmatmul.mubr.bf16.gmra.mxu0 %v3583_v43  ;;  %v2119_v24 = vsel %vm518_vm0, %v2117_v16, %v2118_v17  ;;  %v2104_v40 = vsel %vm518_vm0, %v2102_v30, %v2103_v31  ;;  %v2035_v43 = vunpack.c.l.bf16 %v2896_v28 }
  0x9b   :  { %3416 = vmatmul.mubr.bf16.gmra.mxu1 %v3584_v62  ;;  %3432 = vmatpush3.bf16.msra.mxu0 %v3585_v44  ;;  %v2156_v34 = vpack.c.bf16 %v2122_v29, %v2119_v24  ;;  %v2153_v45 = vpack.c.bf16 %v2104_v40, %v2101_v35 }
  0x9c   :  { %3465 = vmatpush3.bf16.msra.mxu1 %v3585_v44  ;;  %3433 = vmatprep.subr.bf16.mxu0 %v3586_v3  ;;  %v2913_v44 = vld [vmem:[%s4539_s0 + $0x84] sm:$0x1]  ;;  %v2105_v52 = vrot.slane %v2035_v43, 1 }
  0x9d   :  { %3458 = vmatprep.subr.bf16.mxu1 %v3586_v3  ;;  %3435 = vmatprep.mubr.bf16.mxu0 %v2151_v56  ;;  %v2108_v56 = vrot.slane %v2037_v48, 1  ;;  %v2052_v57 = vunpack.c.l.bf16 %v2913_v44 }
  0x9e   :  { %3443 = vmatprep.mubr.bf16.mxu1 %v2155_v63  ;;  %v2107_v62 = vsel %vm518_vm0, %v2105_v52, %v2106_v55  ;;  %v2129_v63 = vrot.slane %v2051_v53, 1 }
  0x9f   :  { %3434 = vmatpush3.bf16.msra.mxu0 %v3586_v3  ;;  %v2130_v0 = vrot.slane %v2052_v57, 1  ;;  %v2110_v1 = vsel %vm518_vm0, %v2108_v56, %v2109_v59 }
  0xa0   :  { %3466 = vmatpush3.bf16.msra.mxu1 %v3586_v3  ;;  %v2133_v3 = vrot.slane %v2054_v61, 1  ;;  %v2154_v4 = vpack.c.bf16 %v2110_v1, %v2107_v62 }
  0xa1   :  { %v2131_v5 = vsel %vm518_vm0, %v2129_v63, %v2130_v0 }
  0xa2   :  { %3436 = vmatmul.mubr.bf16.vlgmr.msra.gmra.mxu0 %v2152_v15  ;;  %v2134_v6 = vsel %vm518_vm0, %v2132_v2, %v2133_v3 }
  0xa3   :  { %3444 = vmatmul.mubr.bf16.vlgmr.msra.gmra.mxu1 %v2156_v34  ;;  %3439 = vmatprep.mubr.bf16.mxu0 %v2153_v45  ;;  %v2158_v7 = vpack.c.bf16 %v2134_v6, %v2131_v5 }
  0xa4   :  { %3447 = vmatprep.mubr.bf16.mxu1 %v2157_v58 }
  0xaa   :  { %3440 = vmatmul.mubr.bf16.gmra.mxu0 %v2154_v4 }
  0xab   :  { %3448 = vmatmul.mubr.bf16.gmra.mxu1 %v2158_v7 }
  0xe2   :  { %v3181_v8 = vpop.f32.mrf.mxu0 }
  0xe3   :  { %v3213_v9 = vpop.f32.mrf.mxu1 }
  0xe4   :  { %v368_v10 = vadd.f32 %v3213_v9, %v3181_v8  ;;  %v214_v11 = vpop.f32.mrf.mxu0 }
  0xe5   :  { %v359_v12 = vpop.f32.mrf.mxu1 }
  0xe6   :  { %v360_v13 = vadd.f32 %v359_v12, %v214_v11  ;;  %v3182_v14 = vpop.f32.mrf.mxu0 }
  0xe7   :  { %v3214_v15 = vpop.f32.mrf.mxu1 }
  0xe8   :  { %v371_v16 = vadd.f32 %v3214_v15, %v3182_v14  ;;  %v217_v17 = vpop.f32.mrf.mxu0 }
  0xe9   :  { %v362_v18 = vpop.f32.mrf.mxu1 }
  0xea   :  { %v363_v19 = vadd.f32 %v362_v18, %v217_v17  ;;  %v3185_v20 = vpop.f32.mrf.mxu0 }
  0xeb   :  { %v3217_v21 = vpop.f32.mrf.mxu1 }
  0xec   :  { %v384_v22 = vadd.f32 %v3217_v21, %v3185_v20  ;;  %v230_v23 = vpop.f32.mrf.mxu0 }
  0xed   :  { %v375_v24 = vpop.f32.mrf.mxu1 }
  0xee   :  { %v376_v25 = vadd.f32 %v375_v24, %v230_v23  ;;  %v3186_v26 = vpop.f32.mrf.mxu0 }
  0xef   :  { %v3218_v27 = vpop.f32.mrf.mxu1 }
  0xf0   :  { %v387_v28 = vadd.f32 %v3218_v27, %v3186_v26  ;;  %v233_v29 = vpop.f32.mrf.mxu0 }
  0xf1   :  { %v378_v30 = vpop.f32.mrf.mxu1 }
  0xf2   :  { %v379_v31 = vadd.f32 %v378_v30, %v233_v29  ;;  %v3189_v32 = vpop.f32.mrf.mxu0 }
  0xf3   :  { %v3221_v33 = vpop.f32.mrf.mxu1 }
  0xf4   :  { %v400_v34 = vadd.f32 %v3221_v33, %v3189_v32  ;;  %v246_v35 = vpop.f32.mrf.mxu0 }
  0xf5   :  { %v391_v36 = vpop.f32.mrf.mxu1 }
  0xf6   :  { %v392_v37 = vadd.f32 %v391_v36, %v246_v35  ;;  %v3190_v38 = vpop.f32.mrf.mxu0 }
  0xf7   :  { %v3222_v39 = vpop.f32.mrf.mxu1 }
  0xf8   :  { %v403_v40 = vadd.f32 %v3222_v39, %v3190_v38  ;;  %v249_v41 = vpop.f32.mrf.mxu0 }
  0xf9   :  { %v394_v42 = vpop.f32.mrf.mxu1 }
  0xfa   :  { %v395_v43 = vadd.f32 %v394_v42, %v249_v41  ;;  %v3193_v44 = vpop.f32.mrf.mxu0 }
  0xfb   :  { %v3225_v45 = vpop.f32.mrf.mxu1 }
  0xfc   :  { %v416_v46 = vadd.f32 %v3225_v45, %v3193_v44  ;;  %v262_v47 = vpop.f32.mrf.mxu0 }
  0xfd   :  { %v407_v48 = vpop.f32.mrf.mxu1 }
  0xfe   :  { %v408_v49 = vadd.f32 %v407_v48, %v262_v47  ;;  %v3194_v50 = vpop.f32.mrf.mxu0 }
  0xff   :  { %v3226_v51 = vpop.f32.mrf.mxu1 }
 0x100   :  { %v419_v52 = vadd.f32 %v3226_v51, %v3194_v50  ;;  %v265_v53 = vpop.f32.mrf.mxu0 }
 0x101   :  { %v410_v54 = vpop.f32.mrf.mxu1 }
 0x102   :  { %v411_v55 = vadd.f32 %v410_v54, %v265_v53  ;;  %v3245_v56 = vpop.f32.mrf.mxu0 }
 0x103   :  { %v755_v57 = vadd.f32 %v3245_v56, %v368_v10  ;;  %v3277_v58 = vpop.f32.mrf.mxu1 }
 0x104   :  { %v690_v59 = vpop.f32.mrf.mxu0 }
 0x105   :  { %v974_v60 = vadd.f32 %v3277_v58, %v755_v57  ;;  %v753_v61 = vadd.f32 %v690_v59, %v360_v13  ;;  %v909_v62 = vpop.f32.mrf.mxu1 }
 0x106   :  { %v3246_v63 = vpop.f32.mrf.mxu0 }
 0x107   :  { %v4238_v0 = vadd.f32 %v909_v62, %v753_v61  ;;  %v756_v1 = vadd.f32 %v3246_v63, %v371_v16  ;;  %v3278_v2 = vpop.f32.mrf.mxu1 }
 0x108   :  { %v693_v3 = vpop.f32.mrf.mxu0 }
 0x109   :  { %v4240_v4 = vadd.f32 %v3278_v2, %v756_v1  ;;  %v754_v5 = vadd.f32 %v693_v3, %v363_v19  ;;  %v912_v6 = vpop.f32.mrf.mxu1 }
 0x10a   :  { %v3249_v7 = vpop.f32.mrf.mxu0 }
 0x10b   :  { %v4242_v8 = vadd.f32 %v912_v6, %v754_v5  ;;  %v759_v9 = vadd.f32 %v3249_v7, %v384_v22  ;;  %v3281_v10 = vpop.f32.mrf.mxu1 }
 0x10c   :  { %v706_v11 = vpop.f32.mrf.mxu0 }
 0x10d   :  { %v978_v12 = vadd.f32 %v3281_v10, %v759_v9  ;;  %v757_v14 = vadd.f32 %v706_v11, %v376_v25  ;;  %v925_v13 = vpop.f32.mrf.mxu1 }
 0x10e   :  { %v3250_v15 = vpop.f32.mrf.mxu0 }
 0x10f   :  { %v4244_v17 = vadd.f32 %v925_v13, %v757_v14  ;;  %v760_v18 = vadd.f32 %v3250_v15, %v387_v28  ;;  %v3282_v16 = vpop.f32.mrf.mxu1 }
 0x110   :  { %v709_v20 = vpop.f32.mrf.mxu0 }
 0x111   :  { %v4246_v21 = vadd.f32 %v3282_v16, %v760_v18  ;;  %v758_v23 = vadd.f32 %v709_v20, %v379_v31  ;;  %v928_v19 = vpop.f32.mrf.mxu1 }
 0x112   :  { %v3253_v24 = vpop.f32.mrf.mxu0 }
 0x113   :  { %v4248_v26 = vadd.f32 %v928_v19, %v758_v23  ;;  %v763_v27 = vadd.f32 %v3253_v24, %v400_v34  ;;  %v3285_v22 = vpop.f32.mrf.mxu1 }
 0x114   :  { %v722_v29 = vpop.f32.mrf.mxu0 }
 0x115   :  { %v982_v30 = vadd.f32 %v3285_v22, %v763_v27  ;;  %v761_v32 = vadd.f32 %v722_v29, %v392_v37  ;;  %v941_v25 = vpop.f32.mrf.mxu1 }
 0x116   :  { %v3254_v33 = vpop.f32.mrf.mxu0 }
 0x117   :  { %v4250_v35 = vadd.f32 %v941_v25, %v761_v32  ;;  %v764_v36 = vadd.f32 %v3254_v33, %v403_v40  ;;  %v3286_v28 = vpop.f32.mrf.mxu1 }
 0x118   :  { %v725_v38 = vpop.f32.mrf.mxu0 }
 0x119   :  { %v4252_v39 = vadd.f32 %v3286_v28, %v764_v36  ;;  %v762_v41 = vadd.f32 %v725_v38, %v395_v43  ;;  %v944_v31 = vpop.f32.mrf.mxu1 }
 0x11a   :  { %v3257_v42 = vpop.f32.mrf.mxu0 }
 0x11b   :  { %v4254_v44 = vadd.f32 %v944_v31, %v762_v41  ;;  %v767_v45 = vadd.f32 %v3257_v42, %v416_v46  ;;  %v3289_v34 = vpop.f32.mrf.mxu1 }
 0x11c   :  { %v738_v47 = vpop.f32.mrf.mxu0 }
 0x11d   :  { %v986_v48 = vadd.f32 %v3289_v34, %v767_v45  ;;  %v765_v50 = vadd.f32 %v738_v47, %v408_v49  ;;  %v957_v37 = vpop.f32.mrf.mxu1 }
 0x11e   :  { %v3258_v51 = vpop.f32.mrf.mxu0 }
 0x11f   :  { %v4256_v53 = vadd.f32 %v957_v37, %v765_v50  ;;  %v768_v54 = vadd.f32 %v3258_v51, %v419_v52  ;;  %v3290_v40 = vpop.f32.mrf.mxu1 }
 0x120   :  { %v741_v56 = vpop.f32.mrf.mxu0 }
 0x121   :  { %v4258_v57 = vadd.f32 %v3290_v40, %v768_v54  ;;  %v766_v58 = vadd.f32 %v741_v56, %v411_v55  ;;  %v960_v43 = vpop.f32.mrf.mxu1 }
 0x122   :  { %v3309_v59 = vpop.f32.mrf.mxu0 }
 0x123   :  { %4543 = vst [vmem:[#allocation2_spill] sm:$0xff] %v4258_v57  ;;  %v4260_v61 = vadd.f32 %v960_v43, %v766_v58  ;;  %v4262_v62 = vadd.f32 %v3309_v59, %v974_v60  ;;  %v4264_v46 = vpop.f32.mrf.mxu1 }
 0x124   :  { %v1128_v63 = vpop.f32.mrf.mxu0 }
 0x125   :  { %v4266_v49 = vpop.f32.mrf.mxu1  ;;  %v1191_v57 = vadd.f32 %v1128_v63, %v4238_v0  ;;  %v1539_v63 = vadd.f32 %v4264_v46, %v4262_v62 }
 0x126   :  { %v4268_v1 = vpop.f32.mrf.mxu0 }
 0x127   :  { %v4270_v2 = vpop.f32.mrf.mxu1 }
 0x128   :  { %v1131_v52 = vpop.f32.mrf.mxu0 }
 0x129   :  { %v4272_v3 = vpop.f32.mrf.mxu1 }
 0x12a   :  { %v3313_v5 = vpop.f32.mrf.mxu0 }
 0x12b   :  { %v4274_v55 = vadd.f32 %v3313_v5, %v978_v12  ;;  %v4276_v6 = vpop.f32.mrf.mxu1 }
 0x12c   :  { %v1144_v7 = vpop.f32.mrf.mxu0 }
 0x12d   :  { %v4278_v60 = vpop.f32.mrf.mxu1 }
 0x12e   :  { %v4280_v9 = vpop.f32.mrf.mxu0 }
 0x12f   :  { %v4282_v10 = vpop.f32.mrf.mxu1  ;;  %v1198_v62 = vadd.f32 %v4280_v9, %v4246_v21 }
 0x130   :  { %v4284_v11 = vpop.f32.mrf.mxu0 }
 0x131   :  { %v4286_v14 = vpop.f32.mrf.mxu1  ;;  %v1544_v9 = vadd.f32 %v4282_v10, %v1198_v62 }
 0x132   :  { %v3317_v13 = vpop.f32.mrf.mxu0 }
 0x133   :  { %v4288_v15 = vadd.f32 %v3317_v13, %v982_v30  ;;  %v4290_v18 = vpop.f32.mrf.mxu1 }
 0x134   :  { %v4292_v12 = vpop.f32.mrf.mxu0 }
 0x135   :  { %v4294_v16 = vpop.f32.mrf.mxu1 }
 0x136   :  { %v4296_v20 = vpop.f32.mrf.mxu0 }
 0x137   :  { %v4298_v23 = vpop.f32.mrf.mxu1 }
 0x138   :  { %v4300_v19 = vpop.f32.mrf.mxu0 }
 0x139   :  { %v4302_v24 = vpop.f32.mrf.mxu1 }
 0x13a   :  { %v3321_v27 = vpop.f32.mrf.mxu0 }
 0x13b   :  { %v4304_v22 = vadd.f32 %v3321_v27, %v986_v48  ;;  %v4306_v29 = vpop.f32.mrf.mxu1 }
 0x13c   :  { %4545 = vst [vmem:[#allocation4_spill] sm:$0xff] %v4306_v29  ;;  %v4308_v30 = vpop.f32.mrf.mxu0 }
 0x13d   :  { %4544 = vst [vmem:[#allocation3_spill] sm:$0xff] %v4304_v22  ;;  %v4310_v32 = vpop.f32.mrf.mxu1 }
 0x13e   :  { %4546 = vst [vmem:[#allocation5_spill] sm:$0xff] %v4310_v32  ;;  %v4312_v25 = vpop.f32.mrf.mxu0 }
 0x13f   :  { %4547 = vst [vmem:[#allocation6_spill] sm:$0xff] %v4312_v25  ;;  %v4314_v33 = vpop.f32.mrf.mxu1 }
 0x140   :  { %4548 = vst [vmem:[#allocation7_spill] sm:$0xff] %v4314_v33  ;;  %v4316_v36 = vpop.f32.mrf.mxu0 }
 0x141   :  { %4549 = vst [vmem:[#allocation8_spill] sm:$0xff] %v4316_v36  ;;  %v4318_v28 = vpop.f32.mrf.mxu1 }
 0x142   :  { %4550 = vst [vmem:[#allocation9_spill] sm:$0xff] %v4318_v28  ;;  %v3373_v38 = vpop.f32.mrf.mxu0 }
 0x143   :  { %v3405_v41 = vpop.f32.mrf.mxu1 }
 0x144   :  { %v1693_v31 = vpop.f32.mrf.mxu0 }
 0x145   :  { %v1912_v42 = vpop.f32.mrf.mxu1 }
 0x146   :  { %v3374_v45 = vpop.f32.mrf.mxu0 }
 0x147   :  { %v3406_v34 = vpop.f32.mrf.mxu1 }
 0x148   :  { %v1696_v47 = vpop.f32.mrf.mxu0 }
 0x149   :  { %v1915_v48 = vpop.f32.mrf.mxu1 }
 0x14a   :  { %v3377_v50 = vpop.f32.mrf.mxu0 }
 0x14b   :  { %v4320_v37 = vpop.f32.mrf.mxu1 }
 0x14c   :  { %v1709_v51 = vpop.f32.mrf.mxu0 }
 0x14d   :  { %v1928_v54 = vpop.f32.mrf.mxu1 }
 0x14e   :  { %v4322_v40 = vpop.f32.mrf.mxu0 }
 0x14f   :  { %v4324_v56 = vpop.f32.mrf.mxu1 }
 0x150   :  { %v1712_v58 = vpop.f32.mrf.mxu0 }
 0x151   :  { %v4326_v43 = vpop.f32.mrf.mxu1 }
 0x152   :  { %v4328_v59 = vpop.f32.mrf.mxu0 }
 0x153   :  { %4551 = vst [vmem:[#allocation10_spill] sm:$0xff] %v4328_v59  ;;  %v4330_v5 = vpop.f32.mrf.mxu1 }
 0x154   :  { %4552 = vst [vmem:[#allocation11_spill] sm:$0xff] %v4330_v5  ;;  %v4332_v13 = vpop.f32.mrf.mxu0  ;;  %v1192_v5 = vadd.f32 %v1131_v52, %v4242_v8 }
 0x155   :  { %v4334_v27 = vpop.f32.mrf.mxu1 }
 0x156   :  { %4553 = vst [vmem:[#allocation12_spill] sm:$0xff] %v4334_v27  ;;  %v4336_v33 = vpop.f32.mrf.mxu0  ;;  %v1538_v8 = vadd.f32 %v4272_v3, %v1192_v5 }
 0x157   :  { %4554 = vst [vmem:[#allocation13_spill] sm:$0xff] %v4336_v33  ;;  %v4338_v29 = vpop.f32.mrf.mxu1  ;;  %v1194_v33 = vadd.f32 %v4268_v1, %v4240_v4 }
 0x158   :  { %4555 = vst [vmem:[#allocation14_spill] sm:$0xff] %v4338_v29  ;;  %v4340_v22 = vpop.f32.mrf.mxu0  ;;  %v1537_v29 = vadd.f32 %v4266_v49, %v1191_v57  ;;  %v1758_v49 = vadd.f32 %v3373_v38, %v1539_v63 }
 0x159   :  { %v4342_v28 = vpop.f32.mrf.mxu1  ;;  %v1540_v57 = vadd.f32 %v4270_v2, %v1194_v33 }
 0x15a   :  { %4556 = vst [vmem:[#allocation15_spill] sm:$0xff] %v4342_v28  ;;  %v4344_v25 = vpop.f32.mrf.mxu0  ;;  %v1756_v52 = vadd.f32 %v1693_v31, %v1537_v29  ;;  %v1977_v2 = vadd.f32 %v3405_v41, %v1758_v49 }
 0x15b   :  { %4557 = vst [vmem:[#allocation16_spill] sm:$0xff] %v4344_v25  ;;  %v4347_v32 = vpop.f32.mrf.mxu1  ;;  %v1195_v25 = vadd.f32 %v1144_v7, %v4244_v17  ;;  %v1196_v17 = vadd.f32 %v4284_v11, %v4248_v26  ;;  %v1759_v3 = vadd.f32 %v3374_v45, %v1540_v57  ;;  %v1199_v26 = vadd.f32 %v4292_v12, %v4250_v35 }
 0x15c   :  { %4558 = vst [vmem:[#allocation17_spill] sm:$0xff] %v4347_v32  ;;  %v4349_v59 = vpop.f32.mrf.mxu0  ;;  %v1975_v46 = vadd.f32 %v1912_v42, %v1756_v52 }
 0x15d   :  { %v4352_v36 = vpop.f32.mrf.mxu1  ;;  %v1541_v1 = vadd.f32 %v4278_v60, %v1195_v25  ;;  %v1543_v60 = vadd.f32 %v4276_v6, %v4274_v55  ;;  %v1542_v25 = vadd.f32 %v4286_v14, %v1196_v17  ;;  %v1978_v42 = vadd.f32 %v3406_v34, %v1759_v3 }
 0x15e   :  { %4559 = vst [vmem:[#allocation18_spill] sm:$0xff] %v4352_v36  ;;  %v4354_v27 = vpop.f32.mrf.mxu0  ;;  %v1757_v36 = vadd.f32 %v1696_v47, %v1538_v8  ;;  %v1202_v8 = vadd.f32 %v4296_v20, %v4252_v39  ;;  %v1203_v17 = vadd.f32 %v4308_v30, %v4256_v53  ;;  %v4561_v53 = vld [vmem:[#allocation8_spill] sm:$0xff] }
 0x15f   :  { %4560 = vst [vmem:[#allocation19_spill] sm:$0xff] %v4354_v27  ;;  %v4359_v28 = vpop.f32.mrf.mxu1  ;;  %v1760_v31 = vadd.f32 %v1709_v51, %v1541_v1  ;;  %v1762_v47 = vadd.f32 %v3377_v50, %v1543_v60  ;;  %v1761_v6 = vadd.f32 %v1712_v58, %v1542_v25  ;;  %v1204_v30 = vadd.f32 %v4561_v53, %v4260_v61 }
 0x160   :  { %v4362_v0 = vpop.f32.mrf.mxu0  ;;  %v1976_v33 = vadd.f32 %v1915_v48, %v1757_v36  ;;  %v1200_v36 = vadd.f32 %v4300_v19, %v4254_v44  ;;  %v1547_v48 = vadd.f32 %v4290_v18, %v4288_v15  ;;  %v1545_v44 = vadd.f32 %v4294_v16, %v1199_v26  ;;  %v4564_v26 = vld [vmem:[#allocation5_spill] sm:$0xff] }
 0x161   :  { %v4367_v32 = vpop.f32.mrf.mxu1  ;;  %v1979_v55 = vadd.f32 %v1928_v54, %v1760_v31  ;;  %v1763_v19 = vadd.f32 %v4322_v40, %v1544_v9  ;;  %v1981_v15 = vadd.f32 %v4320_v37, %v1762_v47  ;;  %v1980_v40 = vadd.f32 %v4326_v43, %v1761_v6  ;;  %v4565_v9 = vld [vmem:[#allocation13_spill] sm:$0xff] }
 0x162   :  { %v3437_v27 = vpop.f32.mrf.mxu0  ;;  %v1546_v52 = vadd.f32 %v4302_v24, %v1200_v36  ;;  %v1764_v18 = vadd.f32 %v4332_v13, %v1545_v44  ;;  %v1548_v3 = vadd.f32 %v4298_v23, %v1202_v8  ;;  %v4566_v23 = vld [vmem:[#allocation15_spill] sm:$0xff] }
 0x163   :  { %v4370_v4 = vpop.f32.mrf.mxu1  ;;  %v4389_v45 = vadd.f32 %v3437_v27, %v1977_v2  ;;  %v1982_v39 = vadd.f32 %v4324_v56, %v1763_v19  ;;  %v4562_v56 = vld [vmem:[#allocation10_spill] sm:$0xff]  ;;  %v4570_v19 = vld [vmem:[#allocation11_spill] sm:$0xff] }
 0x164   :  { %v2258_v7 = vpop.f32.mrf.mxu0  ;;  %v1765_v20 = vadd.f32 %v4340_v22, %v1546_v52  ;;  %v1766_v31 = vadd.f32 %v4562_v56, %v1547_v48  ;;  %v4563_v22 = vld [vmem:[#allocation12_spill] sm:$0xff]  ;;  %v4569_v48 = vld [vmem:[#allocation9_spill] sm:$0xff]  ;;  %v4571_v52 = vld [vmem:[#allocation3_spill] sm:$0xff] }
 0x165   :  { %v4377_v29 = vpop.f32.mrf.mxu1  ;;  %v4379_v38 = vadd.f32 %v2258_v7, %v1975_v46  ;;  %v2362_v54 = vmul.f32 %v4389_v45, %v4389_v45  ;;  %v1550_v44 = vadd.f32 %v4569_v48, %v1204_v30 }
 0x166   :  { %v3438_v5 = vpop.f32.mrf.mxu0  ;;  %v1984_v36 = vadd.f32 %v4566_v23, %v1765_v20  ;;  %v4577_v30 = vld [vmem:[#allocation19_spill] sm:$0xff] }
 0x167   :  { %v4386_v11 = vpop.f32.mrf.mxu1  ;;  %v2360_v35 = vmul.f32 %v4379_v38, %v4379_v38  ;;  %v4397_v12 = vadd.f32 %v3438_v5, %v1978_v42  ;;  %v1983_v5 = vadd.f32 %v4563_v22, %v1764_v18  ;;  %v1767_v42 = vadd.f32 %v4565_v9, %v1548_v3 }
 0x168   :  { %v2261_v21 = vpop.f32.mrf.mxu0 }
 0x169   :  { %v4391_v41 = vadd.f32 %v2261_v21, %v1976_v33  ;;  %v2293_v50 = vpop.f32.mrf.mxu1  ;;  %v2363_v57 = vmul.f32 %v4397_v12, %v4397_v12  ;;  %v1549_v21 = vadd.f32 %v4564_v26, %v1203_v17  ;;  %v4446_v61 = vadd.f32 %v4377_v29, %v1983_v5 }
 0x16a   :  { %v3441_v14 = vpop.f32.mrf.mxu0 }
 0x16b   :  { %v2339_v10 = vadd.f32 %v4391_v41, %v4379_v38  ;;  %v2361_v34 = vmul.f32 %v4391_v41, %v4391_v41  ;;  %v4425_v24 = vadd.f32 %v3441_v14, %v1981_v15  ;;  %v3449_v37 = vpop.f32.mrf.mxu1  ;;  %v4572_v15 = vld [vmem:[#allocation4_spill] sm:$0xff] }
 0x16c   :  { %v2274_v51 = vpop.f32.mrf.mxu0  ;;  %v1551_v18 = vadd.f32 %v4572_v15, %v4571_v52 }
 0x16d   :  { %v2340_v58 = vadd.f32 %v2339_v10, %v4389_v45  ;;  %v2376_v27 = vadd.f32 %v2361_v34, %v2360_v35  ;;  %v4410_v63 = vadd.f32 %v2274_v51, %v1979_v55  ;;  %v2306_v47 = vpop.f32.mrf.mxu1  ;;  %v2366_v55 = vmul.f32 %v4425_v24, %v4425_v24  ;;  %v4567_v35 = vld [vmem:[#allocation2_spill] sm:$0xff] }
 0x16e   :  { %v3442_v16 = vpop.f32.mrf.mxu0  ;;  %v4568_v10 = vld [vmem:[#allocation6_spill] sm:$0xff]  ;;  %v1985_v51 = vadd.f32 %v4570_v19, %v1766_v31 }
 0x16f   :  { %v2377_v49 = vadd.f32 %v2376_v27, %v2362_v54  ;;  %v2341_v1 = vadd.f32 %v2340_v58, %v4397_v12  ;;  %v2364_v43 = vmul.f32 %v4410_v63, %v4410_v63  ;;  %v4437_v33 = vadd.f32 %v3442_v16, %v1982_v39  ;;  %v4573_v16 = vld [vmem:[#allocation14_spill] sm:$0xff]  ;;  %v4574_v39 = vld [vmem:[#allocation7_spill] sm:$0xff] }
 0x170   :  { %v2277_v13 = vpop.f32.mrf.mxu0  ;;  %v1206_v34 = vadd.f32 %v4568_v10, %v4567_v35  ;;  %v1768_v54 = vadd.f32 %v4349_v59, %v1549_v21  ;;  %v4456_v58 = vadd.f32 %v2293_v50, %v1984_v36  ;;  %v2368_v59 = vmul.f32 %v4446_v61, %v4446_v61 }
 0x171   :  { %v2342_v7 = vadd.f32 %v2341_v1, %v4410_v63  ;;  %v2378_v62 = vadd.f32 %v2377_v49, %v2363_v57  ;;  %v4430_v46 = vadd.f32 %v2277_v13, %v1980_v40  ;;  %v2367_v29 = vmul.f32 %v4437_v33, %v4437_v33  ;;  %v3450_v49 = vpop.f32.mrf.mxu1  ;;  %v4575_v13 = vld [vmem:[#allocation16_spill] sm:$0xff] }
 0x172   :  { %v1986_v40 = vadd.f32 %v4573_v16, %v1767_v42  ;;  %v1769_v57 = vadd.f32 %v4362_v0, %v1550_v44  ;;  %v4466_v1 = vadd.f32 %v4370_v4, %v1985_v51  ;;  %v1552_v20 = vadd.f32 %v4574_v39, %v1206_v34 }
 0x173   :  { %v2379_v2 = vadd.f32 %v2378_v62, %v2364_v43  ;;  %v2343_v60 = vadd.f32 %v2342_v7, %v4430_v46  ;;  %v2365_v25 = vmul.f32 %v4430_v46, %v4430_v46  ;;  %v1770_v7 = vadd.f32 %v4575_v13, %v1551_v18  ;;  %v4576_v43 = vld [vmem:[#allocation18_spill] sm:$0xff]  ;;  %v2309_v22 = vpop.f32.mrf.mxu1 }
 0x174   :  { %v1987_v62 = vadd.f32 %v4576_v43, %v1768_v54  ;;  %v4475_v3 = vadd.f32 %v4386_v11, %v1986_v40  ;;  %v2369_v0 = vmul.f32 %v4456_v58, %v4456_v58  ;;  %v1771_v56 = vadd.f32 %v4577_v30, %v1552_v20 }
 0x175   :  { %v2344_v6 = vadd.f32 %v2343_v60, %v4425_v24  ;;  %v2380_v14 = vadd.f32 %v2379_v2, %v2365_v25  ;;  %v1988_v31 = vadd.f32 %v4367_v32, %v1769_v57  ;;  %v2370_v5 = vmul.f32 %v4466_v1, %v4466_v1  ;;  %v4578_v25 = vld [vmem:[#allocation17_spill] sm:$0xff] }
 0x176   :  { %v4484_v2 = vadd.f32 %v2306_v47, %v1987_v62  ;;  %v1989_v26 = vadd.f32 %v4578_v25, %v1770_v7  ;;  %v2371_v21 = vmul.f32 %v4475_v3, %v4475_v3  ;;  %v1990_v32 = vadd.f32 %v4359_v28, %v1771_v56  ;;  %v2338_v56 = vld [vmem:[%s4541_s3] sm:$0x1] }
 0x177   :  { %v2345_v27 = vadd.f32 %v2344_v6, %v4437_v33  ;;  %v2381_v8 = vadd.f32 %v2380_v14, %v2366_v55  ;;  %v2334_v9 = vadd.f32 %v2309_v22, %v1988_v31  ;;  %v2406_v43 = vlaneseq }
 0x178   :  { %v2335_v36 = vadd.f32 %v3449_v37, %v1989_v26  ;;  %v2372_v55 = vmul.f32 %v4484_v2, %v4484_v2  ;;  %v2336_v14 = vadd.f32 %v3450_v49, %v1990_v32 }
 0x179   :  { %v2346_v50 = vadd.f32 %v2345_v27, %v4446_v61  ;;  %v2382_v17 = vadd.f32 %v2381_v8, %v2367_v29  ;;  %v2373_v10 = vmul.f32 %v2334_v9, %v2334_v9  ;;  %v2407_v62 = vshrl.u32 %v2406_v43, 7 }
 0x17a   :  { %v2374_v48 = vmul.f32 %v2335_v36, %v2335_v36  ;;  %v2375_v51 = vmul.f32 %v2336_v14, %v2336_v14 }
 0x17b   :  { %v2383_v4 = vadd.f32 %v2382_v17, %v2368_v59  ;;  %v2347_v53 = vadd.f32 %v2346_v50, %v4456_v58 }
 0x17d   :  { %v2348_v60 = vadd.f32 %v2347_v53, %v4466_v1  ;;  %v2384_v11 = vadd.f32 %v2383_v4, %v2369_v0  ;;  %v2337_v0 = vld [vmem:[%s4540_s2] sm:$0x1]  ;;  %v2408_v4 = vsub.s32 0, %v2407_v62 }
 0x17f   :  { %v2349_v42 = vadd.f32 %v2348_v60, %v4475_v3  ;;  %v2385_v23 = vadd.f32 %v2384_v11, %v2370_v5 }
 0x181   :  { %v2350_v47 = vadd.f32 %v2349_v42, %v4484_v2  ;;  %v2386_v6 = vadd.f32 %v2385_v23, %v2371_v21 }
 0x183   :  { %v2351_v35 = vadd.f32 %v2350_v47, %v2334_v9  ;;  %v2387_v34 = vadd.f32 %v2386_v6, %v2372_v55 }
 0x185   :  { %v2352_v44 = vadd.f32 %v2351_v35, %v2335_v36  ;;  %v2388_v19 = vadd.f32 %v2387_v34, %v2373_v10 }
 0x187   :  { %v2353_v54 = vadd.f32 %v2352_v44, %v2336_v14  ;;  %v2389_v29 = vadd.f32 %v2388_v19, %v2374_v48 }
 0x189   :  { %v2354_v27 = vrot.slane %v2353_v54, 4  ;;  %v2390_v8 = vadd.f32 %v2389_v29, %v2375_v51 }
 0x18b   :  { %v2355_v28 = vadd.f32 %v2354_v27, %v2353_v54  ;;  %v2391_v37 = vrot.slane %v2390_v8, 4 }
 0x18d   :  { %v2356_v52 = vrot.slane %v2355_v28, 2  ;;  %v2392_v15 = vadd.f32 %v2391_v37, %v2390_v8 }
 0x18f   :  { %v2357_v18 = vadd.f32 %v2356_v52, %v2355_v28  ;;  %v2393_v16 = vrot.slane %v2392_v15, 2 }
 0x191   :  { %v2358_v40 = vrot.slane %v2357_v18, 1  ;;  %v2394_v57 = vadd.f32 %v2393_v16, %v2392_v15 }
 0x193   :  { %v2359_v49 = vadd.f32 %v2358_v40, %v2357_v18  ;;  %v2395_v59 = vrot.slane %v2394_v57, 1 }
 0x195   :  { %v2396_v50 = vadd.f32 %v2395_v59, %v2394_v57  ;;  %v2397_v17 = vmul.f32 0.0078125, %v2359_v49 }
 0x197   :  { %v2398_v39 = vmul.f32 0.0078125, %v2396_v50  ;;  %v2399_v20 = vmul.f32 %v2397_v17, %v2397_v17 }
 0x199   :  { %v2400_v13 = vsub.f32 %v2398_v39, %v2399_v20 }
 0x19b   :  { %v2401_v7 = vadd.f32 1e-05, %v2400_v13 }
 0x19d   :  { %3587 = vrsqrt.f32 %v2401_v7 }
 0x1aa   :  { %v3588_v53 = vpop.eup %3587 }
 0x1ab   :  { %v2403_v30 = vmul.f32 %v3588_v53, %v2337_v0 }
 0x1ad   :  { %v2404_v31 = vmul.f32 %v2403_v30, %v2397_v17  ;;  %v2409_v22 = vrot.slane %v2403_v30, %v2408_v4 }
 0x1af   :  { %v2405_v5 = vsub.f32 %v2338_v56, %v2404_v31  ;;  %v2410_v60 = vmul.f32 %v2409_v22, %v4379_v38  ;;  %v2411_v11 = vmul.f32 %v2409_v22, %v4391_v41  ;;  %v2414_v25 = vmul.f32 %v2409_v22, %v4410_v63 }
 0x1b0   :  { %v2415_v26 = vmul.f32 %v2409_v22, %v4430_v46  ;;  %v2416_v21 = vmul.f32 %v2409_v22, %v4425_v24  ;;  %v2417_v42 = vmul.f32 %v2409_v22, %v4437_v33  ;;  %v2418_v23 = vmul.f32 %v2409_v22, %v4446_v61 }
 0x1b1   :  { %v2419_v32 = vmul.f32 %v2409_v22, %v4456_v58  ;;  %v2420_v55 = vmul.f32 %v2409_v22, %v4466_v1  ;;  %v2421_v47 = vmul.f32 %v2409_v22, %v4475_v3  ;;  %v2422_v38 = vmul.f32 %v2409_v22, %v4484_v2 }
 0x1b2   :  { %v2423_v6 = vmul.f32 %v2409_v22, %v2334_v9  ;;  %v2424_v41 = vmul.f32 %v2409_v22, %v2335_v36  ;;  %v2412_v63 = vmul.f32 %v2409_v22, %v4389_v45  ;;  %v2413_v46 = vmul.f32 %v2409_v22, %v4397_v12 }
 0x1b3   :  { %v2425_v35 = vmul.f32 %v2409_v22, %v2336_v14  ;;  %v2430_v24 = vrot.slane %v2405_v5, %v2408_v4 }
 0x1b5   :  { %v2432_v10 = vadd.f32 %v2430_v24, %v2410_v60  ;;  %v2433_v33 = vadd.f32 %v2430_v24, %v2411_v11  ;;  %v2434_v34 = vadd.f32 %v2430_v24, %v2412_v63  ;;  %v2435_v61 = vadd.f32 %v2430_v24, %v2413_v46 }
 0x1b6   :  { %v2436_v48 = vadd.f32 %v2430_v24, %v2414_v25  ;;  %v2437_v58 = vadd.f32 %v2430_v24, %v2415_v26  ;;  %v2438_v44 = vadd.f32 %v2430_v24, %v2416_v21  ;;  %v2439_v1 = vadd.f32 %v2430_v24, %v2417_v42 }
 0x1b7   :  { %v2440_v19 = vadd.f32 %v2430_v24, %v2418_v23  ;;  %v2441_v3 = vadd.f32 %v2430_v24, %v2419_v32  ;;  %v2442_v51 = vadd.f32 %v2430_v24, %v2420_v55  ;;  %v2443_v2 = vadd.f32 %v2430_v24, %v2421_v47 }
 0x1b8   :  { %v2444_v9 = vadd.f32 %v2430_v24, %v2422_v38  ;;  %v2445_v36 = vadd.f32 %v2430_v24, %v2423_v6  ;;  %v2446_v54 = vadd.f32 %v2430_v24, %v2424_v41  ;;  %v2447_v45 = vadd.f32 %v2430_v24, %v2425_v35 }
 0x1b9   :  { %v2448_v29 = vmax.f32 %v2432_v10, 0.0  ;;  %v2449_v12 = vmax.f32 %v2433_v33, 0.0  ;;  %v2450_v14 = vmax.f32 %v2434_v34, 0.0  ;;  %v2451_v27 = vmax.f32 %v2435_v61, 0.0 }
 0x1ba   :  { %v2452_v8 = vmax.f32 %v2436_v48, 0.0  ;;  %v2453_v28 = vmax.f32 %v2437_v58, 0.0  ;;  %v2454_v37 = vmax.f32 %v2438_v44, 0.0  ;;  %v2455_v52 = vmax.f32 %v2439_v1, 0.0 }
 0x1bb   :  { %v2456_v15 = vmax.f32 %v2440_v19, 0.0  ;;  %v2457_v18 = vmax.f32 %v2441_v3, 0.0  ;;  %v2458_v16 = vmax.f32 %v2442_v51, 0.0  ;;  %v2459_v40 = vmax.f32 %v2443_v2, 0.0 }
 0x1bc   :  { %v2460_v57 = vmax.f32 %v2444_v9, 0.0  ;;  %v2461_v49 = vmax.f32 %v2445_v36, 0.0  ;;  %v2462_v59 = vmax.f32 %v2446_v54, 0.0  ;;  %v2463_v50 = vmax.f32 %v2447_v45, 0.0 }
 0x1bd   :  { %v2975_v17 = vpack.c.bf16 %v2449_v12, %v2448_v29  ;;  %v2980_v39 = vpack.c.bf16 %v2451_v27, %v2450_v14  ;;  %v2985_v20 = vpack.c.bf16 %v2453_v28, %v2452_v8  ;;  %v2990_v13 = vpack.c.bf16 %v2455_v52, %v2454_v37 }
 0x1be   :  { %v2995_v7 = vpack.c.bf16 %v2457_v18, %v2456_v15  ;;  %v3000_v43 = vpack.c.bf16 %v2459_v40, %v2458_v16  ;;  %v3005_v62 = vpack.c.bf16 %v2461_v49, %v2460_v57  ;;  %v3010_v0 = vpack.c.bf16 %v2463_v50, %v2462_v59 }
 0x1bf   :  { %2976 = vst [vmem:[%s4542_s4] sm:$0xff] %v2975_v17   ;;  %3012 = vst [vmem:[%s4542_s4 + $0x8] sm:$0xff] %v2980_v39  }
 0x1c0   :  { %3013 = vst [vmem:[%s4542_s4 + $0x10] sm:$0xff] %v2985_v20   ;;  %3014 = vst [vmem:[%s4542_s4 + $0x18] sm:$0xff] %v2990_v13  }
 0x1c1   :  { %3015 = vst [vmem:[%s4542_s4 + $0x20] sm:$0xff] %v2995_v7   ;;  %3016 = vst [vmem:[%s4542_s4 + $0x28] sm:$0xff] %v3000_v43  }
 0x1c2   :  { %3017 = vst [vmem:[%s4542_s4 + $0x30] sm:$0xff] %v3005_v62   ;;  %3018 = vst [vmem:[%s4542_s4 + $0x38] sm:$0xff] %v3010_v0  }

// kernel: bottleneck_forward.5
= control target key start
LH: loop header
LB: loop body
LE: loop exit
PB: predicated region body
PF: predicated region fallthrough
CT: control target
= control target key end

     0   :  { %s1314_s1 = inlined_call_operand.vmem [shape: bf16[128,128], index: 1, kind: input, shape index: {}]   ;;  %s1315_s5 = inlined_call_operand.vmem [shape: bf16[128,128], index: 5, kind: input, shape index: {}]   ;;  %s1316_s0 = inlined_call_operand.vmem [shape: bf16[128,128], index: 0, kind: input, shape index: {}]   ;;  %s1317_s4 = inlined_call_operand.vmem [shape: bf16[128,128], index: 4, kind: input, shape index: {}]   ;;  %s1318_s2 = inlined_call_operand.vmem [shape: f32[1,128], index: 2, kind: input, shape index: {}]   ;;  %s1319_s6 = inlined_call_operand.vmem [shape: f32[1,128], index: 6, kind: input, shape index: {}]   ;;  %s1320_s3 = inlined_call_operand.vmem [shape: f32[1,128], index: 3, kind: input, shape index: {}]   ;;  %s1321_s7 = inlined_call_operand.vmem [shape: f32[1,128], index: 7, kind: input, shape index: {}]   ;;  %s1322_s8 = inlined_call_operand.vmem [shape: f32[128,128], index: 8, kind: output, shape index: {}]  }
   0x1   :  { %v882_v0 = vld [vmem:[%s1314_s1 + $0x38] sm:$0xff]   ;;  %v884_v2 = vld [vmem:[%s1314_s1 + $0x30] sm:$0xff]   ;;  %v886_v4 = vld [vmem:[%s1314_s1 + $0x28] sm:$0xff]  }
   0x2   :  { %v883_v1 = vld [vmem:[%s1315_s5 + $0x38] sm:$0xff]   ;;  %818 = vmatprep.subr.bf16.mxu0 %v882_v0  ;;  %v885_v3 = vld [vmem:[%s1315_s5 + $0x30] sm:$0xff]   ;;  %v887_v5 = vld [vmem:[%s1315_s5 + $0x28] sm:$0xff]  }
   0x3   :  { %850 = vmatprep.subr.bf16.mxu1 %v883_v1  ;;  %819 = vmatpush3.bf16.msra.mxu0 %v882_v0  ;;  %v888_v6 = vld [vmem:[%s1314_s1 + $0x20] sm:$0xff]   ;;  %v890_v8 = vld [vmem:[%s1314_s1 + $0x18] sm:$0xff]   ;;  %v892_v10 = vld [vmem:[%s1314_s1 + $0x10] sm:$0xff]  }
   0x4   :  { %851 = vmatpush3.bf16.msra.mxu1 %v883_v1  ;;  %820 = vmatprep.subr.bf16.mxu0 %v884_v2  ;;  %v889_v7 = vld [vmem:[%s1315_s5 + $0x20] sm:$0xff]   ;;  %v891_v9 = vld [vmem:[%s1315_s5 + $0x18] sm:$0xff]   ;;  %v893_v11 = vld [vmem:[%s1315_s5 + $0x10] sm:$0xff]  }
   0x5   :  { %852 = vmatprep.subr.bf16.mxu1 %v885_v3  ;;  %v898_v12 = vld [vmem:[%s1316_s0] sm:$0xff]   ;;  %v894_v14 = vld [vmem:[%s1314_s1 + $0x8] sm:$0xff]   ;;  %v902_v20 = vld [vmem:[%s1316_s0 + $0x10] sm:$0xff]  }
   0x6   :  { %v899_v13 = vld [vmem:[%s1317_s4] sm:$0xff]   ;;  %834 = vmatprep.mubr.bf16.mxu0 %v898_v12  ;;  %v895_v15 = vld [vmem:[%s1315_s5 + $0x8] sm:$0xff]   ;;  %v903_v21 = vld [vmem:[%s1317_s4 + $0x10] sm:$0xff]  }
   0x7   :  { %821 = vmatpush3.bf16.msra.mxu0 %v884_v2  ;;  %866 = vmatprep.mubr.bf16.mxu1 %v899_v13  ;;  %v896_v16 = vld [vmem:[%s1314_s1] sm:$0xff]   ;;  %v900_v18 = vld [vmem:[%s1316_s0 + $0x8] sm:$0xff]   ;;  %v904_v22 = vld [vmem:[%s1316_s0 + $0x18] sm:$0xff]  }
   0x8   :  { %853 = vmatpush3.bf16.msra.mxu1 %v885_v3  ;;  %822 = vmatprep.subr.bf16.mxu0 %v886_v4  ;;  %v897_v17 = vld [vmem:[%s1315_s5] sm:$0xff]   ;;  %v901_v19 = vld [vmem:[%s1317_s4 + $0x8] sm:$0xff]   ;;  %v905_v23 = vld [vmem:[%s1317_s4 + $0x18] sm:$0xff]  }
   0x9   :  { %854 = vmatprep.subr.bf16.mxu1 %v887_v5  ;;  %v906_v24 = vld [vmem:[%s1316_s0 + $0x20] sm:$0xff]   ;;  %v908_v26 = vld [vmem:[%s1316_s0 + $0x28] sm:$0xff]   ;;  %v910_v28 = vld [vmem:[%s1316_s0 + $0x30] sm:$0xff]  }
   0xa   :  { %v907_v25 = vld [vmem:[%s1317_s4 + $0x20] sm:$0xff]   ;;  %v909_v27 = vld [vmem:[%s1317_s4 + $0x28] sm:$0xff]   ;;  %v911_v29 = vld [vmem:[%s1317_s4 + $0x30] sm:$0xff]  }
   0xb   :  { %823 = vmatpush3.bf16.msra.mxu0 %v886_v4  ;;  %v912_v30 = vld [vmem:[%s1316_s0 + $0x38] sm:$0xff]  }
   0xc   :  { %855 = vmatpush3.bf16.msra.mxu1 %v887_v5  ;;  %824 = vmatprep.subr.bf16.mxu0 %v888_v6  ;;  %v913_v31 = vld [vmem:[%s1317_s4 + $0x38] sm:$0xff]  }
   0xd   :  { %856 = vmatprep.subr.bf16.mxu1 %v889_v7 }
   0xf   :  { %825 = vmatpush3.bf16.msra.mxu0 %v888_v6 }
  0x10   :  { %857 = vmatpush3.bf16.msra.mxu1 %v889_v7  ;;  %826 = vmatprep.subr.bf16.mxu0 %v890_v8 }
  0x11   :  { %858 = vmatprep.subr.bf16.mxu1 %v891_v9 }
  0x13   :  { %827 = vmatpush3.bf16.msra.mxu0 %v890_v8 }
  0x14   :  { %859 = vmatpush3.bf16.msra.mxu1 %v891_v9  ;;  %828 = vmatprep.subr.bf16.mxu0 %v892_v10 }
  0x15   :  { %860 = vmatprep.subr.bf16.mxu1 %v893_v11 }
  0x17   :  { %829 = vmatpush3.bf16.msra.mxu0 %v892_v10 }
  0x18   :  { %861 = vmatpush3.bf16.msra.mxu1 %v893_v11  ;;  %830 = vmatprep.subr.bf16.mxu0 %v894_v14 }
  0x19   :  { %862 = vmatprep.subr.bf16.mxu1 %v895_v15 }
  0x1b   :  { %831 = vmatpush3.bf16.msra.mxu0 %v894_v14 }
  0x1c   :  { %863 = vmatpush3.bf16.msra.mxu1 %v895_v15  ;;  %832 = vmatprep.subr.bf16.mxu0 %v896_v16 }
  0x1d   :  { %864 = vmatprep.subr.bf16.mxu1 %v897_v17 }
  0x1f   :  { %833 = vmatpush3.bf16.msra.mxu0 %v896_v16 }
  0x20   :  { %865 = vmatpush3.bf16.msra.mxu1 %v897_v17 }
  0x22   :  { %835 = vmatmul.mubr.bf16.vlgmr.msra.gmra.mxu0 %v900_v18 }
  0x23   :  { %867 = vmatmul.mubr.bf16.vlgmr.msra.gmra.mxu1 %v901_v19  ;;  %838 = vmatprep.mubr.bf16.mxu0 %v902_v20 }
  0x24   :  { %870 = vmatprep.mubr.bf16.mxu1 %v903_v21 }
  0x2a   :  { %839 = vmatmul.mubr.bf16.gmra.mxu0 %v904_v22 }
  0x2b   :  { %871 = vmatmul.mubr.bf16.gmra.mxu1 %v905_v23  ;;  %842 = vmatprep.mubr.bf16.mxu0 %v906_v24 }
  0x2c   :  { %874 = vmatprep.mubr.bf16.mxu1 %v907_v25 }
  0x32   :  { %843 = vmatmul.mubr.bf16.gmra.mxu0 %v908_v26 }
  0x33   :  { %875 = vmatmul.mubr.bf16.gmra.mxu1 %v909_v27  ;;  %846 = vmatprep.mubr.bf16.mxu0 %v910_v28 }
  0x34   :  { %878 = vmatprep.mubr.bf16.mxu1 %v911_v29 }
  0x3a   :  { %847 = vmatmul.mubr.bf16.gmra.mxu0 %v912_v30 }
  0x3b   :  { %879 = vmatmul.mubr.bf16.gmra.mxu1 %v913_v31 }
  0xe2   :  { %v1059_v32 = vpop.f32.mrf.mxu0 }
  0xe3   :  { %v1061_v33 = vpop.f32.mrf.mxu1  ;;  %v280_v47 = vmul.f32 %v1059_v32, %v1059_v32 }
  0xe4   :  { %v1063_v34 = vpop.f32.mrf.mxu0  ;;  %v616_v51 = vmul.f32 %v1061_v33, %v1061_v33 }
  0xe5   :  { %v1065_v35 = vpop.f32.mrf.mxu1  ;;  %v278_v39 = vmul.f32 %v1063_v34, %v1063_v34 }
  0xe6   :  { %v1067_v36 = vpop.f32.mrf.mxu0  ;;  %v614_v43 = vmul.f32 %v1065_v35, %v1065_v35 }
  0xe7   :  { %v1069_v37 = vpop.f32.mrf.mxu1  ;;  %v281_v55 = vmul.f32 %v1067_v36, %v1067_v36 }
  0xe8   :  { %v1071_v38 = vpop.f32.mrf.mxu0  ;;  %v617_v59 = vmul.f32 %v1069_v37, %v1069_v37 }
  0xe9   :  { %v257_v40 = vadd.f32 %v1071_v38, %v1063_v34  ;;  %v279_v41 = vmul.f32 %v1071_v38, %v1071_v38  ;;  %v1079_v42 = vpop.f32.mrf.mxu1 }
  0xea   :  { %v593_v44 = vadd.f32 %v1079_v42, %v1065_v35  ;;  %v615_v45 = vmul.f32 %v1079_v42, %v1079_v42  ;;  %v1087_v46 = vpop.f32.mrf.mxu0 }
  0xeb   :  { %v258_v48 = vadd.f32 %v1059_v32, %v257_v40  ;;  %v294_v49 = vadd.f32 %v279_v41, %v278_v39  ;;  %v1092_v50 = vpop.f32.mrf.mxu1  ;;  %v284_v15 = vmul.f32 %v1087_v46, %v1087_v46 }
  0xec   :  { %v594_v52 = vadd.f32 %v1061_v33, %v593_v44  ;;  %v630_v53 = vadd.f32 %v615_v45, %v614_v43  ;;  %v1097_v54 = vpop.f32.mrf.mxu0  ;;  %v620_v19 = vmul.f32 %v1092_v50, %v1092_v50 }
  0xed   :  { %v295_v56 = vadd.f32 %v294_v49, %v280_v47  ;;  %v259_v57 = vadd.f32 %v1067_v36, %v258_v48  ;;  %v1102_v58 = vpop.f32.mrf.mxu1  ;;  %v282_v0 = vmul.f32 %v1097_v54, %v1097_v54 }
  0xee   :  { %v631_v60 = vadd.f32 %v630_v53, %v616_v51  ;;  %v595_v61 = vadd.f32 %v1069_v37, %v594_v52  ;;  %v1107_v62 = vpop.f32.mrf.mxu0  ;;  %v618_v4 = vmul.f32 %v1102_v58, %v1102_v58 }
  0xef   :  { %v260_v63 = vadd.f32 %v259_v57, %v1097_v54  ;;  %v296_v1 = vadd.f32 %v295_v56, %v281_v55  ;;  %v1112_v2 = vpop.f32.mrf.mxu1  ;;  %v285_v23 = vmul.f32 %v1107_v62, %v1107_v62 }
  0xf0   :  { %v596_v3 = vadd.f32 %v595_v61, %v1102_v58  ;;  %v632_v5 = vadd.f32 %v631_v60, %v617_v59  ;;  %v1117_v6 = vpop.f32.mrf.mxu0  ;;  %v621_v27 = vmul.f32 %v1112_v2, %v1112_v2 }
  0xf1   :  { %v297_v7 = vadd.f32 %v296_v1, %v282_v0  ;;  %v261_v8 = vadd.f32 %v260_v63, %v1117_v6  ;;  %v283_v9 = vmul.f32 %v1117_v6, %v1117_v6  ;;  %v1122_v10 = vpop.f32.mrf.mxu1 }
  0xf2   :  { %v633_v11 = vadd.f32 %v632_v5, %v618_v4  ;;  %v597_v12 = vadd.f32 %v596_v3, %v1122_v10  ;;  %v619_v13 = vmul.f32 %v1122_v10, %v1122_v10  ;;  %v1127_v14 = vpop.f32.mrf.mxu0 }
  0xf3   :  { %v262_v16 = vadd.f32 %v1087_v46, %v261_v8  ;;  %v298_v17 = vadd.f32 %v297_v7, %v283_v9  ;;  %v1132_v18 = vpop.f32.mrf.mxu1  ;;  %v288_v59 = vmul.f32 %v1127_v14, %v1127_v14 }
  0xf4   :  { %v598_v20 = vadd.f32 %v1092_v50, %v597_v12  ;;  %v634_v21 = vadd.f32 %v633_v11, %v619_v13  ;;  %v1137_v22 = vpop.f32.mrf.mxu0  ;;  %v624_v0 = vmul.f32 %v1132_v18, %v1132_v18 }
  0xf5   :  { %v299_v24 = vadd.f32 %v298_v17, %v284_v15  ;;  %v263_v25 = vadd.f32 %v1107_v62, %v262_v16  ;;  %v1142_v26 = vpop.f32.mrf.mxu1  ;;  %v286_v39 = vmul.f32 %v1137_v22, %v1137_v22 }
  0xf6   :  { %v635_v28 = vadd.f32 %v634_v21, %v620_v19  ;;  %v599_v29 = vadd.f32 %v1112_v2, %v598_v20  ;;  %v1147_v30 = vpop.f32.mrf.mxu0  ;;  %v622_v44 = vmul.f32 %v1142_v26, %v1142_v26 }
  0xf7   :  { %v264_v31 = vadd.f32 %v263_v25, %v1137_v22  ;;  %v300_v40 = vadd.f32 %v299_v24, %v285_v23  ;;  %v1152_v41 = vpop.f32.mrf.mxu1  ;;  %v289_v5 = vmul.f32 %v1147_v30, %v1147_v30 }
  0xf8   :  { %v600_v43 = vadd.f32 %v599_v29, %v1142_v26  ;;  %v636_v45 = vadd.f32 %v635_v28, %v621_v27  ;;  %v1157_v47 = vpop.f32.mrf.mxu0  ;;  %v625_v11 = vmul.f32 %v1152_v41, %v1152_v41 }
  0xf9   :  { %v301_v48 = vadd.f32 %v300_v40, %v286_v39  ;;  %v265_v49 = vadd.f32 %v264_v31, %v1157_v47  ;;  %v287_v51 = vmul.f32 %v1157_v47, %v1157_v47  ;;  %v1162_v52 = vpop.f32.mrf.mxu1 }
  0xfa   :  { %v637_v53 = vadd.f32 %v636_v45, %v622_v44  ;;  %v601_v55 = vadd.f32 %v600_v43, %v1162_v52  ;;  %v623_v56 = vmul.f32 %v1162_v52, %v1162_v52  ;;  %v1167_v57 = vpop.f32.mrf.mxu0 }
  0xfb   :  { %v266_v60 = vadd.f32 %v1127_v14, %v265_v49  ;;  %v302_v61 = vadd.f32 %v301_v48, %v287_v51  ;;  %v1172_v63 = vpop.f32.mrf.mxu1  ;;  %v292_v44 = vmul.f32 %v1167_v57, %v1167_v57 }
  0xfc   :  { %v602_v1 = vadd.f32 %v1132_v18, %v601_v55  ;;  %v638_v3 = vadd.f32 %v637_v53, %v623_v56  ;;  %v1177_v4 = vpop.f32.mrf.mxu0  ;;  %v628_v49 = vmul.f32 %v1172_v63, %v1172_v63 }
  0xfd   :  { %v303_v7 = vadd.f32 %v302_v61, %v288_v59  ;;  %v267_v8 = vadd.f32 %v1147_v30, %v266_v60  ;;  %v1182_v9 = vpop.f32.mrf.mxu1  ;;  %v290_v17 = vmul.f32 %v1177_v4, %v1177_v4 }
  0xfe   :  { %v639_v12 = vadd.f32 %v638_v3, %v624_v0  ;;  %v603_v13 = vadd.f32 %v1152_v41, %v602_v1  ;;  %v1187_v15 = vpop.f32.mrf.mxu0  ;;  %v626_v23 = vmul.f32 %v1182_v9, %v1182_v9 }
  0xff   :  { %v268_v16 = vadd.f32 %v267_v8, %v1177_v4  ;;  %v304_v19 = vadd.f32 %v303_v7, %v289_v5  ;;  %v1192_v20 = vpop.f32.mrf.mxu1  ;;  %v293_v55 = vmul.f32 %v1187_v15, %v1187_v15 }
 0x100   :  { %v604_v21 = vadd.f32 %v603_v13, %v1182_v9  ;;  %v640_v24 = vadd.f32 %v639_v12, %v625_v11  ;;  %v1197_v25 = vpop.f32.mrf.mxu0  ;;  %v629_v60 = vmul.f32 %v1192_v20, %v1192_v20 }
 0x101   :  { %v305_v27 = vadd.f32 %v304_v19, %v290_v17  ;;  %v269_v28 = vadd.f32 %v268_v16, %v1197_v25  ;;  %v291_v29 = vmul.f32 %v1197_v25, %v1197_v25  ;;  %v1202_v31 = vpop.f32.mrf.mxu1 }
 0x102   :  { %v641_v39 = vadd.f32 %v640_v24, %v626_v23  ;;  %v605_v40 = vadd.f32 %v604_v21, %v1202_v31  ;;  %v627_v43 = vmul.f32 %v1202_v31, %v1202_v31 }
 0x103   :  { %v270_v45 = vadd.f32 %v1167_v57, %v269_v28  ;;  %v306_v48 = vadd.f32 %v305_v27, %v291_v29 }
 0x104   :  { %v606_v51 = vadd.f32 %v1172_v63, %v605_v40  ;;  %v642_v53 = vadd.f32 %v641_v39, %v627_v43 }
 0x105   :  { %v271_v56 = vadd.f32 %v1187_v15, %v270_v45  ;;  %v307_v59 = vadd.f32 %v306_v48, %v292_v44 }
 0x106   :  { %v607_v61 = vadd.f32 %v1192_v20, %v606_v51  ;;  %v643_v0 = vadd.f32 %v642_v53, %v628_v49 }
 0x107   :  { %v272_v1 = vrot.slane %v271_v56, 4  ;;  %v308_v3 = vadd.f32 %v307_v59, %v293_v55 }
 0x108   :  { %v608_v5 = vrot.slane %v607_v61, 4  ;;  %v644_v7 = vadd.f32 %v643_v0, %v629_v60 }
 0x109   :  { %v273_v8 = vadd.f32 %v272_v1, %v271_v56  ;;  %v309_v11 = vrot.slane %v308_v3, 4 }
 0x10a   :  { %v609_v12 = vadd.f32 %v608_v5, %v607_v61  ;;  %v645_v13 = vrot.slane %v644_v7, 4 }
 0x10b   :  { %v274_v16 = vrot.slane %v273_v8, 2  ;;  %v310_v17 = vadd.f32 %v309_v11, %v308_v3 }
 0x10c   :  { %v610_v19 = vrot.slane %v609_v12, 2  ;;  %v646_v21 = vadd.f32 %v645_v13, %v644_v7 }
 0x10d   :  { %v275_v23 = vadd.f32 %v274_v16, %v273_v8  ;;  %v311_v24 = vrot.slane %v310_v17, 2  ;;  %v324_v8 = vlaneseq  ;;  %v591_v16 = vld [vmem:[%s1319_s6] sm:$0x1] }
 0x10e   :  { %v611_v27 = vadd.f32 %v610_v19, %v609_v12  ;;  %v647_v28 = vrot.slane %v646_v21, 2  ;;  %v255_v12 = vld [vmem:[%s1318_s2] sm:$0x1] }
 0x10f   :  { %v276_v29 = vrot.slane %v275_v23, 1  ;;  %v312_v39 = vadd.f32 %v311_v24, %v310_v17  ;;  %v325_v11 = vshrl.u32 %v324_v8, 7 }
 0x110   :  { %v612_v40 = vrot.slane %v611_v27, 1  ;;  %v648_v43 = vadd.f32 %v647_v28, %v646_v21 }
 0x111   :  { %v277_v44 = vadd.f32 %v276_v29, %v275_v23  ;;  %v313_v45 = vrot.slane %v312_v39, 1  ;;  %v326_v13 = vsub.s32 0, %v325_v11  ;;  %v256_v23 = vld [vmem:[%s1320_s3] sm:$0x1] }
 0x112   :  { %v613_v48 = vadd.f32 %v612_v40, %v611_v27  ;;  %v649_v49 = vrot.slane %v648_v43, 1 }
 0x113   :  { %v314_v51 = vadd.f32 %v313_v45, %v312_v39  ;;  %v315_v53 = vmul.f32 0.0078125, %v277_v44 }
 0x114   :  { %v650_v55 = vadd.f32 %v649_v49, %v648_v43  ;;  %v651_v56 = vmul.f32 0.0078125, %v613_v48 }
 0x115   :  { %v316_v59 = vmul.f32 0.0078125, %v314_v51  ;;  %v317_v60 = vmul.f32 %v315_v53, %v315_v53 }
 0x116   :  { %v652_v61 = vmul.f32 0.0078125, %v650_v55  ;;  %v653_v0 = vmul.f32 %v651_v56, %v651_v56 }
 0x117   :  { %v318_v1 = vsub.f32 %v316_v59, %v317_v60 }
 0x118   :  { %v654_v3 = vsub.f32 %v652_v61, %v653_v0 }
 0x119   :  { %v319_v5 = vadd.f32 1e-05, %v318_v1 }
 0x11a   :  { %v655_v7 = vadd.f32 1e-05, %v654_v3 }
 0x11b   :  { %914 = vrsqrt.f32 %v319_v5 }
 0x11c   :  { %916 = vrsqrt.f32 %v655_v7 }
 0x128   :  { %v915_v17 = vpop.eup %914 }
 0x129   :  { %v917_v19 = vpop.eup %916  ;;  %v321_v21 = vmul.f32 %v915_v17, %v255_v12 }
 0x12a   :  { %v657_v24 = vmul.f32 %v917_v19, %v591_v16 }
 0x12b   :  { %v322_v27 = vmul.f32 %v321_v21, %v315_v53  ;;  %v327_v28 = vrot.slane %v321_v21, %v326_v13 }
 0x12c   :  { %v658_v39 = vmul.f32 %v657_v24, %v651_v56  ;;  %v663_v45 = vrot.slane %v657_v24, %v326_v13 }
 0x12d   :  { %v323_v29 = vsub.f32 %v256_v23, %v322_v27  ;;  %v341_v40 = vmul.f32 %v327_v28, %v1197_v25  ;;  %v328_v43 = vmul.f32 %v327_v28, %v1063_v34  ;;  %v329_v44 = vmul.f32 %v327_v28, %v1071_v38 }
 0x12e   :  { %v330_v49 = vmul.f32 %v1059_v32, %v327_v28  ;;  %v331_v51 = vmul.f32 %v1067_v36, %v327_v28  ;;  %v332_v55 = vmul.f32 %v327_v28, %v1097_v54  ;;  %v333_v59 = vmul.f32 %v327_v28, %v1117_v6 }
 0x12f   :  { %v348_v48 = vrot.slane %v323_v29, %v326_v13  ;;  %v334_v53 = vmul.f32 %v1087_v46, %v327_v28  ;;  %v335_v56 = vmul.f32 %v1107_v62, %v327_v28  ;;  %v336_v25 = vmul.f32 %v327_v28, %v1137_v22  ;;  %v592_v46 = vld [vmem:[%s1321_s7] sm:$0x1] }
 0x130   :  { %v337_v34 = vmul.f32 %v327_v28, %v1157_v47  ;;  %v338_v38 = vmul.f32 %v1127_v14, %v327_v28  ;;  %v339_v60 = vmul.f32 %v1147_v30, %v327_v28  ;;  %v340_v32 = vmul.f32 %v327_v28, %v1177_v4 }
 0x131   :  { %v1242_v61 = vadd.f32 %v348_v48, %v341_v40  ;;  %v342_v36 = vmul.f32 %v1167_v57, %v327_v28  ;;  %v343_v54 = vmul.f32 %v1187_v15, %v327_v28  ;;  %v350_v6 = vadd.f32 %v348_v48, %v328_v43 }
 0x132   :  { %v351_v62 = vadd.f32 %v348_v48, %v329_v44  ;;  %v352_v22 = vadd.f32 %v348_v48, %v330_v49  ;;  %v353_v47 = vadd.f32 %v348_v48, %v331_v51  ;;  %v354_v0 = vadd.f32 %v348_v48, %v332_v55 }
 0x133   :  { %v355_v14 = vadd.f32 %v348_v48, %v333_v59  ;;  %v356_v1 = vadd.f32 %v348_v48, %v334_v53  ;;  %v357_v30 = vadd.f32 %v348_v48, %v335_v56  ;;  %v358_v3 = vadd.f32 %v348_v48, %v336_v25 }
 0x134   :  { %v359_v4 = vadd.f32 %v348_v48, %v337_v34  ;;  %v360_v5 = vadd.f32 %v348_v48, %v338_v38  ;;  %v361_v7 = vadd.f32 %v348_v48, %v339_v60  ;;  %v659_v8 = vsub.f32 %v592_v46, %v658_v39 }
 0x135   :  { %v362_v57 = vadd.f32 %v348_v48, %v340_v32  ;;  %v364_v11 = vadd.f32 %v348_v48, %v342_v36  ;;  %v365_v15 = vadd.f32 %v348_v48, %v343_v54  ;;  %v664_v12 = vmul.f32 %v663_v45, %v1065_v35 }
 0x136   :  { %v665_v16 = vmul.f32 %v663_v45, %v1079_v42  ;;  %v666_v17 = vmul.f32 %v1061_v33, %v663_v45  ;;  %v667_v19 = vmul.f32 %v1069_v37, %v663_v45  ;;  %v668_v21 = vmul.f32 %v663_v45, %v1102_v58 }
 0x137   :  { %v669_v23 = vmul.f32 %v663_v45, %v1122_v10  ;;  %v670_v24 = vmul.f32 %v1092_v50, %v663_v45  ;;  %v671_v27 = vmul.f32 %v1112_v2, %v663_v45  ;;  %v672_v28 = vmul.f32 %v663_v45, %v1142_v26 }
 0x138   :  { %v673_v29 = vmul.f32 %v663_v45, %v1162_v52  ;;  %v674_v35 = vmul.f32 %v1132_v18, %v663_v45  ;;  %v675_v42 = vmul.f32 %v1152_v41, %v663_v45  ;;  %v684_v39 = vrot.slane %v659_v8, %v326_v13 }
 0x139   :  { %v676_v33 = vmul.f32 %v663_v45, %v1182_v9  ;;  %v677_v37 = vmul.f32 %v663_v45, %v1202_v31  ;;  %v678_v58 = vmul.f32 %v1172_v63, %v663_v45  ;;  %v679_v10 = vmul.f32 %v1192_v20, %v663_v45 }
 0x13a   :  { %v686_v50 = vadd.f32 %v684_v39, %v664_v12  ;;  %v687_v40 = vadd.f32 %v684_v39, %v665_v16  ;;  %v688_v2 = vadd.f32 %v684_v39, %v666_v17  ;;  %v689_v43 = vadd.f32 %v684_v39, %v667_v19 }
 0x13b   :  { %v690_v26 = vadd.f32 %v684_v39, %v668_v21  ;;  %v691_v44 = vadd.f32 %v684_v39, %v669_v23  ;;  %v692_v52 = vadd.f32 %v684_v39, %v670_v24  ;;  %v693_v48 = vadd.f32 %v684_v39, %v671_v27 }
 0x13c   :  { %v694_v18 = vadd.f32 %v684_v39, %v672_v28  ;;  %v695_v49 = vadd.f32 %v684_v39, %v673_v29  ;;  %v696_v41 = vadd.f32 %v684_v39, %v674_v35  ;;  %v697_v13 = vadd.f32 %v684_v39, %v675_v42 }
 0x13d   :  { %v698_v51 = vadd.f32 %v684_v39, %v676_v33  ;;  %v699_v9 = vadd.f32 %v684_v39, %v677_v37  ;;  %v700_v55 = vadd.f32 %v684_v39, %v678_v58  ;;  %v701_v31 = vadd.f32 %v684_v39, %v679_v10 }
 0x13e   :  { %v702_v59 = vadd.f32 %v686_v50, %v350_v6  ;;  %v703_v63 = vadd.f32 %v687_v40, %v351_v62  ;;  %v704_v53 = vadd.f32 %v688_v2, %v352_v22  ;;  %v705_v20 = vadd.f32 %v689_v43, %v353_v47 }
 0x13f   :  { %v706_v45 = vadd.f32 %v690_v26, %v354_v0  ;;  %v707_v56 = vadd.f32 %v691_v44, %v355_v14  ;;  %v708_v25 = vadd.f32 %v692_v52, %v356_v1  ;;  %v709_v34 = vadd.f32 %v693_v48, %v357_v30 }
 0x140   :  { %v710_v38 = vadd.f32 %v694_v18, %v358_v3  ;;  %v711_v60 = vadd.f32 %v695_v49, %v359_v4  ;;  %v712_v32 = vadd.f32 %v696_v41, %v360_v5  ;;  %v713_v36 = vadd.f32 %v697_v13, %v361_v7 }
 0x141   :  { %v714_v54 = vadd.f32 %v698_v51, %v362_v57  ;;  %v715_v46 = vadd.f32 %v699_v9, %v1242_v61  ;;  %v716_v8 = vadd.f32 %v700_v55, %v364_v11  ;;  %v717_v12 = vadd.f32 %v701_v31, %v365_v15 }
 0x142   :  { %v718_v16 = vmax.f32 %v702_v59, 0.0  ;;  %v719_v17 = vmax.f32 %v703_v63, 0.0  ;;  %v720_v19 = vmax.f32 %v704_v53, 0.0  ;;  %v721_v6 = vmax.f32 %v705_v20, 0.0 }
 0x143   :  { %v722_v62 = vmax.f32 %v706_v45, 0.0  ;;  %v723_v22 = vmax.f32 %v707_v56, 0.0  ;;  %v724_v47 = vmax.f32 %v708_v25, 0.0  ;;  %v725_v0 = vmax.f32 %v709_v34, 0.0 }
 0x144   :  { %v726_v14 = vmax.f32 %v710_v38, 0.0  ;;  %v727_v1 = vmax.f32 %v711_v60, 0.0  ;;  %v728_v30 = vmax.f32 %v712_v32, 0.0  ;;  %v729_v3 = vmax.f32 %v713_v36, 0.0  ;;  %734 = vst [vmem:[%s1322_s8] sm:$0xff] %v718_v16  ;;  %735 = vst [vmem:[%s1322_s8 + $0x8] sm:$0xff] %v719_v17 }
 0x145   :  { %736 = vst [vmem:[%s1322_s8 + $0x10] sm:$0xff] %v720_v19  ;;  %737 = vst [vmem:[%s1322_s8 + $0x18] sm:$0xff] %v721_v6  ;;  %v730_v61 = vmax.f32 %v714_v54, 0.0  ;;  %v731_v4 = vmax.f32 %v715_v46, 0.0  ;;  %v732_v5 = vmax.f32 %v716_v8, 0.0  ;;  %v733_v7 = vmax.f32 %v717_v12, 0.0 }
 0x146   :  { %738 = vst [vmem:[%s1322_s8 + $0x20] sm:$0xff] %v722_v62  ;;  %739 = vst [vmem:[%s1322_s8 + $0x28] sm:$0xff] %v723_v22 }
 0x147   :  { %740 = vst [vmem:[%s1322_s8 + $0x30] sm:$0xff] %v724_v47  ;;  %741 = vst [vmem:[%s1322_s8 + $0x38] sm:$0xff] %v725_v0 }
 0x148   :  { %742 = vst [vmem:[%s1322_s8 + $0x40] sm:$0xff] %v726_v14  ;;  %743 = vst [vmem:[%s1322_s8 + $0x48] sm:$0xff] %v727_v1 }
 0x149   :  { %744 = vst [vmem:[%s1322_s8 + $0x50] sm:$0xff] %v728_v30  ;;  %745 = vst [vmem:[%s1322_s8 + $0x58] sm:$0xff] %v729_v3 }
 0x14a   :  { %746 = vst [vmem:[%s1322_s8 + $0x60] sm:$0xff] %v730_v61  ;;  %747 = vst [vmem:[%s1322_s8 + $0x68] sm:$0xff] %v731_v4 }
 0x14b   :  { %748 = vst [vmem:[%s1322_s8 + $0x70] sm:$0xff] %v732_v5  ;;  %749 = vst [vmem:[%s1322_s8 + $0x78] sm:$0xff] %v733_v7 }

</bundles_post_ra>
